<compile_context>
chip_gen: v6e
topology: v6e:2x2x1
jax: 0.10.0
libtpu: 0.0.40
codegen_flags: <defaults>
</compile_context>

<pallas_src>
import functools

import jax
import jax.numpy as jnp
from jax import lax
from jax.experimental import pallas as pl
from jax.experimental.pallas import tpu as pltpu


def _pblstm_kernel(minlen_ref, lens_ref, xf_ref, xb_ref,
                   wih_f_ref, wih_b_ref, whh_ref, b_f_ref, b_b_ref,
                   out_f_ref, out_b_ref,
                   h_f, c_f, h_b, c_b, gf, gb,
                   *, hidden_dim, chunk, batch_pad, unroll):
    """One time-chunk of the bidirectional LSTM recurrence.

    minlen_ref : (1,) int32 SMEM   min effective length over real batch rows
    lens_ref   : (BP, 1) int32     effective (packing) lengths, padded rows = 0
    xf_ref     : (TC*BP, 2F) bf16  forward chunk i        (time-major, flattened)
    xb_ref     : (TC*BP, 2F) bf16  backward chunk n-1-i
    wih_*      : (2F, 4H) bf16     gate columns reordered to [i, f, o, g]
    whh_ref    : (2H, 8H) bf16     block-diag(W_hh_f, W_hh_b), same reorder
    b_*        : (1, 4H)  f32
    out_*      : (TC, BP, H) f32
    h/c        : (BP, H) f32 persistent state scratch (one pair per direction)
    gf/gb      : (TC*BP, 4H) bf16  hoisted input projections
    """
    H = hidden_dim
    TC = chunk
    BP = batch_pad
    i = pl.program_id(0)
    n = pl.num_programs(0)
    lens = lens_ref[...]                                   # (BP, 1) int32
    min_len = minlen_ref[0]

    @pl.when(i == 0)
    def _():
        h_f[...] = jnp.zeros_like(h_f)
        c_f[...] = jnp.zeros_like(c_f)
        h_b[...] = jnp.zeros_like(h_b)
        c_b[...] = jnp.zeros_like(c_b)

    # ---- hoisted input projection: one large MXU matmul per direction ----
    # bias folded in, stored as bf16 (largest VMEM scratch -> halved).
    gf[...] = (jnp.dot(xf_ref[...], wih_f_ref[...],
                       preferred_element_type=jnp.float32)
               + b_f_ref[...]).astype(jnp.bfloat16)
    gb[...] = (jnp.dot(xb_ref[...], wih_b_ref[...],
                       preferred_element_type=jnp.float32)
               + b_b_ref[...]).astype(jnp.bfloat16)

    t0_f = i * TC                 # global time of local step 0 (forward chunk)
    t0_b = (n - 1 - i) * TC       # global time of local step 0 (backward chunk)

    def cell(gates, h_ref, c_ref, t, masked):
        # gate columns: [i | f | o | g]  -> one contiguous sigmoid slab and
        # one tanh slab per direction.
        sig = jax.nn.sigmoid(gates[:, :3 * H])
        g_g = jnp.tanh(gates[:, 3 * H:])
        i_g = sig[:, 0 * H:1 * H]
        f_g = sig[:, 1 * H:2 * H]
        o_g = sig[:, 2 * H:3 * H]
        c_new = f_g * c_ref[...] + i_g * g_g
        h_new = o_g * jnp.tanh(c_new)
        if masked:
            mask = t < lens                                # (BP, 1) packing mask
            h_ref[...] = jnp.where(mask, h_new, h_ref[...])  # freeze past len
            c_ref[...] = jnp.where(mask, c_new, c_ref[...])
            return jnp.where(mask, h_new, 0.0)             # zero-pad past len
        h_ref[...] = h_new
        c_ref[...] = c_new
        return h_new

    def make_body(masked):
        def body(s, carry):
            # ---- one fused recurrent matmul for BOTH directions ----
            h_cat = jnp.concatenate([h_f[...], h_b[...]], axis=1)      # (BP, 2H)
            rec = jnp.dot(h_cat.astype(jnp.bfloat16), whh_ref[...],
                          preferred_element_type=jnp.float32)          # (BP, 8H)

            # forward direction: local step s
            rf = pl.multiple_of(s * BP, BP)
            gates_f = gf[pl.ds(rf, BP), :] + rec[:, :4 * H]
            out_f_ref[s] = cell(gates_f, h_f, c_f, t0_f + s, masked)

            # backward direction: local step TC-1-s (interleaved)
            sb = TC - 1 - s
            rb = pl.multiple_of(sb * BP, BP)
            gates_b = gb[pl.ds(rb, BP), :] + rec[:, 4 * H:]
            out_b_ref[sb] = cell(gates_b, h_b, c_b, t0_b + sb, masked)
            return carry
        return body

    # Fast path: every time step touched by this grid step (both directions)
    # lies below min(effective length), so the packing mask is a no-op.
    fast = (jnp.maximum(t0_f, t0_b) + TC) <= min_len

    @pl.when(fast)
    def _():
        lax.fori_loop(0, TC, make_body(False), 0, unroll=unroll)

    @pl.when(jnp.logical_not(fast))
    def _():
        lax.fori_loop(0, TC, make_body(True), 0, unroll=unroll)


def make_params(input_dim, hidden_dim, key):
    """Deterministic init matching nn.LSTM(input_dim*2, hidden_dim, bidirectional).
    PyTorch layout: (4H, in) with gate order i, f, g, o."""
    F2 = input_dim * 2
    H = hidden_dim
    bound = 1.0 / float(jnp.sqrt(jnp.float32(H)))
    keys = jax.random.split(key, 8)

    def u(k, shape):
        return jax.random.uniform(k, shape, jnp.float32, -bound, bound)

    return dict(
        w_ih_f=u(keys[0], (4 * H, F2)), w_hh_f=u(keys[1], (4 * H, H)),
        b_ih_f=u(keys[2], (4 * H,)),    b_hh_f=u(keys[3], (4 * H,)),
        w_ih_b=u(keys[4], (4 * H, F2)), w_hh_b=u(keys[5], (4 * H, H)),
        b_ih_b=u(keys[6], (4 * H,)),    b_hh_b=u(keys[7], (4 * H,)),
    )


def _vmem_capacity_bytes():
    """Physical per-core VMEM (generation-aware); conservative fallback."""
    try:
        info = pltpu.get_tpu_info()
        cap = getattr(info, "vmem_capacity_bytes", None)
        if cap:
            return int(cap)
    except Exception:
        pass
    return 64 * 1024 * 1024        # v7x-sized conservative default


def _reorder_gates(w, H):
    """PyTorch gate order [i, f, g, o] -> [i, f, o, g] along the leading 4H axis."""
    return w.reshape((4, H) + w.shape[1:])[jnp.array([0, 1, 3, 2])].reshape(w.shape)


def pblstm_forward(x, input_lengths, params, hidden_dim, *, max_chunk=None):
    B, T, F = x.shape
    assert T % 2 == 0, "pBLSTM requires an even number of time steps"
    T2 = T // 2
    H = hidden_dim
    F2 = 2 * F

    # Returned lengths: (L - 1) / 2 + 1  (float, exactly as the PyTorch module).
    out_lengths = (input_lengths.astype(jnp.float32) - 1.0) / 2.0 + 1.0
    # Effective packing lengths: int truncation; pack_padded_sequence is fed
    # lengths[0] = T//2 (assumes sorted-descending lengths, enforce_sorted=True).
    eff = out_lengths.astype(jnp.int32)
    eff = eff.at[0].set(T2)
    min_len = jnp.min(eff).reshape(1).astype(jnp.int32)   # scalar-prefetch operand

    # Batch padded to a multiple of 16 so per-step loads from the packed bf16
    # gate scratch stay tile-aligned (bf16 packs 16 sublanes per vreg).
    B_pad = ((B + 15) // 16) * 16

    # ---- generation-aware chunk size: fit the pipeline in a VMEM budget ----
    vmem_cap = _vmem_capacity_bytes()
    per_tc = B_pad * (2 * 2 * F2 * 2      # xf/xb chunks, double-buffered, bf16
                      + 2 * 2 * H * 4     # out_f/out_b chunks, double-buffered, f32
                      + 2 * 4 * H * 2)    # gf/gb hoisted gate scratch, bf16
    const = (2 * F2 * 4 * H * 2           # W_ih fwd/bwd
             + (2 * H) * (8 * H) * 2      # block-diag W_hh
             + 2 * 4 * H * 4              # biases
             + 4 * B_pad * H * 4          # h/c state scratch
             + B_pad * 4)                 # lens
    budget = int(vmem_cap * 0.70) - const
    tc_cap = max(1, budget // per_tc)
    if max_chunk is not None:
        tc_cap = min(tc_cap, max_chunk)
    TC = min(T2, tc_cap)
    if TC >= 4:
        TC -= TC % 4
    elif TC >= 2:
        TC -= TC % 2
    TC = max(TC, 1)
    n_chunks = pl.cdiv(T2, TC)
    T2p = n_chunks * TC

    # Adaptive unroll: more unroll when the per-step gate footprint is small.
    if TC % 4 == 0 and B_pad * 4 * H * 4 <= 8 * 4096:
        unroll = 4
    elif TC % 2 == 0:
        unroll = 2
    else:
        unroll = 1

    # ---- layout: bf16 *before* transpose/pad, time-major, batch padded ----
    x2 = x.reshape(B, T2, F2).astype(jnp.bfloat16)
    x_tm = jnp.transpose(x2, (1, 0, 2))                       # (T2, B, 2F)
    x_tm = jnp.pad(x_tm, ((0, T2p - T2), (0, B_pad - B), (0, 0)))
    x_flat = x_tm.reshape(T2p * B_pad, F2)

    # Padded batch rows get length 0 -> masked on the slow path; their outputs
    # are sliced away in all cases.
    lens = jnp.zeros((B_pad, 1), jnp.int32).at[:B, 0].set(eff)

    # Weights: permute gate columns to [i, f, o, g], pre-transpose to (in, 4H),
    # and fuse both directions' recurrent weights into one block-diag (2H, 8H).
    wih_f = _reorder_gates(params["w_ih_f"], H).T.astype(jnp.bfloat16)   # (2F, 4H)
    wih_b = _reorder_gates(params["w_ih_b"], H).T.astype(jnp.bfloat16)
    whh_f = _reorder_gates(params["w_hh_f"], H).T.astype(jnp.bfloat16)   # (H, 4H)
    whh_b = _reorder_gates(params["w_hh_b"], H).T.astype(jnp.bfloat16)
    z = jnp.zeros((H, 4 * H), jnp.bfloat16)
    whh_bd = jnp.concatenate(
        [jnp.concatenate([whh_f, z], axis=1),
         jnp.concatenate([z, whh_b], axis=1)], axis=0)                    # (2H, 8H)
    b_f = _reorder_gates(params["b_ih_f"] + params["b_hh_f"], H)
    b_f = b_f.astype(jnp.float32).reshape(1, 4 * H)
    b_b = _reorder_gates(params["b_ih_b"] + params["b_hh_b"], H)
    b_b = b_b.astype(jnp.float32).reshape(1, 4 * H)

    kernel = functools.partial(_pblstm_kernel, hidden_dim=H, chunk=TC,
                               batch_pad=B_pad, unroll=unroll)
    const2 = lambda i, ml: (0, 0)

    grid_spec = pltpu.PrefetchScalarGridSpec(
        num_scalar_prefetch=1,
        grid=(n_chunks,),
        in_specs=[
            pl.BlockSpec((B_pad, 1), const2),                            # lens
            pl.BlockSpec((TC * B_pad, F2), lambda i, ml: (i, 0)),        # x, fwd
            pl.BlockSpec((TC * B_pad, F2),
                         lambda i, ml: (n_chunks - 1 - i, 0)),           # x, bwd
            pl.BlockSpec((F2, 4 * H), const2),                           # W_ih fwd
            pl.BlockSpec((F2, 4 * H), const2),                           # W_ih bwd
            pl.BlockSpec((2 * H, 8 * H), const2),                        # W_hh blkdiag
            pl.BlockSpec((1, 4 * H), const2),                            # bias fwd
            pl.BlockSpec((1, 4 * H), const2),                            # bias bwd
        ],
        out_specs=[
            pl.BlockSpec((TC, B_pad, H), lambda i, ml: (i, 0, 0)),
            pl.BlockSpec((TC, B_pad, H), lambda i, ml: (n_chunks - 1 - i, 0, 0)),
        ],
        scratch_shapes=[
            pltpu.VMEM((B_pad, H), jnp.float32),             # h fwd
            pltpu.VMEM((B_pad, H), jnp.float32),             # c fwd
            pltpu.VMEM((B_pad, H), jnp.float32),             # h bwd
            pltpu.VMEM((B_pad, H), jnp.float32),             # c bwd
            pltpu.VMEM((TC * B_pad, 4 * H), jnp.bfloat16),   # hoisted gates fwd
            pltpu.VMEM((TC * B_pad, 4 * H), jnp.bfloat16),   # hoisted gates bwd
        ],
    )

    vmem_limit = min(int(vmem_cap * 0.85), vmem_cap - 2 * 1024 * 1024)

    out_f, out_b = pl.pallas_call(
        kernel,
        out_shape=(jax.ShapeDtypeStruct((T2p, B_pad, H), jnp.float32),
                   jax.ShapeDtypeStruct((T2p, B_pad, H), jnp.float32)),
        grid_spec=grid_spec,
        compiler_params=pltpu.CompilerParams(
            dimension_semantics=("arbitrary",),   # recurrence carries state
            vmem_limit_bytes=vmem_limit),
    )(min_len, lens, x_flat, x_flat, wih_f, wih_b, whh_bd, b_f, b_b)

    out_f = out_f[:T2, :B]                                   # drop time/batch pad
    out_b = out_b[:T2, :B]
    out = jnp.concatenate([jnp.transpose(out_f, (1, 0, 2)),
                           jnp.transpose(out_b, (1, 0, 2))], axis=-1)
    return out, out_lengths


def pblstm_reference(x, input_lengths, params, hidden_dim):
    """Pure-JAX reference (lax.scan): original i,f,g,o gate order, un-permuted
    weights, matching packing + bf16 matmul-operand numerics."""
    B, T, F = x.shape
    T2 = T // 2
    H = hidden_dim
    x2 = x.reshape(B, T2, 2 * F)
    out_lengths = (input_lengths.astype(jnp.float32) - 1.0) / 2.0 + 1.0
    eff = out_lengths.astype(jnp.int32).at[0].set(T2)
    lens = eff[:, None]
    x_bf = x2.astype(jnp.bfloat16)

    def run(wih, whh, b, reverse):
        wih = wih.astype(jnp.bfloat16)
        whh = whh.astype(jnp.bfloat16)
        b = b.astype(jnp.float32)

        def step(carry, inp):
            h, c = carry
            x_t, t = inp
            gates = (jnp.dot(x_t, wih.T, preferred_element_type=jnp.float32)
                     + jnp.dot(h.astype(jnp.bfloat16), whh.T,
                               preferred_element_type=jnp.float32) + b)
            i_g = jax.nn.sigmoid(gates[:, :H])
            f_g = jax.nn.sigmoid(gates[:, H:2 * H])
            g_g = jnp.tanh(gates[:, 2 * H:3 * H])
            o_g = jax.nn.sigmoid(gates[:, 3 * H:])
            c_new = f_g * c + i_g * g_g
            h_new = o_g * jnp.tanh(c_new)
            mask = t < lens
            h = jnp.where(mask, h_new, h)
            c = jnp.where(mask, c_new, c)
            return (h, c), jnp.where(mask, h_new, 0.0)

        xs = (jnp.transpose(x_bf, (1, 0, 2)), jnp.arange(T2))
        init = (jnp.zeros((B, H), jnp.float32), jnp.zeros((B, H), jnp.float32))
        _, ys = lax.scan(step, init, xs, reverse=reverse)
        return jnp.transpose(ys, (1, 0, 2))

    fwd = run(params["w_ih_f"], params["w_hh_f"],
              params["b_ih_f"] + params["b_hh_f"], False)
    bwd = run(params["w_ih_b"], params["w_hh_b"],
              params["b_ih_b"] + params["b_hh_b"], True)
    return jnp.concatenate([fwd, bwd], axis=-1), out_lengths


if __name__ == "__main__":
    F, H = 16, 32
    key = jax.random.PRNGKey(0)
    k_x, k_p = jax.random.split(key)
    params = make_params(F, H, k_p)

    def check(x, lengths, name, max_chunk=None):
        out, out_lens = pblstm_forward(x, lengths, params, H, max_chunk=max_chunk)
        out = jax.block_until_ready(out)
        ref_out, ref_lens = pblstm_reference(x, lengths, params, H)
        assert out.shape == ref_out.shape, (name, out.shape, ref_out.shape)
        # Tolerance loosened (vs f32 reference) to absorb the bf16 storage of
        # the hoisted gate projections.
        if not jnp.allclose(out, ref_out, atol=2e-2, rtol=2e-2):
            max_err = jnp.max(jnp.abs(out - ref_out))
            raise AssertionError(f"{name}: mismatch vs reference (max abs err {max_err})")
        if not jnp.allclose(out_lens, ref_lens):
            raise AssertionError(f"{name}: length mismatch")

    # Small shapes, lengths sorted descending (enforce_sorted semantics).
    x = jax.random.normal(k_x, (2, 8, F), jnp.float32)
    check(x, jnp.array([8, 5], jnp.int32), "masked (slow path)")
    check(x, jnp.array([8, 8], jnp.int32), "full length (fast path)")

    # Multi-chunk grid (time tiling), mixed and full lengths.
    x3 = jax.random.normal(jax.random.PRNGKey(1), (3, 16, F), jnp.float32)
    check(x3, jnp.array([16, 11, 6], jnp.int32), "chunked masked", max_chunk=4)
    check(x3, jnp.array([16, 16, 16], jnp.int32), "chunked full", max_chunk=4)

    print("KERNEL_OK")
</pallas_src>

<mosaic_0001>
module attributes {stable_mosaic.version = 11 : i64} {
  func.func @_pblstm_kernel(%arg0: i32, %arg1: memref<1xi32, #tpu.memory_space<smem>>, %arg2: memref<16x1xi32, #tpu.memory_space<vmem>>, %arg3: memref<64x32xbf16, #tpu.memory_space<vmem>>, %arg4: memref<64x32xbf16, #tpu.memory_space<vmem>>, %arg5: memref<32x128xbf16, #tpu.memory_space<vmem>>, %arg6: memref<32x128xbf16, #tpu.memory_space<vmem>>, %arg7: memref<64x256xbf16, #tpu.memory_space<vmem>>, %arg8: memref<1x128xf32, #tpu.memory_space<vmem>>, %arg9: memref<1x128xf32, #tpu.memory_space<vmem>>, %arg10: memref<4x16x32xf32, #tpu.memory_space<vmem>>, %arg11: memref<4x16x32xf32, #tpu.memory_space<vmem>>, %arg12: memref<16x32xf32, #tpu.memory_space<vmem>>, %arg13: memref<16x32xf32, #tpu.memory_space<vmem>>, %arg14: memref<16x32xf32, #tpu.memory_space<vmem>>, %arg15: memref<16x32xf32, #tpu.memory_space<vmem>>, %arg16: memref<64x128xbf16, #tpu.memory_space<vmem>>, %arg17: memref<64x128xbf16, #tpu.memory_space<vmem>>) attributes {dimension_semantics = [#tpu.dimension_semantics<arbitrary>], iteration_bounds = array<i64: 1>, scalar_prefetch = 1 : i64, scratch_operands = 6 : i64, tpu.core_type = #tpu.core_type<tc>, window_params = [{pipeline_mode = #tpu.pipeline_mode<synchronous>, transform_indices = @transform_0, window_bounds = array<i64: 16, 1>}, {transform_indices = @transform_1, window_bounds = array<i64: 64, 32>}, {transform_indices = @transform_2, window_bounds = array<i64: 64, 32>}, {pipeline_mode = #tpu.pipeline_mode<synchronous>, transform_indices = @transform_3, window_bounds = array<i64: 32, 128>}, {pipeline_mode = #tpu.pipeline_mode<synchronous>, transform_indices = @transform_4, window_bounds = array<i64: 32, 128>}, {pipeline_mode = #tpu.pipeline_mode<synchronous>, transform_indices = @transform_5, window_bounds = array<i64: 64, 256>}, {pipeline_mode = #tpu.pipeline_mode<synchronous>, transform_indices = @transform_6, window_bounds = array<i64: 1, 128>}, {pipeline_mode = #tpu.pipeline_mode<synchronous>, transform_indices = @transform_7, window_bounds = array<i64: 1, 128>}, {transform_indices = @transform_8, window_bounds = array<i64: 4, 16, 32>}, {transform_indices = @transform_9, window_bounds = array<i64: 4, 16, 32>}]} {
    %c0 = arith.constant 0 : index
    %c0_0 = arith.constant 0 : index
    %0 = vector.load %arg2[%c0, %c0_0] : memref<16x1xi32, #tpu.memory_space<vmem>>, vector<16x1xi32>
    %c0_1 = arith.constant 0 : index
    %1 = memref.load %arg1[%c0_1] : memref<1xi32, #tpu.memory_space<smem>>
    %c0_i32 = arith.constant 0 : i32
    %2 = arith.cmpi eq, %arg0, %c0_i32 : i32
    %3 = arith.extui %2 : i1 to i32
    %c0_i32_2 = arith.constant 0 : i32
    %4 = arith.cmpi ne, %3, %c0_i32_2 : i32
    scf.if %4 {
      %cst_25 = arith.constant 0.000000e+00 : f32
      %32 = vector.broadcast %cst_25 : f32 to vector<16x32xf32>
      %c0_26 = arith.constant 0 : index
      %c0_27 = arith.constant 0 : index
      %33 = vector.load %arg12[%c0_26, %c0_27] : memref<16x32xf32, #tpu.memory_space<vmem>>, vector<16x32xf32>
      tpu.vector_store %arg12[%c0_26, %c0_27], %32 {strides = array<i32>} : memref<16x32xf32, #tpu.memory_space<vmem>>, vector<16x32xf32>,
      %cst_28 = arith.constant 0.000000e+00 : f32
      %34 = vector.broadcast %cst_28 : f32 to vector<16x32xf32>
      %c0_29 = arith.constant 0 : index
      %c0_30 = arith.constant 0 : index
      %35 = vector.load %arg13[%c0_29, %c0_30] : memref<16x32xf32, #tpu.memory_space<vmem>>, vector<16x32xf32>
      tpu.vector_store %arg13[%c0_29, %c0_30], %34 {strides = array<i32>} : memref<16x32xf32, #tpu.memory_space<vmem>>, vector<16x32xf32>,
      %cst_31 = arith.constant 0.000000e+00 : f32
      %36 = vector.broadcast %cst_31 : f32 to vector<16x32xf32>
      %c0_32 = arith.constant 0 : index
      %c0_33 = arith.constant 0 : index
      %37 = vector.load %arg14[%c0_32, %c0_33] : memref<16x32xf32, #tpu.memory_space<vmem>>, vector<16x32xf32>
      tpu.vector_store %arg14[%c0_32, %c0_33], %36 {strides = array<i32>} : memref<16x32xf32, #tpu.memory_space<vmem>>, vector<16x32xf32>,
      %cst_34 = arith.constant 0.000000e+00 : f32
      %38 = vector.broadcast %cst_34 : f32 to vector<16x32xf32>
      %c0_35 = arith.constant 0 : index
      %c0_36 = arith.constant 0 : index
      %39 = vector.load %arg15[%c0_35, %c0_36] : memref<16x32xf32, #tpu.memory_space<vmem>>, vector<16x32xf32>
      tpu.vector_store %arg15[%c0_35, %c0_36], %38 {strides = array<i32>} : memref<16x32xf32, #tpu.memory_space<vmem>>, vector<16x32xf32>,
    } else {
    }
    %c0_3 = arith.constant 0 : index
    %c0_4 = arith.constant 0 : index
    %5 = vector.load %arg3[%c0_3, %c0_4] : memref<64x32xbf16, #tpu.memory_space<vmem>>, vector<64x32xbf16>
    %c0_5 = arith.constant 0 : index
    %c0_6 = arith.constant 0 : index
    %6 = vector.load %arg5[%c0_5, %c0_6] : memref<32x128xbf16, #tpu.memory_space<vmem>>, vector<32x128xbf16>
    %cst = arith.constant dense<0.000000e+00> : vector<64x128xf32>
    %7 = tpu.matmul %5, %6, %cst {dimension_numbers = #tpu.dot_dimension_numbers<[1], [0], [0], [1], [0, 0, 1, 1], [], []>} : vector<64x32xbf16>, vector<32x128xbf16>, vector<64x128xf32> -> vector<64x128xf32>
    %c0_7 = arith.constant 0 : index
    %c0_8 = arith.constant 0 : index
    %8 = vector.load %arg8[%c0_7, %c0_8] : memref<1x128xf32, #tpu.memory_space<vmem>>, vector<1x128xf32>
    %9 = vector.broadcast %8 : vector<1x128xf32> to vector<64x128xf32>
    %10 = arith.addf %7, %9 : vector<64x128xf32>
    %11 = arith.truncf %10 : vector<64x128xf32> to vector<64x128xbf16>
    %c0_9 = arith.constant 0 : index
    %c0_10 = arith.constant 0 : index
    %12 = vector.load %arg16[%c0_9, %c0_10] : memref<64x128xbf16, #tpu.memory_space<vmem>>, vector<64x128xbf16>
    tpu.vector_store %arg16[%c0_9, %c0_10], %11 {strides = array<i32>} : memref<64x128xbf16, #tpu.memory_space<vmem>>, vector<64x128xbf16>,
    %c0_11 = arith.constant 0 : index
    %c0_12 = arith.constant 0 : index
    %13 = vector.load %arg4[%c0_11, %c0_12] : memref<64x32xbf16, #tpu.memory_space<vmem>>, vector<64x32xbf16>
    %c0_13 = arith.constant 0 : index
    %c0_14 = arith.constant 0 : index
    %14 = vector.load %arg6[%c0_13, %c0_14] : memref<32x128xbf16, #tpu.memory_space<vmem>>, vector<32x128xbf16>
    %cst_15 = arith.constant dense<0.000000e+00> : vector<64x128xf32>
    %15 = tpu.matmul %13, %14, %cst_15 {dimension_numbers = #tpu.dot_dimension_numbers<[1], [0], [0], [1], [0, 0, 1, 1], [], []>} : vector<64x32xbf16>, vector<32x128xbf16>, vector<64x128xf32> -> vector<64x128xf32>
    %c0_16 = arith.constant 0 : index
    %c0_17 = arith.constant 0 : index
    %16 = vector.load %arg9[%c0_16, %c0_17] : memref<1x128xf32, #tpu.memory_space<vmem>>, vector<1x128xf32>
    %17 = vector.broadcast %16 : vector<1x128xf32> to vector<64x128xf32>
    %18 = arith.addf %15, %17 : vector<64x128xf32>
    %19 = arith.truncf %18 : vector<64x128xf32> to vector<64x128xbf16>
    %c0_18 = arith.constant 0 : index
    %c0_19 = arith.constant 0 : index
    %20 = vector.load %arg17[%c0_18, %c0_19] : memref<64x128xbf16, #tpu.memory_space<vmem>>, vector<64x128xbf16>
    tpu.vector_store %arg17[%c0_18, %c0_19], %19 {strides = array<i32>} : memref<64x128xbf16, #tpu.memory_space<vmem>>, vector<64x128xbf16>,
    %c4_i32 = arith.constant 4 : i32
    %21 = arith.muli %arg0, %c4_i32 : i32
    %c0_i32_20 = arith.constant 0 : i32
    %22 = arith.subi %c0_i32_20, %arg0 : i32
    %c4_i32_21 = arith.constant 4 : i32
    %23 = arith.muli %22, %c4_i32_21 : i32
    %24 = arith.maxsi %21, %23 : i32
    %c4_i32_22 = arith.constant 4 : i32
    %25 = arith.addi %24, %c4_i32_22 : i32
    %26 = arith.cmpi sle, %25, %1 : i32
    %27 = arith.extui %26 : i1 to i32
    %c0_i32_23 = arith.constant 0 : i32
    %28 = arith.cmpi ne, %27, %c0_i32_23 : i32
    scf.if %28 {
      %c0_i32_25 = arith.constant 0 : i32
      %c0_26 = arith.constant 0 : index
      %c0_27 = arith.constant 0 : index
      %32 = vector.load %arg12[%c0_26, %c0_27] : memref<16x32xf32, #tpu.memory_space<vmem>>, vector<16x32xf32>
      %c0_28 = arith.constant 0 : index
      %c0_29 = arith.constant 0 : index
      %33 = vector.load %arg14[%c0_28, %c0_29] : memref<16x32xf32, #tpu.memory_space<vmem>>, vector<16x32xf32>
      %34 = tpu.concatenate %32, %33 in 1 : vector<16x32xf32>, vector<16x32xf32> -> vector<16x64xf32>
      %35 = arith.truncf %34 : vector<16x64xf32> to vector<16x64xbf16>
      %c0_30 = arith.constant 0 : index
      %c0_31 = arith.constant 0 : index
      %36 = vector.load %arg7[%c0_30, %c0_31] : memref<64x256xbf16, #tpu.memory_space<vmem>>, vector<64x256xbf16>
      %cst_32 = arith.constant dense<0.000000e+00> : vector<16x256xf32>
      %37 = tpu.matmul %35, %36, %cst_32 {dimension_numbers = #tpu.dot_dimension_numbers<[1], [0], [0], [1], [0, 0, 1, 1], [], []>} : vector<16x64xbf16>, vector<64x256xbf16>, vector<16x256xf32> -> vector<16x256xf32>
      %c16_i32 = arith.constant 16 : i32
      %38 = arith.muli %c0_i32_25, %c16_i32 : i32
      %39 = tpu.assume_multiple %38, 16 : i32
      %40 = arith.index_cast %39 : i32 to index
      %c0_33 = arith.constant 0 : index
      %41 = vector.load %arg16[%40, %c0_33] : memref<64x128xbf16, #tpu.memory_space<vmem>>, vector<16x128xbf16>
      %42 = vector.extract_strided_slice %37 {offsets = [0, 0], sizes = [16, 128], strides = [1, 1]} : vector<16x256xf32> to vector<16x128xf32>
      %43 = arith.extf %41 : vector<16x128xbf16> to vector<16x128xf32>
      %44 = arith.addf %43, %42 : vector<16x128xf32>
      %45 = vector.extract_strided_slice %44 {offsets = [0, 0], sizes = [16, 96], strides = [1, 1]} : vector<16x128xf32> to vector<16x96xf32>
      %46 = arith.negf %45 : vector<16x96xf32>
      %47 = math.exp %46 : vector<16x96xf32>
      %cst_34 = arith.constant 1.000000e+00 : f32
      %48 = vector.broadcast %cst_34 : f32 to vector<16x96xf32>
      %49 = arith.addf %48, %47 : vector<16x96xf32>
      %50 = arith.divf %48, %49 : vector<16x96xf32>
      %51 = vector.extract_strided_slice %44 {offsets = [0, 96], sizes = [16, 32], strides = [1, 1]} : vector<16x128xf32> to vector<16x32xf32>
      %52 = math.tanh %51 : vector<16x32xf32>
      %53 = vector.extract_strided_slice %50 {offsets = [0, 0], sizes = [16, 32], strides = [1, 1]} : vector<16x96xf32> to vector<16x32xf32>
      %54 = vector.extract_strided_slice %50 {offsets = [0, 32], sizes = [16, 32], strides = [1, 1]} : vector<16x96xf32> to vector<16x32xf32>
      %55 = vector.extract_strided_slice %50 {offsets = [0, 64], sizes = [16, 32], strides = [1, 1]} : vector<16x96xf32> to vector<16x32xf32>
      %c0_35 = arith.constant 0 : index
      %c0_36 = arith.constant 0 : index
      %56 = vector.load %arg13[%c0_35, %c0_36] : memref<16x32xf32, #tpu.memory_space<vmem>>, vector<16x32xf32>
      %57 = arith.mulf %54, %56 : vector<16x32xf32>
      %58 = arith.mulf %53, %52 : vector<16x32xf32>
      %59 = arith.addf %57, %58 : vector<16x32xf32>
      %60 = math.tanh %59 : vector<16x32xf32>
      %61 = arith.mulf %55, %60 : vector<16x32xf32>
      %c0_37 = arith.constant 0 : index
      %c0_38 = arith.constant 0 : index
      %62 = vector.load %arg12[%c0_37, %c0_38] : memref<16x32xf32, #tpu.memory_space<vmem>>, vector<16x32xf32>
      tpu.vector_store %arg12[%c0_37, %c0_38], %61 {strides = array<i32>} : memref<16x32xf32, #tpu.memory_space<vmem>>, vector<16x32xf32>,
      %c0_39 = arith.constant 0 : index
      %c0_40 = arith.constant 0 : index
      %63 = vector.load %arg13[%c0_39, %c0_40] : memref<16x32xf32, #tpu.memory_space<vmem>>, vector<16x32xf32>
      tpu.vector_store %arg13[%c0_39, %c0_40], %59 {strides = array<i32>} : memref<16x32xf32, #tpu.memory_space<vmem>>, vector<16x32xf32>,
      %64 = arith.index_cast %c0_i32_25 : i32 to index
      %c0_41 = arith.constant 0 : index
      %c0_42 = arith.constant 0 : index
      %65 = vector.load %arg10[%64, %c0_41, %c0_42] : memref<4x16x32xf32, #tpu.memory_space<vmem>>, vector<1x16x32xf32>
      %66 = vector.shape_cast %65 : vector<1x16x32xf32> to vector<16x32xf32>
      %67 = vector.shape_cast %61 : vector<16x32xf32> to vector<1x16x32xf32>
      tpu.vector_store %arg10[%64, %c0_41, %c0_42], %67 {strides = array<i32>} : memref<4x16x32xf32, #tpu.memory_space<vmem>>, vector<1x16x32xf32>,
      %c3_i32 = arith.constant 3 : i32
      %68 = arith.subi %c3_i32, %c0_i32_25 : i32
      %c16_i32_43 = arith.constant 16 : i32
      %69 = arith.muli %68, %c16_i32_43 : i32
      %70 = tpu.assume_multiple %69, 16 : i32
      %71 = arith.index_cast %70 : i32 to index
      %c0_44 = arith.constant 0 : index
      %72 = vector.load %arg17[%71, %c0_44] : memref<64x128xbf16, #tpu.memory_space<vmem>>, vector<16x128xbf16>
      %73 = vector.extract_strided_slice %37 {offsets = [0, 128], sizes = [16, 128], strides = [1, 1]} : vector<16x256xf32> to vector<16x128xf32>
      %74 = arith.extf %72 : vector<16x128xbf16> to vector<16x128xf32>
      %75 = arith.addf %74, %73 : vector<16x128xf32>
      %76 = vector.extract_strided_slice %75 {offsets = [0, 0], sizes = [16, 96], strides = [1, 1]} : vector<16x128xf32> to vector<16x96xf32>
      %77 = arith.negf %76 : vector<16x96xf32>
      %78 = math.exp %77 : vector<16x96xf32>
      %cst_45 = arith.constant 1.000000e+00 : f32
      %79 = vector.broadcast %cst_45 : f32 to vector<16x96xf32>
      %80 = arith.addf %79, %78 : vector<16x96xf32>
      %81 = arith.divf %79, %80 : vector<16x96xf32>
      %82 = vector.extract_strided_slice %75 {offsets = [0, 96], sizes = [16, 32], strides = [1, 1]} : vector<16x128xf32> to vector<16x32xf32>
      %83 = math.tanh %82 : vector<16x32xf32>
      %84 = vector.extract_strided_slice %81 {offsets = [0, 0], sizes = [16, 32], strides = [1, 1]} : vector<16x96xf32> to vector<16x32xf32>
      %85 = vector.extract_strided_slice %81 {offsets = [0, 32], sizes = [16, 32], strides = [1, 1]} : vector<16x96xf32> to vector<16x32xf32>
      %86 = vector.extract_strided_slice %81 {offsets = [0, 64], sizes = [16, 32], strides = [1, 1]} : vector<16x96xf32> to vector<16x32xf32>
      %c0_46 = arith.constant 0 : index
      %c0_47 = arith.constant 0 : index
      %87 = vector.load %arg15[%c0_46, %c0_47] : memref<16x32xf32, #tpu.memory_space<vmem>>, vector<16x32xf32>
      %88 = arith.mulf %85, %87 : vector<16x32xf32>
      %89 = arith.mulf %84, %83 : vector<16x32xf32>
      %90 = arith.addf %88, %89 : vector<16x32xf32>
      %91 = math.tanh %90 : vector<16x32xf32>
      %92 = arith.mulf %86, %91 : vector<16x32xf32>
      %c0_48 = arith.constant 0 : index
      %c0_49 = arith.constant 0 : index
      %93 = vector.load %arg14[%c0_48, %c0_49] : memref<16x32xf32, #tpu.memory_space<vmem>>, vector<16x32xf32>
      tpu.vector_store %arg14[%c0_48, %c0_49], %92 {strides = array<i32>} : memref<16x32xf32, #tpu.memory_space<vmem>>, vector<16x32xf32>,
      %c0_50 = arith.constant 0 : index
      %c0_51 = arith.constant 0 : index
      %94 = vector.load %arg15[%c0_50, %c0_51] : memref<16x32xf32, #tpu.memory_space<vmem>>, vector<16x32xf32>
      tpu.vector_store %arg15[%c0_50, %c0_51], %90 {strides = array<i32>} : memref<16x32xf32, #tpu.memory_space<vmem>>, vector<16x32xf32>,
      %95 = arith.index_cast %68 : i32 to index
      %c0_52 = arith.constant 0 : index
      %c0_53 = arith.constant 0 : index
      %96 = vector.load %arg11[%95, %c0_52, %c0_53] : memref<4x16x32xf32, #tpu.memory_space<vmem>>, vector<1x16x32xf32>
      %97 = vector.shape_cast %96 : vector<1x16x32xf32> to vector<16x32xf32>
      %98 = vector.shape_cast %92 : vector<16x32xf32> to vector<1x16x32xf32>
      tpu.vector_store %arg11[%95, %c0_52, %c0_53], %98 {strides = array<i32>} : memref<4x16x32xf32, #tpu.memory_space<vmem>>, vector<1x16x32xf32>,
      %c1_i32 = arith.constant 1 : i32
      %c0_54 = arith.constant 0 : index
      %c0_55 = arith.constant 0 : index
      %99 = vector.load %arg12[%c0_54, %c0_55] : memref<16x32xf32, #tpu.memory_space<vmem>>, vector<16x32xf32>
      %c0_56 = arith.constant 0 : index
      %c0_57 = arith.constant 0 : index
      %100 = vector.load %arg14[%c0_56, %c0_57] : memref<16x32xf32, #tpu.memory_space<vmem>>, vector<16x32xf32>
      %101 = tpu.concatenate %99, %100 in 1 : vector<16x32xf32>, vector<16x32xf32> -> vector<16x64xf32>
      %102 = arith.truncf %101 : vector<16x64xf32> to vector<16x64xbf16>
      %c0_58 = arith.constant 0 : index
      %c0_59 = arith.constant 0 : index
      %103 = vector.load %arg7[%c0_58, %c0_59] : memref<64x256xbf16, #tpu.memory_space<vmem>>, vector<64x256xbf16>
      %cst_60 = arith.constant dense<0.000000e+00> : vector<16x256xf32>
      %104 = tpu.matmul %102, %103, %cst_60 {dimension_numbers = #tpu.dot_dimension_numbers<[1], [0], [0], [1], [0, 0, 1, 1], [], []>} : vector<16x64xbf16>, vector<64x256xbf16>, vector<16x256xf32> -> vector<16x256xf32>
      %c16_i32_61 = arith.constant 16 : i32
      %105 = arith.muli %c1_i32, %c16_i32_61 : i32
      %106 = tpu.assume_multiple %105, 16 : i32
      %107 = arith.index_cast %106 : i32 to index
      %c0_62 = arith.constant 0 : index
      %108 = vector.load %arg16[%107, %c0_62] : memref<64x128xbf16, #tpu.memory_space<vmem>>, vector<16x128xbf16>
      %109 = vector.extract_strided_slice %104 {offsets = [0, 0], sizes = [16, 128], strides = [1, 1]} : vector<16x256xf32> to vector<16x128xf32>
      %110 = arith.extf %108 : vector<16x128xbf16> to vector<16x128xf32>
      %111 = arith.addf %110, %109 : vector<16x128xf32>
      %112 = vector.extract_strided_slice %111 {offsets = [0, 0], sizes = [16, 96], strides = [1, 1]} : vector<16x128xf32> to vector<16x96xf32>
      %113 = arith.negf %112 : vector<16x96xf32>
      %114 = math.exp %113 : vector<16x96xf32>
      %cst_63 = arith.constant 1.000000e+00 : f32
      %115 = vector.broadcast %cst_63 : f32 to vector<16x96xf32>
      %116 = arith.addf %115, %114 : vector<16x96xf32>
      %117 = arith.divf %115, %116 : vector<16x96xf32>
      %118 = vector.extract_strided_slice %111 {offsets = [0, 96], sizes = [16, 32], strides = [1, 1]} : vector<16x128xf32> to vector<16x32xf32>
      %119 = math.tanh %118 : vector<16x32xf32>
      %120 = vector.extract_strided_slice %117 {offsets = [0, 0], sizes = [16, 32], strides = [1, 1]} : vector<16x96xf32> to vector<16x32xf32>
      %121 = vector.extract_strided_slice %117 {offsets = [0, 32], sizes = [16, 32], strides = [1, 1]} : vector<16x96xf32> to vector<16x32xf32>
      %122 = vector.extract_strided_slice %117 {offsets = [0, 64], sizes = [16, 32], strides = [1, 1]} : vector<16x96xf32> to vector<16x32xf32>
      %c0_64 = arith.constant 0 : index
      %c0_65 = arith.constant 0 : index
      %123 = vector.load %arg13[%c0_64, %c0_65] : memref<16x32xf32, #tpu.memory_space<vmem>>, vector<16x32xf32>
      %124 = arith.mulf %121, %123 : vector<16x32xf32>
      %125 = arith.mulf %120, %119 : vector<16x32xf32>
      %126 = arith.addf %124, %125 : vector<16x32xf32>
      %127 = math.tanh %126 : vector<16x32xf32>
      %128 = arith.mulf %122, %127 : vector<16x32xf32>
      %c0_66 = arith.constant 0 : index
      %c0_67 = arith.constant 0 : index
      %129 = vector.load %arg12[%c0_66, %c0_67] : memref<16x32xf32, #tpu.memory_space<vmem>>, vector<16x32xf32>
      tpu.vector_store %arg12[%c0_66, %c0_67], %128 {strides = array<i32>} : memref<16x32xf32, #tpu.memory_space<vmem>>, vector<16x32xf32>,
      %c0_68 = arith.constant 0 : index
      %c0_69 = arith.constant 0 : index
      %130 = vector.load %arg13[%c0_68, %c0_69] : memref<16x32xf32, #tpu.memory_space<vmem>>, vector<16x32xf32>
      tpu.vector_store %arg13[%c0_68, %c0_69], %126 {strides = array<i32>} : memref<16x32xf32, #tpu.memory_space<vmem>>, vector<16x32xf32>,
      %131 = arith.index_cast %c1_i32 : i32 to index
      %c0_70 = arith.constant 0 : index
      %c0_71 = arith.constant 0 : index
      %132 = vector.load %arg10[%131, %c0_70, %c0_71] : memref<4x16x32xf32, #tpu.memory_space<vmem>>, vector<1x16x32xf32>
      %133 = vector.shape_cast %132 : vector<1x16x32xf32> to vector<16x32xf32>
      %134 = vector.shape_cast %128 : vector<16x32xf32> to vector<1x16x32xf32>
      tpu.vector_store %arg10[%131, %c0_70, %c0_71], %134 {strides = array<i32>} : memref<4x16x32xf32, #tpu.memory_space<vmem>>, vector<1x16x32xf32>,
      %c3_i32_72 = arith.constant 3 : i32
      %135 = arith.subi %c3_i32_72, %c1_i32 : i32
      %c16_i32_73 = arith.constant 16 : i32
      %136 = arith.muli %135, %c16_i32_73 : i32
      %137 = tpu.assume_multiple %136, 16 : i32
      %138 = arith.index_cast %137 : i32 to index
      %c0_74 = arith.constant 0 : index
      %139 = vector.load %arg17[%138, %c0_74] : memref<64x128xbf16, #tpu.memory_space<vmem>>, vector<16x128xbf16>
      %140 = vector.extract_strided_slice %104 {offsets = [0, 128], sizes = [16, 128], strides = [1, 1]} : vector<16x256xf32> to vector<16x128xf32>
      %141 = arith.extf %139 : vector<16x128xbf16> to vector<16x128xf32>
      %142 = arith.addf %141, %140 : vector<16x128xf32>
      %143 = vector.extract_strided_slice %142 {offsets = [0, 0], sizes = [16, 96], strides = [1, 1]} : vector<16x128xf32> to vector<16x96xf32>
      %144 = arith.negf %143 : vector<16x96xf32>
      %145 = math.exp %144 : vector<16x96xf32>
      %cst_75 = arith.constant 1.000000e+00 : f32
      %146 = vector.broadcast %cst_75 : f32 to vector<16x96xf32>
      %147 = arith.addf %146, %145 : vector<16x96xf32>
      %148 = arith.divf %146, %147 : vector<16x96xf32>
      %149 = vector.extract_strided_slice %142 {offsets = [0, 96], sizes = [16, 32], strides = [1, 1]} : vector<16x128xf32> to vector<16x32xf32>
      %150 = math.tanh %149 : vector<16x32xf32>
      %151 = vector.extract_strided_slice %148 {offsets = [0, 0], sizes = [16, 32], strides = [1, 1]} : vector<16x96xf32> to vector<16x32xf32>
      %152 = vector.extract_strided_slice %148 {offsets = [0, 32], sizes = [16, 32], strides = [1, 1]} : vector<16x96xf32> to vector<16x32xf32>
      %153 = vector.extract_strided_slice %148 {offsets = [0, 64], sizes = [16, 32], strides = [1, 1]} : vector<16x96xf32> to vector<16x32xf32>
      %c0_76 = arith.constant 0 : index
      %c0_77 = arith.constant 0 : index
      %154 = vector.load %arg15[%c0_76, %c0_77] : memref<16x32xf32, #tpu.memory_space<vmem>>, vector<16x32xf32>
      %155 = arith.mulf %152, %154 : vector<16x32xf32>
      %156 = arith.mulf %151, %150 : vector<16x32xf32>
      %157 = arith.addf %155, %156 : vector<16x32xf32>
      %158 = math.tanh %157 : vector<16x32xf32>
      %159 = arith.mulf %153, %158 : vector<16x32xf32>
      %c0_78 = arith.constant 0 : index
      %c0_79 = arith.constant 0 : index
      %160 = vector.load %arg14[%c0_78, %c0_79] : memref<16x32xf32, #tpu.memory_space<vmem>>, vector<16x32xf32>
      tpu.vector_store %arg14[%c0_78, %c0_79], %159 {strides = array<i32>} : memref<16x32xf32, #tpu.memory_space<vmem>>, vector<16x32xf32>,
      %c0_80 = arith.constant 0 : index
      %c0_81 = arith.constant 0 : index
      %161 = vector.load %arg15[%c0_80, %c0_81] : memref<16x32xf32, #tpu.memory_space<vmem>>, vector<16x32xf32>
      tpu.vector_store %arg15[%c0_80, %c0_81], %157 {strides = array<i32>} : memref<16x32xf32, #tpu.memory_space<vmem>>, vector<16x32xf32>,
      %162 = arith.index_cast %135 : i32 to index
      %c0_82 = arith.constant 0 : index
      %c0_83 = arith.constant 0 : index
      %163 = vector.load %arg11[%162, %c0_82, %c0_83] : memref<4x16x32xf32, #tpu.memory_space<vmem>>, vector<1x16x32xf32>
      %164 = vector.shape_cast %163 : vector<1x16x32xf32> to vector<16x32xf32>
      %165 = vector.shape_cast %159 : vector<16x32xf32> to vector<1x16x32xf32>
      tpu.vector_store %arg11[%162, %c0_82, %c0_83], %165 {strides = array<i32>} : memref<4x16x32xf32, #tpu.memory_space<vmem>>, vector<1x16x32xf32>,
      %c2_i32 = arith.constant 2 : i32
      %c0_84 = arith.constant 0 : index
      %c0_85 = arith.constant 0 : index
      %166 = vector.load %arg12[%c0_84, %c0_85] : memref<16x32xf32, #tpu.memory_space<vmem>>, vector<16x32xf32>
      %c0_86 = arith.constant 0 : index
      %c0_87 = arith.constant 0 : index
      %167 = vector.load %arg14[%c0_86, %c0_87] : memref<16x32xf32, #tpu.memory_space<vmem>>, vector<16x32xf32>
      %168 = tpu.concatenate %166, %167 in 1 : vector<16x32xf32>, vector<16x32xf32> -> vector<16x64xf32>
      %169 = arith.truncf %168 : vector<16x64xf32> to vector<16x64xbf16>
      %c0_88 = arith.constant 0 : index
      %c0_89 = arith.constant 0 : index
      %170 = vector.load %arg7[%c0_88, %c0_89] : memref<64x256xbf16, #tpu.memory_space<vmem>>, vector<64x256xbf16>
      %cst_90 = arith.constant dense<0.000000e+00> : vector<16x256xf32>
      %171 = tpu.matmul %169, %170, %cst_90 {dimension_numbers = #tpu.dot_dimension_numbers<[1], [0], [0], [1], [0, 0, 1, 1], [], []>} : vector<16x64xbf16>, vector<64x256xbf16>, vector<16x256xf32> -> vector<16x256xf32>
      %c16_i32_91 = arith.constant 16 : i32
      %172 = arith.muli %c2_i32, %c16_i32_91 : i32
      %173 = tpu.assume_multiple %172, 16 : i32
      %174 = arith.index_cast %173 : i32 to index
      %c0_92 = arith.constant 0 : index
      %175 = vector.load %arg16[%174, %c0_92] : memref<64x128xbf16, #tpu.memory_space<vmem>>, vector<16x128xbf16>
      %176 = vector.extract_strided_slice %171 {offsets = [0, 0], sizes = [16, 128], strides = [1, 1]} : vector<16x256xf32> to vector<16x128xf32>
      %177 = arith.extf %175 : vector<16x128xbf16> to vector<16x128xf32>
      %178 = arith.addf %177, %176 : vector<16x128xf32>
      %179 = vector.extract_strided_slice %178 {offsets = [0, 0], sizes = [16, 96], strides = [1, 1]} : vector<16x128xf32> to vector<16x96xf32>
      %180 = arith.negf %179 : vector<16x96xf32>
      %181 = math.exp %180 : vector<16x96xf32>
      %cst_93 = arith.constant 1.000000e+00 : f32
      %182 = vector.broadcast %cst_93 : f32 to vector<16x96xf32>
      %183 = arith.addf %182, %181 : vector<16x96xf32>
      %184 = arith.divf %182, %183 : vector<16x96xf32>
      %185 = vector.extract_strided_slice %178 {offsets = [0, 96], sizes = [16, 32], strides = [1, 1]} : vector<16x128xf32> to vector<16x32xf32>
      %186 = math.tanh %185 : vector<16x32xf32>
      %187 = vector.extract_strided_slice %184 {offsets = [0, 0], sizes = [16, 32], strides = [1, 1]} : vector<16x96xf32> to vector<16x32xf32>
      %188 = vector.extract_strided_slice %184 {offsets = [0, 32], sizes = [16, 32], strides = [1, 1]} : vector<16x96xf32> to vector<16x32xf32>
      %189 = vector.extract_strided_slice %184 {offsets = [0, 64], sizes = [16, 32], strides = [1, 1]} : vector<16x96xf32> to vector<16x32xf32>
      %c0_94 = arith.constant 0 : index
      %c0_95 = arith.constant 0 : index
      %190 = vector.load %arg13[%c0_94, %c0_95] : memref<16x32xf32, #tpu.memory_space<vmem>>, vector<16x32xf32>
      %191 = arith.mulf %188, %190 : vector<16x32xf32>
      %192 = arith.mulf %187, %186 : vector<16x32xf32>
      %193 = arith.addf %191, %192 : vector<16x32xf32>
      %194 = math.tanh %193 : vector<16x32xf32>
      %195 = arith.mulf %189, %194 : vector<16x32xf32>
      %c0_96 = arith.constant 0 : index
      %c0_97 = arith.constant 0 : index
      %196 = vector.load %arg12[%c0_96, %c0_97] : memref<16x32xf32, #tpu.memory_space<vmem>>, vector<16x32xf32>
      tpu.vector_store %arg12[%c0_96, %c0_97], %195 {strides = array<i32>} : memref<16x32xf32, #tpu.memory_space<vmem>>, vector<16x32xf32>,
      %c0_98 = arith.constant 0 : index
      %c0_99 = arith.constant 0 : index
      %197 = vector.load %arg13[%c0_98, %c0_99] : memref<16x32xf32, #tpu.memory_space<vmem>>, vector<16x32xf32>
      tpu.vector_store %arg13[%c0_98, %c0_99], %193 {strides = array<i32>} : memref<16x32xf32, #tpu.memory_space<vmem>>, vector<16x32xf32>,
      %198 = arith.index_cast %c2_i32 : i32 to index
      %c0_100 = arith.constant 0 : index
      %c0_101 = arith.constant 0 : index
      %199 = vector.load %arg10[%198, %c0_100, %c0_101] : memref<4x16x32xf32, #tpu.memory_space<vmem>>, vector<1x16x32xf32>
      %200 = vector.shape_cast %199 : vector<1x16x32xf32> to vector<16x32xf32>
      %201 = vector.shape_cast %195 : vector<16x32xf32> to vector<1x16x32xf32>
      tpu.vector_store %arg10[%198, %c0_100, %c0_101], %201 {strides = array<i32>} : memref<4x16x32xf32, #tpu.memory_space<vmem>>, vector<1x16x32xf32>,
      %c3_i32_102 = arith.constant 3 : i32
      %202 = arith.subi %c3_i32_102, %c2_i32 : i32
      %c16_i32_103 = arith.constant 16 : i32
      %203 = arith.muli %202, %c16_i32_103 : i32
      %204 = tpu.assume_multiple %203, 16 : i32
      %205 = arith.index_cast %204 : i32 to index
      %c0_104 = arith.constant 0 : index
      %206 = vector.load %arg17[%205, %c0_104] : memref<64x128xbf16, #tpu.memory_space<vmem>>, vector<16x128xbf16>
      %207 = vector.extract_strided_slice %171 {offsets = [0, 128], sizes = [16, 128], strides = [1, 1]} : vector<16x256xf32> to vector<16x128xf32>
      %208 = arith.extf %206 : vector<16x128xbf16> to vector<16x128xf32>
      %209 = arith.addf %208, %207 : vector<16x128xf32>
      %210 = vector.extract_strided_slice %209 {offsets = [0, 0], sizes = [16, 96], strides = [1, 1]} : vector<16x128xf32> to vector<16x96xf32>
      %211 = arith.negf %210 : vector<16x96xf32>
      %212 = math.exp %211 : vector<16x96xf32>
      %cst_105 = arith.constant 1.000000e+00 : f32
      %213 = vector.broadcast %cst_105 : f32 to vector<16x96xf32>
      %214 = arith.addf %213, %212 : vector<16x96xf32>
      %215 = arith.divf %213, %214 : vector<16x96xf32>
      %216 = vector.extract_strided_slice %209 {offsets = [0, 96], sizes = [16, 32], strides = [1, 1]} : vector<16x128xf32> to vector<16x32xf32>
      %217 = math.tanh %216 : vector<16x32xf32>
      %218 = vector.extract_strided_slice %215 {offsets = [0, 0], sizes = [16, 32], strides = [1, 1]} : vector<16x96xf32> to vector<16x32xf32>
      %219 = vector.extract_strided_slice %215 {offsets = [0, 32], sizes = [16, 32], strides = [1, 1]} : vector<16x96xf32> to vector<16x32xf32>
      %220 = vector.extract_strided_slice %215 {offsets = [0, 64], sizes = [16, 32], strides = [1, 1]} : vector<16x96xf32> to vector<16x32xf32>
      %c0_106 = arith.constant 0 : index
      %c0_107 = arith.constant 0 : index
      %221 = vector.load %arg15[%c0_106, %c0_107] : memref<16x32xf32, #tpu.memory_space<vmem>>, vector<16x32xf32>
      %222 = arith.mulf %219, %221 : vector<16x32xf32>
      %223 = arith.mulf %218, %217 : vector<16x32xf32>
      %224 = arith.addf %222, %223 : vector<16x32xf32>
      %225 = math.tanh %224 : vector<16x32xf32>
      %226 = arith.mulf %220, %225 : vector<16x32xf32>
      %c0_108 = arith.constant 0 : index
      %c0_109 = arith.constant 0 : index
      %227 = vector.load %arg14[%c0_108, %c0_109] : memref<16x32xf32, #tpu.memory_space<vmem>>, vector<16x32xf32>
      tpu.vector_store %arg14[%c0_108, %c0_109], %226 {strides = array<i32>} : memref<16x32xf32, #tpu.memory_space<vmem>>, vector<16x32xf32>,
      %c0_110 = arith.constant 0 : index
      %c0_111 = arith.constant 0 : index
      %228 = vector.load %arg15[%c0_110, %c0_111] : memref<16x32xf32, #tpu.memory_space<vmem>>, vector<16x32xf32>
      tpu.vector_store %arg15[%c0_110, %c0_111], %224 {strides = array<i32>} : memref<16x32xf32, #tpu.memory_space<vmem>>, vector<16x32xf32>,
      %229 = arith.index_cast %202 : i32 to index
      %c0_112 = arith.constant 0 : index
      %c0_113 = arith.constant 0 : index
      %230 = vector.load %arg11[%229, %c0_112, %c0_113] : memref<4x16x32xf32, #tpu.memory_space<vmem>>, vector<1x16x32xf32>
      %231 = vector.shape_cast %230 : vector<1x16x32xf32> to vector<16x32xf32>
      %232 = vector.shape_cast %226 : vector<16x32xf32> to vector<1x16x32xf32>
      tpu.vector_store %arg11[%229, %c0_112, %c0_113], %232 {strides = array<i32>} : memref<4x16x32xf32, #tpu.memory_space<vmem>>, vector<1x16x32xf32>,
      %c3_i32_114 = arith.constant 3 : i32
      %c0_115 = arith.constant 0 : index
      %c0_116 = arith.constant 0 : index
      %233 = vector.load %arg12[%c0_115, %c0_116] : memref<16x32xf32, #tpu.memory_space<vmem>>, vector<16x32xf32>
      %c0_117 = arith.constant 0 : index
      %c0_118 = arith.constant 0 : index
      %234 = vector.load %arg14[%c0_117, %c0_118] : memref<16x32xf32, #tpu.memory_space<vmem>>, vector<16x32xf32>
      %235 = tpu.concatenate %233, %234 in 1 : vector<16x32xf32>, vector<16x32xf32> -> vector<16x64xf32>
      %236 = arith.truncf %235 : vector<16x64xf32> to vector<16x64xbf16>
      %c0_119 = arith.constant 0 : index
      %c0_120 = arith.constant 0 : index
      %237 = vector.load %arg7[%c0_119, %c0_120] : memref<64x256xbf16, #tpu.memory_space<vmem>>, vector<64x256xbf16>
      %cst_121 = arith.constant dense<0.000000e+00> : vector<16x256xf32>
      %238 = tpu.matmul %236, %237, %cst_121 {dimension_numbers = #tpu.dot_dimension_numbers<[1], [0], [0], [1], [0, 0, 1, 1], [], []>} : vector<16x64xbf16>, vector<64x256xbf16>, vector<16x256xf32> -> vector<16x256xf32>
      %c16_i32_122 = arith.constant 16 : i32
      %239 = arith.muli %c3_i32_114, %c16_i32_122 : i32
      %240 = tpu.assume_multiple %239, 16 : i32
      %241 = arith.index_cast %240 : i32 to index
      %c0_123 = arith.constant 0 : index
      %242 = vector.load %arg16[%241, %c0_123] : memref<64x128xbf16, #tpu.memory_space<vmem>>, vector<16x128xbf16>
      %243 = vector.extract_strided_slice %238 {offsets = [0, 0], sizes = [16, 128], strides = [1, 1]} : vector<16x256xf32> to vector<16x128xf32>
      %244 = arith.extf %242 : vector<16x128xbf16> to vector<16x128xf32>
      %245 = arith.addf %244, %243 : vector<16x128xf32>
      %246 = vector.extract_strided_slice %245 {offsets = [0, 0], sizes = [16, 96], strides = [1, 1]} : vector<16x128xf32> to vector<16x96xf32>
      %247 = arith.negf %246 : vector<16x96xf32>
      %248 = math.exp %247 : vector<16x96xf32>
      %cst_124 = arith.constant 1.000000e+00 : f32
      %249 = vector.broadcast %cst_124 : f32 to vector<16x96xf32>
      %250 = arith.addf %249, %248 : vector<16x96xf32>
      %251 = arith.divf %249, %250 : vector<16x96xf32>
      %252 = vector.extract_strided_slice %245 {offsets = [0, 96], sizes = [16, 32], strides = [1, 1]} : vector<16x128xf32> to vector<16x32xf32>
      %253 = math.tanh %252 : vector<16x32xf32>
      %254 = vector.extract_strided_slice %251 {offsets = [0, 0], sizes = [16, 32], strides = [1, 1]} : vector<16x96xf32> to vector<16x32xf32>
      %255 = vector.extract_strided_slice %251 {offsets = [0, 32], sizes = [16, 32], strides = [1, 1]} : vector<16x96xf32> to vector<16x32xf32>
      %256 = vector.extract_strided_slice %251 {offsets = [0, 64], sizes = [16, 32], strides = [1, 1]} : vector<16x96xf32> to vector<16x32xf32>
      %c0_125 = arith.constant 0 : index
      %c0_126 = arith.constant 0 : index
      %257 = vector.load %arg13[%c0_125, %c0_126] : memref<16x32xf32, #tpu.memory_space<vmem>>, vector<16x32xf32>
      %258 = arith.mulf %255, %257 : vector<16x32xf32>
      %259 = arith.mulf %254, %253 : vector<16x32xf32>
      %260 = arith.addf %258, %259 : vector<16x32xf32>
      %261 = math.tanh %260 : vector<16x32xf32>
      %262 = arith.mulf %256, %261 : vector<16x32xf32>
      %c0_127 = arith.constant 0 : index
      %c0_128 = arith.constant 0 : index
      %263 = vector.load %arg12[%c0_127, %c0_128] : memref<16x32xf32, #tpu.memory_space<vmem>>, vector<16x32xf32>
      tpu.vector_store %arg12[%c0_127, %c0_128], %262 {strides = array<i32>} : memref<16x32xf32, #tpu.memory_space<vmem>>, vector<16x32xf32>,
      %c0_129 = arith.constant 0 : index
      %c0_130 = arith.constant 0 : index
      %264 = vector.load %arg13[%c0_129, %c0_130] : memref<16x32xf32, #tpu.memory_space<vmem>>, vector<16x32xf32>
      tpu.vector_store %arg13[%c0_129, %c0_130], %260 {strides = array<i32>} : memref<16x32xf32, #tpu.memory_space<vmem>>, vector<16x32xf32>,
      %265 = arith.index_cast %c3_i32_114 : i32 to index
      %c0_131 = arith.constant 0 : index
      %c0_132 = arith.constant 0 : index
      %266 = vector.load %arg10[%265, %c0_131, %c0_132] : memref<4x16x32xf32, #tpu.memory_space<vmem>>, vector<1x16x32xf32>
      %267 = vector.shape_cast %266 : vector<1x16x32xf32> to vector<16x32xf32>
      %268 = vector.shape_cast %262 : vector<16x32xf32> to vector<1x16x32xf32>
      tpu.vector_store %arg10[%265, %c0_131, %c0_132], %268 {strides = array<i32>} : memref<4x16x32xf32, #tpu.memory_space<vmem>>, vector<1x16x32xf32>,
      %c3_i32_133 = arith.constant 3 : i32
      %269 = arith.subi %c3_i32_133, %c3_i32_114 : i32
      %c16_i32_134 = arith.constant 16 : i32
      %270 = arith.muli %269, %c16_i32_134 : i32
      %271 = tpu.assume_multiple %270, 16 : i32
      %272 = arith.index_cast %271 : i32 to index
      %c0_135 = arith.constant 0 : index
      %273 = vector.load %arg17[%272, %c0_135] : memref<64x128xbf16, #tpu.memory_space<vmem>>, vector<16x128xbf16>
      %274 = vector.extract_strided_slice %238 {offsets = [0, 128], sizes = [16, 128], strides = [1, 1]} : vector<16x256xf32> to vector<16x128xf32>
      %275 = arith.extf %273 : vector<16x128xbf16> to vector<16x128xf32>
      %276 = arith.addf %275, %274 : vector<16x128xf32>
      %277 = vector.extract_strided_slice %276 {offsets = [0, 0], sizes = [16, 96], strides = [1, 1]} : vector<16x128xf32> to vector<16x96xf32>
      %278 = arith.negf %277 : vector<16x96xf32>
      %279 = math.exp %278 : vector<16x96xf32>
      %cst_136 = arith.constant 1.000000e+00 : f32
      %280 = vector.broadcast %cst_136 : f32 to vector<16x96xf32>
      %281 = arith.addf %280, %279 : vector<16x96xf32>
      %282 = arith.divf %280, %281 : vector<16x96xf32>
      %283 = vector.extract_strided_slice %276 {offsets = [0, 96], sizes = [16, 32], strides = [1, 1]} : vector<16x128xf32> to vector<16x32xf32>
      %284 = math.tanh %283 : vector<16x32xf32>
      %285 = vector.extract_strided_slice %282 {offsets = [0, 0], sizes = [16, 32], strides = [1, 1]} : vector<16x96xf32> to vector<16x32xf32>
      %286 = vector.extract_strided_slice %282 {offsets = [0, 32], sizes = [16, 32], strides = [1, 1]} : vector<16x96xf32> to vector<16x32xf32>
      %287 = vector.extract_strided_slice %282 {offsets = [0, 64], sizes = [16, 32], strides = [1, 1]} : vector<16x96xf32> to vector<16x32xf32>
      %c0_137 = arith.constant 0 : index
      %c0_138 = arith.constant 0 : index
      %288 = vector.load %arg15[%c0_137, %c0_138] : memref<16x32xf32, #tpu.memory_space<vmem>>, vector<16x32xf32>
      %289 = arith.mulf %286, %288 : vector<16x32xf32>
      %290 = arith.mulf %285, %284 : vector<16x32xf32>
      %291 = arith.addf %289, %290 : vector<16x32xf32>
      %292 = math.tanh %291 : vector<16x32xf32>
      %293 = arith.mulf %287, %292 : vector<16x32xf32>
      %c0_139 = arith.constant 0 : index
      %c0_140 = arith.constant 0 : index
      %294 = vector.load %arg14[%c0_139, %c0_140] : memref<16x32xf32, #tpu.memory_space<vmem>>, vector<16x32xf32>
      tpu.vector_store %arg14[%c0_139, %c0_140], %293 {strides = array<i32>} : memref<16x32xf32, #tpu.memory_space<vmem>>, vector<16x32xf32>,
      %c0_141 = arith.constant 0 : index
      %c0_142 = arith.constant 0 : index
      %295 = vector.load %arg15[%c0_141, %c0_142] : memref<16x32xf32, #tpu.memory_space<vmem>>, vector<16x32xf32>
      tpu.vector_store %arg15[%c0_141, %c0_142], %291 {strides = array<i32>} : memref<16x32xf32, #tpu.memory_space<vmem>>, vector<16x32xf32>,
      %296 = arith.index_cast %269 : i32 to index
      %c0_143 = arith.constant 0 : index
      %c0_144 = arith.constant 0 : index
      %297 = vector.load %arg11[%296, %c0_143, %c0_144] : memref<4x16x32xf32, #tpu.memory_space<vmem>>, vector<1x16x32xf32>
      %298 = vector.shape_cast %297 : vector<1x16x32xf32> to vector<16x32xf32>
      %299 = vector.shape_cast %293 : vector<16x32xf32> to vector<1x16x32xf32>
      tpu.vector_store %arg11[%296, %c0_143, %c0_144], %299 {strides = array<i32>} : memref<4x16x32xf32, #tpu.memory_space<vmem>>, vector<1x16x32xf32>,
      %c4_i32_145 = arith.constant 4 : i32
    } else {
    }
    %true = arith.constant true
    %29 = arith.xori %26, %true : i1
    %30 = arith.extui %29 : i1 to i32
    %c0_i32_24 = arith.constant 0 : i32
    %31 = arith.cmpi ne, %30, %c0_i32_24 : i32
    scf.if %31 {
      %c0_i32_25 = arith.constant 0 : i32
      %c0_26 = arith.constant 0 : index
      %c0_27 = arith.constant 0 : index
      %32 = vector.load %arg12[%c0_26, %c0_27] : memref<16x32xf32, #tpu.memory_space<vmem>>, vector<16x32xf32>
      %c0_28 = arith.constant 0 : index
      %c0_29 = arith.constant 0 : index
      %33 = vector.load %arg14[%c0_28, %c0_29] : memref<16x32xf32, #tpu.memory_space<vmem>>, vector<16x32xf32>
      %34 = tpu.concatenate %32, %33 in 1 : vector<16x32xf32>, vector<16x32xf32> -> vector<16x64xf32>
      %35 = arith.truncf %34 : vector<16x64xf32> to vector<16x64xbf16>
      %c0_30 = arith.constant 0 : index
      %c0_31 = arith.constant 0 : index
      %36 = vector.load %arg7[%c0_30, %c0_31] : memref<64x256xbf16, #tpu.memory_space<vmem>>, vector<64x256xbf16>
      %cst_32 = arith.constant dense<0.000000e+00> : vector<16x256xf32>
      %37 = tpu.matmul %35, %36, %cst_32 {dimension_numbers = #tpu.dot_dimension_numbers<[1], [0], [0], [1], [0, 0, 1, 1], [], []>} : vector<16x64xbf16>, vector<64x256xbf16>, vector<16x256xf32> -> vector<16x256xf32>
      %c16_i32 = arith.constant 16 : i32
      %38 = arith.muli %c0_i32_25, %c16_i32 : i32
      %39 = tpu.assume_multiple %38, 16 : i32
      %40 = arith.index_cast %39 : i32 to index
      %c0_33 = arith.constant 0 : index
      %41 = vector.load %arg16[%40, %c0_33] : memref<64x128xbf16, #tpu.memory_space<vmem>>, vector<16x128xbf16>
      %42 = vector.extract_strided_slice %37 {offsets = [0, 0], sizes = [16, 128], strides = [1, 1]} : vector<16x256xf32> to vector<16x128xf32>
      %43 = arith.extf %41 : vector<16x128xbf16> to vector<16x128xf32>
      %44 = arith.addf %43, %42 : vector<16x128xf32>
      %45 = arith.addi %21, %c0_i32_25 : i32
      %46 = vector.extract_strided_slice %44 {offsets = [0, 0], sizes = [16, 96], strides = [1, 1]} : vector<16x128xf32> to vector<16x96xf32>
      %47 = arith.negf %46 : vector<16x96xf32>
      %48 = math.exp %47 : vector<16x96xf32>
      %cst_34 = arith.constant 1.000000e+00 : f32
      %49 = vector.broadcast %cst_34 : f32 to vector<16x96xf32>
      %50 = arith.addf %49, %48 : vector<16x96xf32>
      %51 = arith.divf %49, %50 : vector<16x96xf32>
      %52 = vector.extract_strided_slice %44 {offsets = [0, 96], sizes = [16, 32], strides = [1, 1]} : vector<16x128xf32> to vector<16x32xf32>
      %53 = math.tanh %52 : vector<16x32xf32>
      %54 = vector.extract_strided_slice %51 {offsets = [0, 0], sizes = [16, 32], strides = [1, 1]} : vector<16x96xf32> to vector<16x32xf32>
      %55 = vector.extract_strided_slice %51 {offsets = [0, 32], sizes = [16, 32], strides = [1, 1]} : vector<16x96xf32> to vector<16x32xf32>
      %56 = vector.extract_strided_slice %51 {offsets = [0, 64], sizes = [16, 32], strides = [1, 1]} : vector<16x96xf32> to vector<16x32xf32>
      %c0_35 = arith.constant 0 : index
      %c0_36 = arith.constant 0 : index
      %57 = vector.load %arg13[%c0_35, %c0_36] : memref<16x32xf32, #tpu.memory_space<vmem>>, vector<16x32xf32>
      %58 = arith.mulf %55, %57 : vector<16x32xf32>
      %59 = arith.mulf %54, %53 : vector<16x32xf32>
      %60 = arith.addf %58, %59 : vector<16x32xf32>
      %61 = math.tanh %60 : vector<16x32xf32>
      %62 = arith.mulf %56, %61 : vector<16x32xf32>
      %63 = vector.broadcast %45 : i32 to vector<16x1xi32>
      %64 = arith.cmpi slt, %63, %0 : vector<16x1xi32>
      %c0_37 = arith.constant 0 : index
      %c0_38 = arith.constant 0 : index
      %65 = vector.load %arg12[%c0_37, %c0_38] : memref<16x32xf32, #tpu.memory_space<vmem>>, vector<16x32xf32>
      %66 = vector.shape_cast %64 : vector<16x1xi1> to vector<16x1xi1>
      %67 = vector.broadcast %66 : vector<16x1xi1> to vector<16x32xi1>
      %68 = arith.select %67, %62, %65 : vector<16x32xi1>, vector<16x32xf32>
      %c0_39 = arith.constant 0 : index
      %c0_40 = arith.constant 0 : index
      %69 = vector.load %arg12[%c0_39, %c0_40] : memref<16x32xf32, #tpu.memory_space<vmem>>, vector<16x32xf32>
      tpu.vector_store %arg12[%c0_39, %c0_40], %68 {strides = array<i32>} : memref<16x32xf32, #tpu.memory_space<vmem>>, vector<16x32xf32>,
      %c0_41 = arith.constant 0 : index
      %c0_42 = arith.constant 0 : index
      %70 = vector.load %arg13[%c0_41, %c0_42] : memref<16x32xf32, #tpu.memory_space<vmem>>, vector<16x32xf32>
      %71 = vector.shape_cast %64 : vector<16x1xi1> to vector<16x1xi1>
      %72 = vector.broadcast %71 : vector<16x1xi1> to vector<16x32xi1>
      %73 = arith.select %72, %60, %70 : vector<16x32xi1>, vector<16x32xf32>
      %c0_43 = arith.constant 0 : index
      %c0_44 = arith.constant 0 : index
      %74 = vector.load %arg13[%c0_43, %c0_44] : memref<16x32xf32, #tpu.memory_space<vmem>>, vector<16x32xf32>
      tpu.vector_store %arg13[%c0_43, %c0_44], %73 {strides = array<i32>} : memref<16x32xf32, #tpu.memory_space<vmem>>, vector<16x32xf32>,
      %cst_45 = arith.constant 0.000000e+00 : f32
      %75 = vector.shape_cast %64 : vector<16x1xi1> to vector<16x1xi1>
      %76 = vector.broadcast %75 : vector<16x1xi1> to vector<16x32xi1>
      %77 = vector.broadcast %cst_45 : f32 to vector<16x32xf32>
      %78 = arith.select %76, %62, %77 : vector<16x32xi1>, vector<16x32xf32>
      %79 = arith.index_cast %c0_i32_25 : i32 to index
      %c0_46 = arith.constant 0 : index
      %c0_47 = arith.constant 0 : index
      %80 = vector.load %arg10[%79, %c0_46, %c0_47] : memref<4x16x32xf32, #tpu.memory_space<vmem>>, vector<1x16x32xf32>
      %81 = vector.shape_cast %80 : vector<1x16x32xf32> to vector<16x32xf32>
      %82 = vector.shape_cast %78 : vector<16x32xf32> to vector<1x16x32xf32>
      tpu.vector_store %arg10[%79, %c0_46, %c0_47], %82 {strides = array<i32>} : memref<4x16x32xf32, #tpu.memory_space<vmem>>, vector<1x16x32xf32>,
      %c3_i32 = arith.constant 3 : i32
      %83 = arith.subi %c3_i32, %c0_i32_25 : i32
      %c16_i32_48 = arith.constant 16 : i32
      %84 = arith.muli %83, %c16_i32_48 : i32
      %85 = tpu.assume_multiple %84, 16 : i32
      %86 = arith.index_cast %85 : i32 to index
      %c0_49 = arith.constant 0 : index
      %87 = vector.load %arg17[%86, %c0_49] : memref<64x128xbf16, #tpu.memory_space<vmem>>, vector<16x128xbf16>
      %88 = vector.extract_strided_slice %37 {offsets = [0, 128], sizes = [16, 128], strides = [1, 1]} : vector<16x256xf32> to vector<16x128xf32>
      %89 = arith.extf %87 : vector<16x128xbf16> to vector<16x128xf32>
      %90 = arith.addf %89, %88 : vector<16x128xf32>
      %91 = arith.addi %23, %83 : i32
      %92 = vector.extract_strided_slice %90 {offsets = [0, 0], sizes = [16, 96], strides = [1, 1]} : vector<16x128xf32> to vector<16x96xf32>
      %93 = arith.negf %92 : vector<16x96xf32>
      %94 = math.exp %93 : vector<16x96xf32>
      %cst_50 = arith.constant 1.000000e+00 : f32
      %95 = vector.broadcast %cst_50 : f32 to vector<16x96xf32>
      %96 = arith.addf %95, %94 : vector<16x96xf32>
      %97 = arith.divf %95, %96 : vector<16x96xf32>
      %98 = vector.extract_strided_slice %90 {offsets = [0, 96], sizes = [16, 32], strides = [1, 1]} : vector<16x128xf32> to vector<16x32xf32>
      %99 = math.tanh %98 : vector<16x32xf32>
      %100 = vector.extract_strided_slice %97 {offsets = [0, 0], sizes = [16, 32], strides = [1, 1]} : vector<16x96xf32> to vector<16x32xf32>
      %101 = vector.extract_strided_slice %97 {offsets = [0, 32], sizes = [16, 32], strides = [1, 1]} : vector<16x96xf32> to vector<16x32xf32>
      %102 = vector.extract_strided_slice %97 {offsets = [0, 64], sizes = [16, 32], strides = [1, 1]} : vector<16x96xf32> to vector<16x32xf32>
      %c0_51 = arith.constant 0 : index
      %c0_52 = arith.constant 0 : index
      %103 = vector.load %arg15[%c0_51, %c0_52] : memref<16x32xf32, #tpu.memory_space<vmem>>, vector<16x32xf32>
      %104 = arith.mulf %101, %103 : vector<16x32xf32>
      %105 = arith.mulf %100, %99 : vector<16x32xf32>
      %106 = arith.addf %104, %105 : vector<16x32xf32>
      %107 = math.tanh %106 : vector<16x32xf32>
      %108 = arith.mulf %102, %107 : vector<16x32xf32>
      %109 = vector.broadcast %91 : i32 to vector<16x1xi32>
      %110 = arith.cmpi slt, %109, %0 : vector<16x1xi32>
      %c0_53 = arith.constant 0 : index
      %c0_54 = arith.constant 0 : index
      %111 = vector.load %arg14[%c0_53, %c0_54] : memref<16x32xf32, #tpu.memory_space<vmem>>, vector<16x32xf32>
      %112 = vector.shape_cast %110 : vector<16x1xi1> to vector<16x1xi1>
      %113 = vector.broadcast %112 : vector<16x1xi1> to vector<16x32xi1>
      %114 = arith.select %113, %108, %111 : vector<16x32xi1>, vector<16x32xf32>
      %c0_55 = arith.constant 0 : index
      %c0_56 = arith.constant 0 : index
      %115 = vector.load %arg14[%c0_55, %c0_56] : memref<16x32xf32, #tpu.memory_space<vmem>>, vector<16x32xf32>
      tpu.vector_store %arg14[%c0_55, %c0_56], %114 {strides = array<i32>} : memref<16x32xf32, #tpu.memory_space<vmem>>, vector<16x32xf32>,
      %c0_57 = arith.constant 0 : index
      %c0_58 = arith.constant 0 : index
      %116 = vector.load %arg15[%c0_57, %c0_58] : memref<16x32xf32, #tpu.memory_space<vmem>>, vector<16x32xf32>
      %117 = vector.shape_cast %110 : vector<16x1xi1> to vector<16x1xi1>
      %118 = vector.broadcast %117 : vector<16x1xi1> to vector<16x32xi1>
      %119 = arith.select %118, %106, %116 : vector<16x32xi1>, vector<16x32xf32>
      %c0_59 = arith.constant 0 : index
      %c0_60 = arith.constant 0 : index
      %120 = vector.load %arg15[%c0_59, %c0_60] : memref<16x32xf32, #tpu.memory_space<vmem>>, vector<16x32xf32>
      tpu.vector_store %arg15[%c0_59, %c0_60], %119 {strides = array<i32>} : memref<16x32xf32, #tpu.memory_space<vmem>>, vector<16x32xf32>,
      %cst_61 = arith.constant 0.000000e+00 : f32
      %121 = vector.shape_cast %110 : vector<16x1xi1> to vector<16x1xi1>
      %122 = vector.broadcast %121 : vector<16x1xi1> to vector<16x32xi1>
      %123 = vector.broadcast %cst_61 : f32 to vector<16x32xf32>
      %124 = arith.select %122, %108, %123 : vector<16x32xi1>, vector<16x32xf32>
      %125 = arith.index_cast %83 : i32 to index
      %c0_62 = arith.constant 0 : index
      %c0_63 = arith.constant 0 : index
      %126 = vector.load %arg11[%125, %c0_62, %c0_63] : memref<4x16x32xf32, #tpu.memory_space<vmem>>, vector<1x16x32xf32>
      %127 = vector.shape_cast %126 : vector<1x16x32xf32> to vector<16x32xf32>
      %128 = vector.shape_cast %124 : vector<16x32xf32> to vector<1x16x32xf32>
      tpu.vector_store %arg11[%125, %c0_62, %c0_63], %128 {strides = array<i32>} : memref<4x16x32xf32, #tpu.memory_space<vmem>>, vector<1x16x32xf32>,
      %c1_i32 = arith.constant 1 : i32
      %c0_64 = arith.constant 0 : index
      %c0_65 = arith.constant 0 : index
      %129 = vector.load %arg12[%c0_64, %c0_65] : memref<16x32xf32, #tpu.memory_space<vmem>>, vector<16x32xf32>
      %c0_66 = arith.constant 0 : index
      %c0_67 = arith.constant 0 : index
      %130 = vector.load %arg14[%c0_66, %c0_67] : memref<16x32xf32, #tpu.memory_space<vmem>>, vector<16x32xf32>
      %131 = tpu.concatenate %129, %130 in 1 : vector<16x32xf32>, vector<16x32xf32> -> vector<16x64xf32>
      %132 = arith.truncf %131 : vector<16x64xf32> to vector<16x64xbf16>
      %c0_68 = arith.constant 0 : index
      %c0_69 = arith.constant 0 : index
      %133 = vector.load %arg7[%c0_68, %c0_69] : memref<64x256xbf16, #tpu.memory_space<vmem>>, vector<64x256xbf16>
      %cst_70 = arith.constant dense<0.000000e+00> : vector<16x256xf32>
      %134 = tpu.matmul %132, %133, %cst_70 {dimension_numbers = #tpu.dot_dimension_numbers<[1], [0], [0], [1], [0, 0, 1, 1], [], []>} : vector<16x64xbf16>, vector<64x256xbf16>, vector<16x256xf32> -> vector<16x256xf32>
      %c16_i32_71 = arith.constant 16 : i32
      %135 = arith.muli %c1_i32, %c16_i32_71 : i32
      %136 = tpu.assume_multiple %135, 16 : i32
      %137 = arith.index_cast %136 : i32 to index
      %c0_72 = arith.constant 0 : index
      %138 = vector.load %arg16[%137, %c0_72] : memref<64x128xbf16, #tpu.memory_space<vmem>>, vector<16x128xbf16>
      %139 = vector.extract_strided_slice %134 {offsets = [0, 0], sizes = [16, 128], strides = [1, 1]} : vector<16x256xf32> to vector<16x128xf32>
      %140 = arith.extf %138 : vector<16x128xbf16> to vector<16x128xf32>
      %141 = arith.addf %140, %139 : vector<16x128xf32>
      %142 = arith.addi %21, %c1_i32 : i32
      %143 = vector.extract_strided_slice %141 {offsets = [0, 0], sizes = [16, 96], strides = [1, 1]} : vector<16x128xf32> to vector<16x96xf32>
      %144 = arith.negf %143 : vector<16x96xf32>
      %145 = math.exp %144 : vector<16x96xf32>
      %cst_73 = arith.constant 1.000000e+00 : f32
      %146 = vector.broadcast %cst_73 : f32 to vector<16x96xf32>
      %147 = arith.addf %146, %145 : vector<16x96xf32>
      %148 = arith.divf %146, %147 : vector<16x96xf32>
      %149 = vector.extract_strided_slice %141 {offsets = [0, 96], sizes = [16, 32], strides = [1, 1]} : vector<16x128xf32> to vector<16x32xf32>
      %150 = math.tanh %149 : vector<16x32xf32>
      %151 = vector.extract_strided_slice %148 {offsets = [0, 0], sizes = [16, 32], strides = [1, 1]} : vector<16x96xf32> to vector<16x32xf32>
      %152 = vector.extract_strided_slice %148 {offsets = [0, 32], sizes = [16, 32], strides = [1, 1]} : vector<16x96xf32> to vector<16x32xf32>
      %153 = vector.extract_strided_slice %148 {offsets = [0, 64], sizes = [16, 32], strides = [1, 1]} : vector<16x96xf32> to vector<16x32xf32>
      %c0_74 = arith.constant 0 : index
      %c0_75 = arith.constant 0 : index
      %154 = vector.load %arg13[%c0_74, %c0_75] : memref<16x32xf32, #tpu.memory_space<vmem>>, vector<16x32xf32>
      %155 = arith.mulf %152, %154 : vector<16x32xf32>
      %156 = arith.mulf %151, %150 : vector<16x32xf32>
      %157 = arith.addf %155, %156 : vector<16x32xf32>
      %158 = math.tanh %157 : vector<16x32xf32>
      %159 = arith.mulf %153, %158 : vector<16x32xf32>
      %160 = vector.broadcast %142 : i32 to vector<16x1xi32>
      %161 = arith.cmpi slt, %160, %0 : vector<16x1xi32>
      %c0_76 = arith.constant 0 : index
      %c0_77 = arith.constant 0 : index
      %162 = vector.load %arg12[%c0_76, %c0_77] : memref<16x32xf32, #tpu.memory_space<vmem>>, vector<16x32xf32>
      %163 = vector.shape_cast %161 : vector<16x1xi1> to vector<16x1xi1>
      %164 = vector.broadcast %163 : vector<16x1xi1> to vector<16x32xi1>
      %165 = arith.select %164, %159, %162 : vector<16x32xi1>, vector<16x32xf32>
      %c0_78 = arith.constant 0 : index
      %c0_79 = arith.constant 0 : index
      %166 = vector.load %arg12[%c0_78, %c0_79] : memref<16x32xf32, #tpu.memory_space<vmem>>, vector<16x32xf32>
      tpu.vector_store %arg12[%c0_78, %c0_79], %165 {strides = array<i32>} : memref<16x32xf32, #tpu.memory_space<vmem>>, vector<16x32xf32>,
      %c0_80 = arith.constant 0 : index
      %c0_81 = arith.constant 0 : index
      %167 = vector.load %arg13[%c0_80, %c0_81] : memref<16x32xf32, #tpu.memory_space<vmem>>, vector<16x32xf32>
      %168 = vector.shape_cast %161 : vector<16x1xi1> to vector<16x1xi1>
      %169 = vector.broadcast %168 : vector<16x1xi1> to vector<16x32xi1>
      %170 = arith.select %169, %157, %167 : vector<16x32xi1>, vector<16x32xf32>
      %c0_82 = arith.constant 0 : index
      %c0_83 = arith.constant 0 : index
      %171 = vector.load %arg13[%c0_82, %c0_83] : memref<16x32xf32, #tpu.memory_space<vmem>>, vector<16x32xf32>
      tpu.vector_store %arg13[%c0_82, %c0_83], %170 {strides = array<i32>} : memref<16x32xf32, #tpu.memory_space<vmem>>, vector<16x32xf32>,
      %cst_84 = arith.constant 0.000000e+00 : f32
      %172 = vector.shape_cast %161 : vector<16x1xi1> to vector<16x1xi1>
      %173 = vector.broadcast %172 : vector<16x1xi1> to vector<16x32xi1>
      %174 = vector.broadcast %cst_84 : f32 to vector<16x32xf32>
      %175 = arith.select %173, %159, %174 : vector<16x32xi1>, vector<16x32xf32>
      %176 = arith.index_cast %c1_i32 : i32 to index
      %c0_85 = arith.constant 0 : index
      %c0_86 = arith.constant 0 : index
      %177 = vector.load %arg10[%176, %c0_85, %c0_86] : memref<4x16x32xf32, #tpu.memory_space<vmem>>, vector<1x16x32xf32>
      %178 = vector.shape_cast %177 : vector<1x16x32xf32> to vector<16x32xf32>
      %179 = vector.shape_cast %175 : vector<16x32xf32> to vector<1x16x32xf32>
      tpu.vector_store %arg10[%176, %c0_85, %c0_86], %179 {strides = array<i32>} : memref<4x16x32xf32, #tpu.memory_space<vmem>>, vector<1x16x32xf32>,
      %c3_i32_87 = arith.constant 3 : i32
      %180 = arith.subi %c3_i32_87, %c1_i32 : i32
      %c16_i32_88 = arith.constant 16 : i32
      %181 = arith.muli %180, %c16_i32_88 : i32
      %182 = tpu.assume_multiple %181, 16 : i32
      %183 = arith.index_cast %182 : i32 to index
      %c0_89 = arith.constant 0 : index
      %184 = vector.load %arg17[%183, %c0_89] : memref<64x128xbf16, #tpu.memory_space<vmem>>, vector<16x128xbf16>
      %185 = vector.extract_strided_slice %134 {offsets = [0, 128], sizes = [16, 128], strides = [1, 1]} : vector<16x256xf32> to vector<16x128xf32>
      %186 = arith.extf %184 : vector<16x128xbf16> to vector<16x128xf32>
      %187 = arith.addf %186, %185 : vector<16x128xf32>
      %188 = arith.addi %23, %180 : i32
      %189 = vector.extract_strided_slice %187 {offsets = [0, 0], sizes = [16, 96], strides = [1, 1]} : vector<16x128xf32> to vector<16x96xf32>
      %190 = arith.negf %189 : vector<16x96xf32>
      %191 = math.exp %190 : vector<16x96xf32>
      %cst_90 = arith.constant 1.000000e+00 : f32
      %192 = vector.broadcast %cst_90 : f32 to vector<16x96xf32>
      %193 = arith.addf %192, %191 : vector<16x96xf32>
      %194 = arith.divf %192, %193 : vector<16x96xf32>
      %195 = vector.extract_strided_slice %187 {offsets = [0, 96], sizes = [16, 32], strides = [1, 1]} : vector<16x128xf32> to vector<16x32xf32>
      %196 = math.tanh %195 : vector<16x32xf32>
      %197 = vector.extract_strided_slice %194 {offsets = [0, 0], sizes = [16, 32], strides = [1, 1]} : vector<16x96xf32> to vector<16x32xf32>
      %198 = vector.extract_strided_slice %194 {offsets = [0, 32], sizes = [16, 32], strides = [1, 1]} : vector<16x96xf32> to vector<16x32xf32>
      %199 = vector.extract_strided_slice %194 {offsets = [0, 64], sizes = [16, 32], strides = [1, 1]} : vector<16x96xf32> to vector<16x32xf32>
      %c0_91 = arith.constant 0 : index
      %c0_92 = arith.constant 0 : index
      %200 = vector.load %arg15[%c0_91, %c0_92] : memref<16x32xf32, #tpu.memory_space<vmem>>, vector<16x32xf32>
      %201 = arith.mulf %198, %200 : vector<16x32xf32>
      %202 = arith.mulf %197, %196 : vector<16x32xf32>
      %203 = arith.addf %201, %202 : vector<16x32xf32>
      %204 = math.tanh %203 : vector<16x32xf32>
      %205 = arith.mulf %199, %204 : vector<16x32xf32>
      %206 = vector.broadcast %188 : i32 to vector<16x1xi32>
      %207 = arith.cmpi slt, %206, %0 : vector<16x1xi32>
      %c0_93 = arith.constant 0 : index
      %c0_94 = arith.constant 0 : index
      %208 = vector.load %arg14[%c0_93, %c0_94] : memref<16x32xf32, #tpu.memory_space<vmem>>, vector<16x32xf32>
      %209 = vector.shape_cast %207 : vector<16x1xi1> to vector<16x1xi1>
      %210 = vector.broadcast %209 : vector<16x1xi1> to vector<16x32xi1>
      %211 = arith.select %210, %205, %208 : vector<16x32xi1>, vector<16x32xf32>
      %c0_95 = arith.constant 0 : index
      %c0_96 = arith.constant 0 : index
      %212 = vector.load %arg14[%c0_95, %c0_96] : memref<16x32xf32, #tpu.memory_space<vmem>>, vector<16x32xf32>
      tpu.vector_store %arg14[%c0_95, %c0_96], %211 {strides = array<i32>} : memref<16x32xf32, #tpu.memory_space<vmem>>, vector<16x32xf32>,
      %c0_97 = arith.constant 0 : index
      %c0_98 = arith.constant 0 : index
      %213 = vector.load %arg15[%c0_97, %c0_98] : memref<16x32xf32, #tpu.memory_space<vmem>>, vector<16x32xf32>
      %214 = vector.shape_cast %207 : vector<16x1xi1> to vector<16x1xi1>
      %215 = vector.broadcast %214 : vector<16x1xi1> to vector<16x32xi1>
      %216 = arith.select %215, %203, %213 : vector<16x32xi1>, vector<16x32xf32>
      %c0_99 = arith.constant 0 : index
      %c0_100 = arith.constant 0 : index
      %217 = vector.load %arg15[%c0_99, %c0_100] : memref<16x32xf32, #tpu.memory_space<vmem>>, vector<16x32xf32>
      tpu.vector_store %arg15[%c0_99, %c0_100], %216 {strides = array<i32>} : memref<16x32xf32, #tpu.memory_space<vmem>>, vector<16x32xf32>,
      %cst_101 = arith.constant 0.000000e+00 : f32
      %218 = vector.shape_cast %207 : vector<16x1xi1> to vector<16x1xi1>
      %219 = vector.broadcast %218 : vector<16x1xi1> to vector<16x32xi1>
      %220 = vector.broadcast %cst_101 : f32 to vector<16x32xf32>
      %221 = arith.select %219, %205, %220 : vector<16x32xi1>, vector<16x32xf32>
      %222 = arith.index_cast %180 : i32 to index
      %c0_102 = arith.constant 0 : index
      %c0_103 = arith.constant 0 : index
      %223 = vector.load %arg11[%222, %c0_102, %c0_103] : memref<4x16x32xf32, #tpu.memory_space<vmem>>, vector<1x16x32xf32>
      %224 = vector.shape_cast %223 : vector<1x16x32xf32> to vector<16x32xf32>
      %225 = vector.shape_cast %221 : vector<16x32xf32> to vector<1x16x32xf32>
      tpu.vector_store %arg11[%222, %c0_102, %c0_103], %225 {strides = array<i32>} : memref<4x16x32xf32, #tpu.memory_space<vmem>>, vector<1x16x32xf32>,
      %c2_i32 = arith.constant 2 : i32
      %c0_104 = arith.constant 0 : index
      %c0_105 = arith.constant 0 : index
      %226 = vector.load %arg12[%c0_104, %c0_105] : memref<16x32xf32, #tpu.memory_space<vmem>>, vector<16x32xf32>
      %c0_106 = arith.constant 0 : index
      %c0_107 = arith.constant 0 : index
      %227 = vector.load %arg14[%c0_106, %c0_107] : memref<16x32xf32, #tpu.memory_space<vmem>>, vector<16x32xf32>
      %228 = tpu.concatenate %226, %227 in 1 : vector<16x32xf32>, vector<16x32xf32> -> vector<16x64xf32>
      %229 = arith.truncf %228 : vector<16x64xf32> to vector<16x64xbf16>
      %c0_108 = arith.constant 0 : index
      %c0_109 = arith.constant 0 : index
      %230 = vector.load %arg7[%c0_108, %c0_109] : memref<64x256xbf16, #tpu.memory_space<vmem>>, vector<64x256xbf16>
      %cst_110 = arith.constant dense<0.000000e+00> : vector<16x256xf32>
      %231 = tpu.matmul %229, %230, %cst_110 {dimension_numbers = #tpu.dot_dimension_numbers<[1], [0], [0], [1], [0, 0, 1, 1], [], []>} : vector<16x64xbf16>, vector<64x256xbf16>, vector<16x256xf32> -> vector<16x256xf32>
      %c16_i32_111 = arith.constant 16 : i32
      %232 = arith.muli %c2_i32, %c16_i32_111 : i32
      %233 = tpu.assume_multiple %232, 16 : i32
      %234 = arith.index_cast %233 : i32 to index
      %c0_112 = arith.constant 0 : index
      %235 = vector.load %arg16[%234, %c0_112] : memref<64x128xbf16, #tpu.memory_space<vmem>>, vector<16x128xbf16>
      %236 = vector.extract_strided_slice %231 {offsets = [0, 0], sizes = [16, 128], strides = [1, 1]} : vector<16x256xf32> to vector<16x128xf32>
      %237 = arith.extf %235 : vector<16x128xbf16> to vector<16x128xf32>
      %238 = arith.addf %237, %236 : vector<16x128xf32>
      %239 = arith.addi %21, %c2_i32 : i32
      %240 = vector.extract_strided_slice %238 {offsets = [0, 0], sizes = [16, 96], strides = [1, 1]} : vector<16x128xf32> to vector<16x96xf32>
      %241 = arith.negf %240 : vector<16x96xf32>
      %242 = math.exp %241 : vector<16x96xf32>
      %cst_113 = arith.constant 1.000000e+00 : f32
      %243 = vector.broadcast %cst_113 : f32 to vector<16x96xf32>
      %244 = arith.addf %243, %242 : vector<16x96xf32>
      %245 = arith.divf %243, %244 : vector<16x96xf32>
      %246 = vector.extract_strided_slice %238 {offsets = [0, 96], sizes = [16, 32], strides = [1, 1]} : vector<16x128xf32> to vector<16x32xf32>
      %247 = math.tanh %246 : vector<16x32xf32>
      %248 = vector.extract_strided_slice %245 {offsets = [0, 0], sizes = [16, 32], strides = [1, 1]} : vector<16x96xf32> to vector<16x32xf32>
      %249 = vector.extract_strided_slice %245 {offsets = [0, 32], sizes = [16, 32], strides = [1, 1]} : vector<16x96xf32> to vector<16x32xf32>
      %250 = vector.extract_strided_slice %245 {offsets = [0, 64], sizes = [16, 32], strides = [1, 1]} : vector<16x96xf32> to vector<16x32xf32>
      %c0_114 = arith.constant 0 : index
      %c0_115 = arith.constant 0 : index
      %251 = vector.load %arg13[%c0_114, %c0_115] : memref<16x32xf32, #tpu.memory_space<vmem>>, vector<16x32xf32>
      %252 = arith.mulf %249, %251 : vector<16x32xf32>
      %253 = arith.mulf %248, %247 : vector<16x32xf32>
      %254 = arith.addf %252, %253 : vector<16x32xf32>
      %255 = math.tanh %254 : vector<16x32xf32>
      %256 = arith.mulf %250, %255 : vector<16x32xf32>
      %257 = vector.broadcast %239 : i32 to vector<16x1xi32>
      %258 = arith.cmpi slt, %257, %0 : vector<16x1xi32>
      %c0_116 = arith.constant 0 : index
      %c0_117 = arith.constant 0 : index
      %259 = vector.load %arg12[%c0_116, %c0_117] : memref<16x32xf32, #tpu.memory_space<vmem>>, vector<16x32xf32>
      %260 = vector.shape_cast %258 : vector<16x1xi1> to vector<16x1xi1>
      %261 = vector.broadcast %260 : vector<16x1xi1> to vector<16x32xi1>
      %262 = arith.select %261, %256, %259 : vector<16x32xi1>, vector<16x32xf32>
      %c0_118 = arith.constant 0 : index
      %c0_119 = arith.constant 0 : index
      %263 = vector.load %arg12[%c0_118, %c0_119] : memref<16x32xf32, #tpu.memory_space<vmem>>, vector<16x32xf32>
      tpu.vector_store %arg12[%c0_118, %c0_119], %262 {strides = array<i32>} : memref<16x32xf32, #tpu.memory_space<vmem>>, vector<16x32xf32>,
      %c0_120 = arith.constant 0 : index
      %c0_121 = arith.constant 0 : index
      %264 = vector.load %arg13[%c0_120, %c0_121] : memref<16x32xf32, #tpu.memory_space<vmem>>, vector<16x32xf32>
      %265 = vector.shape_cast %258 : vector<16x1xi1> to vector<16x1xi1>
      %266 = vector.broadcast %265 : vector<16x1xi1> to vector<16x32xi1>
      %267 = arith.select %266, %254, %264 : vector<16x32xi1>, vector<16x32xf32>
      %c0_122 = arith.constant 0 : index
      %c0_123 = arith.constant 0 : index
      %268 = vector.load %arg13[%c0_122, %c0_123] : memref<16x32xf32, #tpu.memory_space<vmem>>, vector<16x32xf32>
      tpu.vector_store %arg13[%c0_122, %c0_123], %267 {strides = array<i32>} : memref<16x32xf32, #tpu.memory_space<vmem>>, vector<16x32xf32>,
      %cst_124 = arith.constant 0.000000e+00 : f32
      %269 = vector.shape_cast %258 : vector<16x1xi1> to vector<16x1xi1>
      %270 = vector.broadcast %269 : vector<16x1xi1> to vector<16x32xi1>
      %271 = vector.broadcast %cst_124 : f32 to vector<16x32xf32>
      %272 = arith.select %270, %256, %271 : vector<16x32xi1>, vector<16x32xf32>
      %273 = arith.index_cast %c2_i32 : i32 to index
      %c0_125 = arith.constant 0 : index
      %c0_126 = arith.constant 0 : index
      %274 = vector.load %arg10[%273, %c0_125, %c0_126] : memref<4x16x32xf32, #tpu.memory_space<vmem>>, vector<1x16x32xf32>
      %275 = vector.shape_cast %274 : vector<1x16x32xf32> to vector<16x32xf32>
      %276 = vector.shape_cast %272 : vector<16x32xf32> to vector<1x16x32xf32>
      tpu.vector_store %arg10[%273, %c0_125, %c0_126], %276 {strides = array<i32>} : memref<4x16x32xf32, #tpu.memory_space<vmem>>, vector<1x16x32xf32>,
      %c3_i32_127 = arith.constant 3 : i32
      %277 = arith.subi %c3_i32_127, %c2_i32 : i32
      %c16_i32_128 = arith.constant 16 : i32
      %278 = arith.muli %277, %c16_i32_128 : i32
      %279 = tpu.assume_multiple %278, 16 : i32
      %280 = arith.index_cast %279 : i32 to index
      %c0_129 = arith.constant 0 : index
      %281 = vector.load %arg17[%280, %c0_129] : memref<64x128xbf16, #tpu.memory_space<vmem>>, vector<16x128xbf16>
      %282 = vector.extract_strided_slice %231 {offsets = [0, 128], sizes = [16, 128], strides = [1, 1]} : vector<16x256xf32> to vector<16x128xf32>
      %283 = arith.extf %281 : vector<16x128xbf16> to vector<16x128xf32>
      %284 = arith.addf %283, %282 : vector<16x128xf32>
      %285 = arith.addi %23, %277 : i32
      %286 = vector.extract_strided_slice %284 {offsets = [0, 0], sizes = [16, 96], strides = [1, 1]} : vector<16x128xf32> to vector<16x96xf32>
      %287 = arith.negf %286 : vector<16x96xf32>
      %288 = math.exp %287 : vector<16x96xf32>
      %cst_130 = arith.constant 1.000000e+00 : f32
      %289 = vector.broadcast %cst_130 : f32 to vector<16x96xf32>
      %290 = arith.addf %289, %288 : vector<16x96xf32>
      %291 = arith.divf %289, %290 : vector<16x96xf32>
      %292 = vector.extract_strided_slice %284 {offsets = [0, 96], sizes = [16, 32], strides = [1, 1]} : vector<16x128xf32> to vector<16x32xf32>
      %293 = math.tanh %292 : vector<16x32xf32>
      %294 = vector.extract_strided_slice %291 {offsets = [0, 0], sizes = [16, 32], strides = [1, 1]} : vector<16x96xf32> to vector<16x32xf32>
      %295 = vector.extract_strided_slice %291 {offsets = [0, 32], sizes = [16, 32], strides = [1, 1]} : vector<16x96xf32> to vector<16x32xf32>
      %296 = vector.extract_strided_slice %291 {offsets = [0, 64], sizes = [16, 32], strides = [1, 1]} : vector<16x96xf32> to vector<16x32xf32>
      %c0_131 = arith.constant 0 : index
      %c0_132 = arith.constant 0 : index
      %297 = vector.load %arg15[%c0_131, %c0_132] : memref<16x32xf32, #tpu.memory_space<vmem>>, vector<16x32xf32>
      %298 = arith.mulf %295, %297 : vector<16x32xf32>
      %299 = arith.mulf %294, %293 : vector<16x32xf32>
      %300 = arith.addf %298, %299 : vector<16x32xf32>
      %301 = math.tanh %300 : vector<16x32xf32>
      %302 = arith.mulf %296, %301 : vector<16x32xf32>
      %303 = vector.broadcast %285 : i32 to vector<16x1xi32>
      %304 = arith.cmpi slt, %303, %0 : vector<16x1xi32>
      %c0_133 = arith.constant 0 : index
      %c0_134 = arith.constant 0 : index
      %305 = vector.load %arg14[%c0_133, %c0_134] : memref<16x32xf32, #tpu.memory_space<vmem>>, vector<16x32xf32>
      %306 = vector.shape_cast %304 : vector<16x1xi1> to vector<16x1xi1>
      %307 = vector.broadcast %306 : vector<16x1xi1> to vector<16x32xi1>
      %308 = arith.select %307, %302, %305 : vector<16x32xi1>, vector<16x32xf32>
      %c0_135 = arith.constant 0 : index
      %c0_136 = arith.constant 0 : index
      %309 = vector.load %arg14[%c0_135, %c0_136] : memref<16x32xf32, #tpu.memory_space<vmem>>, vector<16x32xf32>
      tpu.vector_store %arg14[%c0_135, %c0_136], %308 {strides = array<i32>} : memref<16x32xf32, #tpu.memory_space<vmem>>, vector<16x32xf32>,
      %c0_137 = arith.constant 0 : index
      %c0_138 = arith.constant 0 : index
      %310 = vector.load %arg15[%c0_137, %c0_138] : memref<16x32xf32, #tpu.memory_space<vmem>>, vector<16x32xf32>
      %311 = vector.shape_cast %304 : vector<16x1xi1> to vector<16x1xi1>
      %312 = vector.broadcast %311 : vector<16x1xi1> to vector<16x32xi1>
      %313 = arith.select %312, %300, %310 : vector<16x32xi1>, vector<16x32xf32>
      %c0_139 = arith.constant 0 : index
      %c0_140 = arith.constant 0 : index
      %314 = vector.load %arg15[%c0_139, %c0_140] : memref<16x32xf32, #tpu.memory_space<vmem>>, vector<16x32xf32>
      tpu.vector_store %arg15[%c0_139, %c0_140], %313 {strides = array<i32>} : memref<16x32xf32, #tpu.memory_space<vmem>>, vector<16x32xf32>,
      %cst_141 = arith.constant 0.000000e+00 : f32
      %315 = vector.shape_cast %304 : vector<16x1xi1> to vector<16x1xi1>
      %316 = vector.broadcast %315 : vector<16x1xi1> to vector<16x32xi1>
      %317 = vector.broadcast %cst_141 : f32 to vector<16x32xf32>
      %318 = arith.select %316, %302, %317 : vector<16x32xi1>, vector<16x32xf32>
      %319 = arith.index_cast %277 : i32 to index
      %c0_142 = arith.constant 0 : index
      %c0_143 = arith.constant 0 : index
      %320 = vector.load %arg11[%319, %c0_142, %c0_143] : memref<4x16x32xf32, #tpu.memory_space<vmem>>, vector<1x16x32xf32>
      %321 = vector.shape_cast %320 : vector<1x16x32xf32> to vector<16x32xf32>
      %322 = vector.shape_cast %318 : vector<16x32xf32> to vector<1x16x32xf32>
      tpu.vector_store %arg11[%319, %c0_142, %c0_143], %322 {strides = array<i32>} : memref<4x16x32xf32, #tpu.memory_space<vmem>>, vector<1x16x32xf32>,
      %c3_i32_144 = arith.constant 3 : i32
      %c0_145 = arith.constant 0 : index
      %c0_146 = arith.constant 0 : index
      %323 = vector.load %arg12[%c0_145, %c0_146] : memref<16x32xf32, #tpu.memory_space<vmem>>, vector<16x32xf32>
      %c0_147 = arith.constant 0 : index
      %c0_148 = arith.constant 0 : index
      %324 = vector.load %arg14[%c0_147, %c0_148] : memref<16x32xf32, #tpu.memory_space<vmem>>, vector<16x32xf32>
      %325 = tpu.concatenate %323, %324 in 1 : vector<16x32xf32>, vector<16x32xf32> -> vector<16x64xf32>
      %326 = arith.truncf %325 : vector<16x64xf32> to vector<16x64xbf16>
      %c0_149 = arith.constant 0 : index
      %c0_150 = arith.constant 0 : index
      %327 = vector.load %arg7[%c0_149, %c0_150] : memref<64x256xbf16, #tpu.memory_space<vmem>>, vector<64x256xbf16>
      %cst_151 = arith.constant dense<0.000000e+00> : vector<16x256xf32>
      %328 = tpu.matmul %326, %327, %cst_151 {dimension_numbers = #tpu.dot_dimension_numbers<[1], [0], [0], [1], [0, 0, 1, 1], [], []>} : vector<16x64xbf16>, vector<64x256xbf16>, vector<16x256xf32> -> vector<16x256xf32>
      %c16_i32_152 = arith.constant 16 : i32
      %329 = arith.muli %c3_i32_144, %c16_i32_152 : i32
      %330 = tpu.assume_multiple %329, 16 : i32
      %331 = arith.index_cast %330 : i32 to index
      %c0_153 = arith.constant 0 : index
      %332 = vector.load %arg16[%331, %c0_153] : memref<64x128xbf16, #tpu.memory_space<vmem>>, vector<16x128xbf16>
      %333 = vector.extract_strided_slice %328 {offsets = [0, 0], sizes = [16, 128], strides = [1, 1]} : vector<16x256xf32> to vector<16x128xf32>
      %334 = arith.extf %332 : vector<16x128xbf16> to vector<16x128xf32>
      %335 = arith.addf %334, %333 : vector<16x128xf32>
      %336 = arith.addi %21, %c3_i32_144 : i32
      %337 = vector.extract_strided_slice %335 {offsets = [0, 0], sizes = [16, 96], strides = [1, 1]} : vector<16x128xf32> to vector<16x96xf32>
      %338 = arith.negf %337 : vector<16x96xf32>
      %339 = math.exp %338 : vector<16x96xf32>
      %cst_154 = arith.constant 1.000000e+00 : f32
      %340 = vector.broadcast %cst_154 : f32 to vector<16x96xf32>
      %341 = arith.addf %340, %339 : vector<16x96xf32>
      %342 = arith.divf %340, %341 : vector<16x96xf32>
      %343 = vector.extract_strided_slice %335 {offsets = [0, 96], sizes = [16, 32], strides = [1, 1]} : vector<16x128xf32> to vector<16x32xf32>
      %344 = math.tanh %343 : vector<16x32xf32>
      %345 = vector.extract_strided_slice %342 {offsets = [0, 0], sizes = [16, 32], strides = [1, 1]} : vector<16x96xf32> to vector<16x32xf32>
      %346 = vector.extract_strided_slice %342 {offsets = [0, 32], sizes = [16, 32], strides = [1, 1]} : vector<16x96xf32> to vector<16x32xf32>
      %347 = vector.extract_strided_slice %342 {offsets = [0, 64], sizes = [16, 32], strides = [1, 1]} : vector<16x96xf32> to vector<16x32xf32>
      %c0_155 = arith.constant 0 : index
      %c0_156 = arith.constant 0 : index
      %348 = vector.load %arg13[%c0_155, %c0_156] : memref<16x32xf32, #tpu.memory_space<vmem>>, vector<16x32xf32>
      %349 = arith.mulf %346, %348 : vector<16x32xf32>
      %350 = arith.mulf %345, %344 : vector<16x32xf32>
      %351 = arith.addf %349, %350 : vector<16x32xf32>
      %352 = math.tanh %351 : vector<16x32xf32>
      %353 = arith.mulf %347, %352 : vector<16x32xf32>
      %354 = vector.broadcast %336 : i32 to vector<16x1xi32>
      %355 = arith.cmpi slt, %354, %0 : vector<16x1xi32>
      %c0_157 = arith.constant 0 : index
      %c0_158 = arith.constant 0 : index
      %356 = vector.load %arg12[%c0_157, %c0_158] : memref<16x32xf32, #tpu.memory_space<vmem>>, vector<16x32xf32>
      %357 = vector.shape_cast %355 : vector<16x1xi1> to vector<16x1xi1>
      %358 = vector.broadcast %357 : vector<16x1xi1> to vector<16x32xi1>
      %359 = arith.select %358, %353, %356 : vector<16x32xi1>, vector<16x32xf32>
      %c0_159 = arith.constant 0 : index
      %c0_160 = arith.constant 0 : index
      %360 = vector.load %arg12[%c0_159, %c0_160] : memref<16x32xf32, #tpu.memory_space<vmem>>, vector<16x32xf32>
      tpu.vector_store %arg12[%c0_159, %c0_160], %359 {strides = array<i32>} : memref<16x32xf32, #tpu.memory_space<vmem>>, vector<16x32xf32>,
      %c0_161 = arith.constant 0 : index
      %c0_162 = arith.constant 0 : index
      %361 = vector.load %arg13[%c0_161, %c0_162] : memref<16x32xf32, #tpu.memory_space<vmem>>, vector<16x32xf32>
      %362 = vector.shape_cast %355 : vector<16x1xi1> to vector<16x1xi1>
      %363 = vector.broadcast %362 : vector<16x1xi1> to vector<16x32xi1>
      %364 = arith.select %363, %351, %361 : vector<16x32xi1>, vector<16x32xf32>
      %c0_163 = arith.constant 0 : index
      %c0_164 = arith.constant 0 : index
      %365 = vector.load %arg13[%c0_163, %c0_164] : memref<16x32xf32, #tpu.memory_space<vmem>>, vector<16x32xf32>
      tpu.vector_store %arg13[%c0_163, %c0_164], %364 {strides = array<i32>} : memref<16x32xf32, #tpu.memory_space<vmem>>, vector<16x32xf32>,
      %cst_165 = arith.constant 0.000000e+00 : f32
      %366 = vector.shape_cast %355 : vector<16x1xi1> to vector<16x1xi1>
      %367 = vector.broadcast %366 : vector<16x1xi1> to vector<16x32xi1>
      %368 = vector.broadcast %cst_165 : f32 to vector<16x32xf32>
      %369 = arith.select %367, %353, %368 : vector<16x32xi1>, vector<16x32xf32>
      %370 = arith.index_cast %c3_i32_144 : i32 to index
      %c0_166 = arith.constant 0 : index
      %c0_167 = arith.constant 0 : index
      %371 = vector.load %arg10[%370, %c0_166, %c0_167] : memref<4x16x32xf32, #tpu.memory_space<vmem>>, vector<1x16x32xf32>
      %372 = vector.shape_cast %371 : vector<1x16x32xf32> to vector<16x32xf32>
      %373 = vector.shape_cast %369 : vector<16x32xf32> to vector<1x16x32xf32>
      tpu.vector_store %arg10[%370, %c0_166, %c0_167], %373 {strides = array<i32>} : memref<4x16x32xf32, #tpu.memory_space<vmem>>, vector<1x16x32xf32>,
      %c3_i32_168 = arith.constant 3 : i32
      %374 = arith.subi %c3_i32_168, %c3_i32_144 : i32
      %c16_i32_169 = arith.constant 16 : i32
      %375 = arith.muli %374, %c16_i32_169 : i32
      %376 = tpu.assume_multiple %375, 16 : i32
      %377 = arith.index_cast %376 : i32 to index
      %c0_170 = arith.constant 0 : index
      %378 = vector.load %arg17[%377, %c0_170] : memref<64x128xbf16, #tpu.memory_space<vmem>>, vector<16x128xbf16>
      %379 = vector.extract_strided_slice %328 {offsets = [0, 128], sizes = [16, 128], strides = [1, 1]} : vector<16x256xf32> to vector<16x128xf32>
      %380 = arith.extf %378 : vector<16x128xbf16> to vector<16x128xf32>
      %381 = arith.addf %380, %379 : vector<16x128xf32>
      %382 = arith.addi %23, %374 : i32
      %383 = vector.extract_strided_slice %381 {offsets = [0, 0], sizes = [16, 96], strides = [1, 1]} : vector<16x128xf32> to vector<16x96xf32>
      %384 = arith.negf %383 : vector<16x96xf32>
      %385 = math.exp %384 : vector<16x96xf32>
      %cst_171 = arith.constant 1.000000e+00 : f32
      %386 = vector.broadcast %cst_171 : f32 to vector<16x96xf32>
      %387 = arith.addf %386, %385 : vector<16x96xf32>
      %388 = arith.divf %386, %387 : vector<16x96xf32>
      %389 = vector.extract_strided_slice %381 {offsets = [0, 96], sizes = [16, 32], strides = [1, 1]} : vector<16x128xf32> to vector<16x32xf32>
      %390 = math.tanh %389 : vector<16x32xf32>
      %391 = vector.extract_strided_slice %388 {offsets = [0, 0], sizes = [16, 32], strides = [1, 1]} : vector<16x96xf32> to vector<16x32xf32>
      %392 = vector.extract_strided_slice %388 {offsets = [0, 32], sizes = [16, 32], strides = [1, 1]} : vector<16x96xf32> to vector<16x32xf32>
      %393 = vector.extract_strided_slice %388 {offsets = [0, 64], sizes = [16, 32], strides = [1, 1]} : vector<16x96xf32> to vector<16x32xf32>
      %c0_172 = arith.constant 0 : index
      %c0_173 = arith.constant 0 : index
      %394 = vector.load %arg15[%c0_172, %c0_173] : memref<16x32xf32, #tpu.memory_space<vmem>>, vector<16x32xf32>
      %395 = arith.mulf %392, %394 : vector<16x32xf32>
      %396 = arith.mulf %391, %390 : vector<16x32xf32>
      %397 = arith.addf %395, %396 : vector<16x32xf32>
      %398 = math.tanh %397 : vector<16x32xf32>
      %399 = arith.mulf %393, %398 : vector<16x32xf32>
      %400 = vector.broadcast %382 : i32 to vector<16x1xi32>
      %401 = arith.cmpi slt, %400, %0 : vector<16x1xi32>
      %c0_174 = arith.constant 0 : index
      %c0_175 = arith.constant 0 : index
      %402 = vector.load %arg14[%c0_174, %c0_175] : memref<16x32xf32, #tpu.memory_space<vmem>>, vector<16x32xf32>
      %403 = vector.shape_cast %401 : vector<16x1xi1> to vector<16x1xi1>
      %404 = vector.broadcast %403 : vector<16x1xi1> to vector<16x32xi1>
      %405 = arith.select %404, %399, %402 : vector<16x32xi1>, vector<16x32xf32>
      %c0_176 = arith.constant 0 : index
      %c0_177 = arith.constant 0 : index
      %406 = vector.load %arg14[%c0_176, %c0_177] : memref<16x32xf32, #tpu.memory_space<vmem>>, vector<16x32xf32>
      tpu.vector_store %arg14[%c0_176, %c0_177], %405 {strides = array<i32>} : memref<16x32xf32, #tpu.memory_space<vmem>>, vector<16x32xf32>,
      %c0_178 = arith.constant 0 : index
      %c0_179 = arith.constant 0 : index
      %407 = vector.load %arg15[%c0_178, %c0_179] : memref<16x32xf32, #tpu.memory_space<vmem>>, vector<16x32xf32>
      %408 = vector.shape_cast %401 : vector<16x1xi1> to vector<16x1xi1>
      %409 = vector.broadcast %408 : vector<16x1xi1> to vector<16x32xi1>
      %410 = arith.select %409, %397, %407 : vector<16x32xi1>, vector<16x32xf32>
      %c0_180 = arith.constant 0 : index
      %c0_181 = arith.constant 0 : index
      %411 = vector.load %arg15[%c0_180, %c0_181] : memref<16x32xf32, #tpu.memory_space<vmem>>, vector<16x32xf32>
      tpu.vector_store %arg15[%c0_180, %c0_181], %410 {strides = array<i32>} : memref<16x32xf32, #tpu.memory_space<vmem>>, vector<16x32xf32>,
      %cst_182 = arith.constant 0.000000e+00 : f32
      %412 = vector.shape_cast %401 : vector<16x1xi1> to vector<16x1xi1>
      %413 = vector.broadcast %412 : vector<16x1xi1> to vector<16x32xi1>
      %414 = vector.broadcast %cst_182 : f32 to vector<16x32xf32>
      %415 = arith.select %413, %399, %414 : vector<16x32xi1>, vector<16x32xf32>
      %416 = arith.index_cast %374 : i32 to index
      %c0_183 = arith.constant 0 : index
      %c0_184 = arith.constant 0 : index
      %417 = vector.load %arg11[%416, %c0_183, %c0_184] : memref<4x16x32xf32, #tpu.memory_space<vmem>>, vector<1x16x32xf32>
      %418 = vector.shape_cast %417 : vector<1x16x32xf32> to vector<16x32xf32>
      %419 = vector.shape_cast %415 : vector<16x32xf32> to vector<1x16x32xf32>
      tpu.vector_store %arg11[%416, %c0_183, %c0_184], %419 {strides = array<i32>} : memref<4x16x32xf32, #tpu.memory_space<vmem>>, vector<1x16x32xf32>,
      %c4_i32_185 = arith.constant 4 : i32
    } else {
    }
    return
  }
  func.func @transform_0(%arg0: i32, %arg1: memref<1xi32, #tpu.memory_space<smem>>) -> (i32, i32) {
    %c0_i32 = arith.constant 0 : i32
    %c0_i32_0 = arith.constant 0 : i32
    %c0_i32_1 = arith.constant 0 : i32
    return %c0_i32, %c0_i32_0 : i32, i32
  }
  func.func @transform_1(%arg0: i32, %arg1: memref<1xi32, #tpu.memory_space<smem>>) -> (i32, i32) {
    %c0_i32 = arith.constant 0 : i32
    %c0_i32_0 = arith.constant 0 : i32
    return %arg0, %c0_i32 : i32, i32
  }
  func.func @transform_2(%arg0: i32, %arg1: memref<1xi32, #tpu.memory_space<smem>>) -> (i32, i32) {
    %c0_i32 = arith.constant 0 : i32
    %0 = arith.subi %c0_i32, %arg0 : i32
    %c0_i32_0 = arith.constant 0 : i32
    %c0_i32_1 = arith.constant 0 : i32
    return %0, %c0_i32_0 : i32, i32
  }
  func.func @transform_3(%arg0: i32, %arg1: memref<1xi32, #tpu.memory_space<smem>>) -> (i32, i32) {
    %c0_i32 = arith.constant 0 : i32
    %c0_i32_0 = arith.constant 0 : i32
    %c0_i32_1 = arith.constant 0 : i32
    return %c0_i32, %c0_i32_0 : i32, i32
  }
  func.func @transform_4(%arg0: i32, %arg1: memref<1xi32, #tpu.memory_space<smem>>) -> (i32, i32) {
    %c0_i32 = arith.constant 0 : i32
    %c0_i32_0 = arith.constant 0 : i32
    %c0_i32_1 = arith.constant 0 : i32
    return %c0_i32, %c0_i32_0 : i32, i32
  }
  func.func @transform_5(%arg0: i32, %arg1: memref<1xi32, #tpu.memory_space<smem>>) -> (i32, i32) {
    %c0_i32 = arith.constant 0 : i32
    %c0_i32_0 = arith.constant 0 : i32
    %c0_i32_1 = arith.constant 0 : i32
    return %c0_i32, %c0_i32_0 : i32, i32
  }
  func.func @transform_6(%arg0: i32, %arg1: memref<1xi32, #tpu.memory_space<smem>>) -> (i32, i32) {
    %c0_i32 = arith.constant 0 : i32
    %c0_i32_0 = arith.constant 0 : i32
    %c0_i32_1 = arith.constant 0 : i32
    return %c0_i32, %c0_i32_0 : i32, i32
  }
  func.func @transform_7(%arg0: i32, %arg1: memref<1xi32, #tpu.memory_space<smem>>) -> (i32, i32) {
    %c0_i32 = arith.constant 0 : i32
    %c0_i32_0 = arith.constant 0 : i32
    %c0_i32_1 = arith.constant 0 : i32
    return %c0_i32, %c0_i32_0 : i32, i32
  }
  func.func @transform_8(%arg0: i32, %arg1: memref<1xi32, #tpu.memory_space<smem>>) -> (i32, i32, i32) {
    %c0_i32 = arith.constant 0 : i32
    %c0_i32_0 = arith.constant 0 : i32
    %c0_i32_1 = arith.constant 0 : i32
    return %arg0, %c0_i32, %c0_i32_0 : i32, i32, i32
  }
  func.func @transform_9(%arg0: i32, %arg1: memref<1xi32, #tpu.memory_space<smem>>) -> (i32, i32, i32) {
    %c0_i32 = arith.constant 0 : i32
    %0 = arith.subi %c0_i32, %arg0 : i32
    %c0_i32_0 = arith.constant 0 : i32
    %c0_i32_1 = arith.constant 0 : i32
    %c0_i32_2 = arith.constant 0 : i32
    return %0, %c0_i32_0, %c0_i32_1 : i32, i32, i32
  }
}

</mosaic_0001>

<bundles_post_ra>
// kernel: tpu_custom_call.1
= control target key start
LH: loop header
LB: loop body
LE: loop exit
PB: predicated region body
PF: predicated region fallthrough
CT: control target
= control target key end

     0   :  { %17 = vsyncpa [#allocation11], 0  ;;  %s4988_s0 = inlined_call_operand.<no memory space> [shape: s32[1], index: 0, kind: input, shape index: {}]   ;;  %s4989_s1 = inlined_call_operand.vmem [shape: s32[16,1], index: 1, kind: input, shape index: {}]   ;;  %s4990_s2 = inlined_call_operand.vmem [shape: bf16[64,32], index: 2, kind: input, shape index: {}]   ;;  %s4991_s3 = inlined_call_operand.vmem [shape: bf16[64,32], index: 3, kind: input, shape index: {}]   ;;  %s4992_s4 = inlined_call_operand.vmem [shape: bf16[32,128], index: 4, kind: input, shape index: {}]   ;;  %s4993_s5 = inlined_call_operand.vmem [shape: bf16[32,128], index: 5, kind: input, shape index: {}]   ;;  %s4994_s6 = inlined_call_operand.vmem [shape: bf16[64,256], index: 6, kind: input, shape index: {}]   ;;  %s4995_s7 = inlined_call_operand.vmem [shape: f32[1,128], index: 7, kind: input, shape index: {}]   ;;  %s4996_s8 = inlined_call_operand.vmem [shape: f32[1,128], index: 8, kind: input, shape index: {}]   ;;  %s4997_s9 = inlined_call_operand.hbm [shape: f32[4,16,32], index: 9, kind: output, shape index: {0}]   ;;  %s4998_s10 = inlined_call_operand.hbm [shape: f32[4,16,32], index: 10, kind: output, shape index: {1}]  }
   0x1   :  { %18 = vsyncpa [#allocation13], 0  ;;  %v3918_v0 = vld [vmem:[%s4989_s1] sm:$0xff]  ;;  %v3923_v1 = vld [vmem:[%s4989_s1 + $0x8] sm:$0xff]  ;;  %vm67_vm0 = vcmask 261120   ;;  %v3847_v3 = vmov 0.0  }
   0x2   :  { %v3457_v2 = vld [vmem:[%s4992_s4 + $0x8] sm:$0xff]   ;;  %68 = vst.msk [vmem:[#allocation2] sm:$0xff] %vm67_vm0, %v3847_v3  ;;  %69 = vst.msk [vmem:[#allocation2 + $0x8] sm:$0xff] %vm67_vm0, %v3847_v3  ;;  %v3459_v5 = vld [vmem:[%s4992_s4] sm:$0xff]   ;;  %p3159_p0 = scmp.lt.s32.totalorder %s4988_s0, 4 }
   0x3   :  { %70 = vst.msk [vmem:[#allocation3] sm:$0xff] %vm67_vm0, %v3847_v3  ;;  %71 = vst.msk [vmem:[#allocation3 + $0x8] sm:$0xff] %vm67_vm0, %v3847_v3  ;;  %v3458_v4 = vld [vmem:[%s4993_s5 + $0x8] sm:$0xff]   ;;  %3420 = vmatprep.subr.bf16.mxu0 %v3457_v2  ;;  %v3460_v6 = vld [vmem:[%s4993_s5] sm:$0xff]   ;;  %s3849_s25 = smov (!%p3159_p0), 32   ;;  %s3850_s14 = smov (!%p3159_p0), 64  }
   0x4   :  { %72 = vst.msk [vmem:[#allocation4] sm:$0xff] %vm67_vm0, %v3847_v3  ;;  %73 = vst.msk [vmem:[#allocation4 + $0x8] sm:$0xff] %vm67_vm0, %v3847_v3  ;;  %3432 = vmatprep.subr.bf16.mxu1 %v3458_v4  ;;  %3421 = vmatpush3.bf16.msra.mxu0 %v3457_v2  ;;  %v3461_v7 = vld [vmem:[%s4990_s2] sm:$0xff]   ;;  %v3463_v9 = vld [vmem:[%s4990_s2 + $0x8] sm:$0xff]   ;;  %s3851_s15 = smov (!%p3159_p0), 96  }
   0x5   :  { %74 = vst.msk [vmem:[#allocation5] sm:$0xff] %vm67_vm0, %v3847_v3  ;;  %75 = vst.msk [vmem:[#allocation5 + $0x8] sm:$0xff] %vm67_vm0, %v3847_v3  ;;  %3433 = vmatpush3.bf16.msra.mxu1 %v3458_v4  ;;  %3422 = vmatprep.subr.bf16.mxu0 %v3459_v5  ;;  %v3462_v8 = vld [vmem:[%s4991_s3] sm:$0xff]   ;;  %v3464_v10 = vld [vmem:[%s4991_s3 + $0x8] sm:$0xff]  }
   0x6   :  { %3434 = vmatprep.subr.bf16.mxu1 %v3460_v6  ;;  %3424 = vmatprep.mubr.msk.bf16.mxu0 %vm67_vm0, %v3461_v7  ;;  %v3465_v11 = vld [vmem:[%s4990_s2 + $0x10] sm:$0xff]   ;;  %v3467_v13 = vld [vmem:[%s4990_s2 + $0x18] sm:$0xff]   ;;  %v3120_v17 = vld [vmem:[%s4995_s7] ss:$0 sm:$0xff] }
   0x7   :  { %3436 = vmatprep.mubr.msk.bf16.mxu1 %vm67_vm0, %v3462_v8  ;;  %v3466_v12 = vld [vmem:[%s4991_s3 + $0x10] sm:$0xff]   ;;  %v3468_v14 = vld [vmem:[%s4991_s3 + $0x18] sm:$0xff]   ;;  %v3139_v19 = vld [vmem:[%s4996_s8] ss:$0 sm:$0xff] }
   0x8   :  { %3423 = vmatpush3.bf16.msra.mxu0 %v3459_v5 }
   0x9   :  { %3435 = vmatpush3.bf16.msra.mxu1 %v3460_v6 }
   0xb   :  { %3425 = vmatmul.mubr.msk.bf16.vlgmr.msra.gmra.mxu0 %vm67_vm0, %v3463_v9 }
   0xc   :  { %3437 = vmatmul.mubr.msk.bf16.vlgmr.msra.gmra.mxu1 %vm67_vm0, %v3464_v10  ;;  %3428 = vmatprep.mubr.msk.bf16.mxu0 %vm67_vm0, %v3465_v11 }
   0xd   :  { %3440 = vmatprep.mubr.msk.bf16.mxu1 %vm67_vm0, %v3466_v12 }
  0x13   :  { %3429 = vmatmul.mubr.msk.bf16.gmra.mxu0 %vm67_vm0, %v3467_v13 }
  0x14   :  { %3441 = vmatmul.mubr.msk.bf16.gmra.mxu1 %vm67_vm0, %v3468_v14 }
  0xcb   :  { %v3426_v15 = vpop.f32.mrf.mxu0 }
  0xcc   :  { %v3438_v16 = vpop.f32.mrf.mxu1  ;;  %v183_v22 = vadd.f32 %v3426_v15, %v3120_v17 }
  0xcd   :  { %v174_v18 = vpop.f32.mrf.mxu0  ;;  %v351_v25 = vadd.f32 %v3438_v16, %v3139_v19 }
  0xce   :  { %v342_v20 = vpop.f32.mrf.mxu1  ;;  %v175_v28 = vadd.f32 %v3120_v17, %v174_v18 }
  0xcf   :  { %v3427_v21 = vpop.f32.mrf.mxu0  ;;  %v343_v32 = vadd.f32 %v3139_v19, %v342_v20 }
  0xd0   :  { %v186_v23 = vadd.f32 %v3427_v21, %v3120_v17  ;;  %v3439_v24 = vpop.f32.mrf.mxu1 }
  0xd1   :  { %v354_v26 = vadd.f32 %v3439_v24, %v3139_v19  ;;  %v177_v27 = vpop.f32.mrf.mxu0 }
  0xd2   :  { %v3306_v29 = vpack.c.bf16 %v186_v23, %v183_v22  ;;  %v178_v30 = vadd.f32 %v3120_v17, %v177_v27  ;;  %v345_v31 = vpop.f32.mrf.mxu1 }
  0xd3   :  { %v3326_v33 = vpack.c.bf16 %v354_v26, %v351_v25  ;;  %v346_v34 = vadd.f32 %v3139_v19, %v345_v31  ;;  %v3430_v35 = vpop.f32.mrf.mxu0 }
  0xd4   :  { %3402 = vst [vmem:[#allocation6] sm:$0xff] %v3306_v29   ;;  %v3301_v36 = vpack.c.bf16 %v178_v30, %v175_v28  ;;  %v3442_v37 = vpop.f32.mrf.mxu1  ;;  %v199_v42 = vadd.f32 %v3430_v35, %v3120_v17 }
  0xd5   :  { %3405 = vst [vmem:[#allocation7 + $0x18] sm:$0xff] %v3326_v33   ;;  %v3321_v38 = vpack.c.bf16 %v346_v34, %v343_v32  ;;  %v190_v39 = vpop.f32.mrf.mxu0  ;;  %v367_v45 = vadd.f32 %v3442_v37, %v3139_v19 }
  0xd6   :  { %3302 = vst [vmem:[#allocation6 + $0x10] sm:$0xff] %v3301_v36   ;;  %v358_v40 = vpop.f32.mrf.mxu1  ;;  %v191_v48 = vadd.f32 %v3120_v17, %v190_v39 }
  0xd7   :  { %3322 = vst [vmem:[#allocation7] sm:$0xff] %v3321_v38   ;;  %v3431_v41 = vpop.f32.mrf.mxu0  ;;  %v359_v52 = vadd.f32 %v3139_v19, %v358_v40 }
  0xd8   :  { %v202_v43 = vadd.f32 %v3431_v41, %v3120_v17  ;;  %v3443_v44 = vpop.f32.mrf.mxu1 }
  0xd9   :  { %v370_v46 = vadd.f32 %v3443_v44, %v3139_v19  ;;  %v193_v47 = vpop.f32.mrf.mxu0 }
  0xda   :  { %v3316_v49 = vpack.c.bf16 %v202_v43, %v199_v42  ;;  %v194_v50 = vadd.f32 %v3120_v17, %v193_v47  ;;  %v361_v51 = vpop.f32.mrf.mxu1 }
  0xdb   :  { %v3336_v53 = vpack.c.bf16 %v370_v46, %v367_v45  ;;  %v362_v54 = vadd.f32 %v3139_v19, %v361_v51  ;;  %422 = sbr.rel (%p3159_p0) target bundleno = 3525 (0xdc5), region = 41 }
  0xdc   :  { %3404 = vst [vmem:[#allocation6 + $0x8] sm:$0xff] %v3316_v49   ;;  %v3311_v55 = vpack.c.bf16 %v194_v50, %v191_v48 }
  0xdd   :  { %3407 = vst [vmem:[#allocation7 + $0x10] sm:$0xff] %v3336_v53   ;;  %v3331_v56 = vpack.c.bf16 %v362_v54, %v359_v52 }
  0xde   :  { %3403 = vst [vmem:[#allocation6 + $0x18] sm:$0xff] %v3311_v55  }
  0xdf   :  { %3406 = vst [vmem:[#allocation7 + $0x8] sm:$0xff] %v3331_v56  }
  0xe0   :  { %v425_v57 = vld [vmem:[#allocation4] sm:$0xff]  ;;  %v426_v58 = vld [vmem:[#allocation4 + $0x8] sm:$0xff]  ;;  %v3489_v60 = vld [vmem:[%s4994_s6 + $0x34] ss:$8 sps:$4 sm:$0xff]   ;;  %v3848_v62 = vmov 0   ;;  %vm486_vm1 = vcmask 523264  }
  0xe1   :  { %v3469_v59 = vpack.i.bf16 %v426_v58, %v425_v57  ;;  %v3992_v61 = vld [vmem:[%s4994_s6 + $0x30] ss:$8 sps:$4 sm:$0xff]   ;;  %522 = vmatprep.mubr.bf16.mxu0 %v3848_v62  ;;  %805 = vmatprep.mubr.bf16.mxu1 %v3848_v62  ;;  %v3999_v63 = vld [vmem:[%s4994_s6 + $0x24] ss:$8 sps:$4 sm:$0xff]   ;;  %v4006_v2 = vld [vmem:[%s4994_s6 + $0x20] ss:$8 sps:$4 sm:$0xff]  }
  0xe2   :  { %498 = vmatprep.subr.bf16.mxu0 %v3489_v60  ;;  %781 = vmatprep.subr.bf16.mxu1 %v3489_v60  ;;  %v4012_v3 = vld [vmem:[%s4994_s6 + $0x14] ss:$8 sps:$4 sm:$0xff]   ;;  %v4020_v4 = vld [vmem:[%s4994_s6 + $0x10] ss:$8 sps:$4 sm:$0xff]   ;;  %v4026_v5 = vld [vmem:[%s4994_s6 + $0x4] ss:$8 sps:$4 sm:$0xff]  }
  0xe3   :  { %3470 = vrot.lane.b32.xlu0 %v3469_v59, %s3849_s25  ;;  %499 = vmatpush1.bf16.msra.mxu0 %v3992_v61  ;;  %v4034_v6 = vld [vmem:[%s4994_s6] ss:$8 sps:$4 sm:$0xff]   ;;  %v3339_v18 = vld [vmem:[#allocation6 + $0x10] sm:$0xff]   ;;  %v641_v32 = vld [vmem:[#allocation5 + $0x8] sm:$0xff] }
  0xe4   :  { %500 = vmatprep.subr.bf16.mxu0 %v3999_v63  ;;  %782 = vmatpush1.bf16.msra.mxu1 %v3992_v61  ;;  %v423_v8 = vld [vmem:[#allocation2] sm:$0xff]  ;;  %v424_v9 = vld [vmem:[#allocation2 + $0x8] sm:$0xff]  ;;  %v3343_v15 = vld [vmem:[#allocation7 + $0x10] sm:$0xff]   ;;  %v3341_v19 = vunpack.c.h.bf16 %v3339_v18  ;;  %v3340_v25 = vunpack.c.l.bf16 %v3339_v18 }
  0xe5   :  { %783 = vmatprep.subr.bf16.mxu1 %v3999_v63  ;;  %v3344_v16 = vunpack.c.l.bf16 %v3343_v15  ;;  %v3345_v22 = vunpack.c.h.bf16 %v3343_v15  ;;  %v640_v34 = vld [vmem:[#allocation5] sm:$0xff]  ;;  %v554_v56 = vld [vmem:[#allocation3 + $0x8] sm:$0xff] }
  0xe6   :  { %v553_v52 = vld [vmem:[#allocation3] sm:$0xff] }
  0xe7   :  { %501 = vmatpush1.bf16.msra.mxu0 %v4006_v2 }
  0xe8   :  { %502 = vmatprep.subr.bf16.mxu0 %v4012_v3  ;;  %784 = vmatpush1.bf16.msra.mxu1 %v4006_v2 }
  0xe9   :  { %785 = vmatprep.subr.bf16.mxu1 %v4012_v3 }
  0xeb   :  { %503 = vmatpush1.bf16.msra.mxu0 %v4020_v4 }
  0xec   :  { %504 = vmatprep.subr.bf16.mxu0 %v4026_v5  ;;  %786 = vmatpush1.bf16.msra.mxu1 %v4020_v4 }
  0xed   :  { %787 = vmatprep.subr.bf16.mxu1 %v4026_v5 }
  0xef   :  { %505 = vmatpush1.bf16.msra.mxu0 %v4034_v6 }
  0xf0   :  { %788 = vmatpush1.bf16.msra.mxu1 %v4034_v6  ;;  %1066 = vmatprep.subr.bf16.mxu0 %v3489_v60 }
  0xf1   :  { %1351 = vmatprep.subr.bf16.mxu1 %v3489_v60 }
 0x155   :  { %v3471_v7 = vpop.permute.xlu0 %3470 }
 0x156   :  { %v3473_v10 = vunpack.i.h.bf16 %v3471_v7  ;;  %v3472_v11 = vunpack.i.l.bf16 %v3471_v7 }
 0x158   :  { %v435_v12 = vsel %vm67_vm0, %v423_v8, %v3472_v11  ;;  %v436_v13 = vsel %vm67_vm0, %v424_v9, %v3473_v10 }
 0x159   :  { %v437_v14 = vpack.c.bf16 %v436_v13, %v435_v12 }
 0x15b   :  { %3168 = vmatmul.mubr.msk.bf16.vlgmr.msra.gmra.mxu0 %vm486_vm1, %v437_v14 }
 0x15c   :  { %1067 = vmatpush1.bf16.msra.mxu0 %v3992_v61  ;;  %1090 = vmatprep.mubr.bf16.mxu0 %v3848_v62 }
 0x15d   :  { %1068 = vmatprep.subr.bf16.mxu0 %v3999_v63 }
 0x160   :  { %1069 = vmatpush1.bf16.msra.mxu0 %v4006_v2 }
 0x161   :  { %1070 = vmatprep.subr.bf16.mxu0 %v4012_v3 }
 0x164   :  { %1071 = vmatpush1.bf16.msra.mxu0 %v4020_v4 }
 0x165   :  { %1072 = vmatprep.subr.bf16.mxu0 %v4026_v5 }
 0x168   :  { %1073 = vmatpush1.bf16.msra.mxu0 %v4034_v6 }
 0x21b   :  { %v524_v17 = vpop.f32.mrf.mxu0 }
 0x21c   :  { %v537_v28 = vadd.f32 %v3340_v25, %v524_v17 }
 0x21d   :  { %v526_v20 = vpop.f32.mrf.mxu0 }
 0x21e   :  { %v624_v21 = vadd.f32 %v3344_v16, %v526_v20  ;;  %v3169_v37 = vmul.f32 -1.442695, %v537_v28 }
 0x21f   :  { %v528_v23 = vpop.f32.mrf.mxu0 }
 0x220   :  { %v538_v24 = vadd.f32 %v3341_v19, %v528_v23  ;;  %3501 = vtanh.f32 %v624_v21  ;;  %v3171_v35 = vmul.f32 -1.442695, %v624_v21 }
 0x221   :  { %v530_v26 = vpop.f32.mrf.mxu0 }
 0x222   :  { %v625_v27 = vadd.f32 %v3345_v22, %v530_v26  ;;  %3503 = vtanh.f32 %v538_v24  ;;  %v3170_v38 = vmul.f32 -1.442695, %v538_v24 }
 0x224   :  { %3505 = vtanh.f32 %v625_v27  ;;  %v3172_v36 = vmul.f32 -1.442695, %v625_v27 }
 0x225   :  { %3507 = vtanh.f32 %v537_v28 }
 0x226   :  { %3509 = vpow2.f32 %v3171_v35 }
 0x227   :  { %3511 = vpow2.f32 %v3172_v36 }
 0x228   :  { %3513 = vpow2.f32 %v3169_v37 }
 0x229   :  { %3515 = vpow2.f32 %v3170_v38 }
 0x22d   :  { %v3502_v29 = vpop.eup %3501 }
 0x22e   :  { %654 = vrot.lane.b32.xlu0 %v3502_v29, %s3849_s25 }
 0x22f   :  { %v3504_v30 = vpop.eup %3503 }
 0x231   :  { %v3506_v31 = vpop.eup %3505 }
 0x232   :  { %569 = vrot.lane.b32.xlu0 %v3504_v30, %s3849_s25  ;;  %656 = vrot.lane.b32.xlu1 %v3506_v31, %s3849_s25  ;;  %v3508_v33 = vpop.eup %3507 }
 0x233   :  { %v3510_v39 = vpop.eup %3509 }
 0x234   :  { %v632_v40 = vadd.f32 1.0, %v3510_v39  ;;  %v3512_v41 = vpop.eup %3511 }
 0x235   :  { %v633_v42 = vadd.f32 1.0, %v3512_v41  ;;  %v3514_v43 = vpop.eup %3513 }
 0x236   :  { %646 = vrot.lane.b32.xlu0 %v641_v32, %s3849_s25  ;;  %567 = vrot.lane.b32.xlu1 %v3508_v33, %s3849_s25  ;;  %3517 = vrcp.f32 %v632_v40  ;;  %v545_v44 = vadd.f32 1.0, %v3514_v43  ;;  %v3516_v45 = vpop.eup %3515 }
 0x237   :  { %3519 = vrcp.f32 %v633_v42  ;;  %v546_v46 = vadd.f32 1.0, %v3516_v45 }
 0x238   :  { %3521 = vrcp.f32 %v545_v44 }
 0x239   :  { %3523 = vrcp.f32 %v546_v46 }
 0x23a   :  { %644 = vrot.lane.b32.xlu1 %v640_v34, %s3849_s25 }
 0x243   :  { %v3518_v47 = vpop.eup %3517 }
 0x244   :  { %v3520_v50 = vpop.eup %3519 }
 0x245   :  { %v3522_v54 = vpop.eup %3521 }
 0x246   :  { %v3524_v59 = vpop.eup %3523 }
 0x2a0   :  { %v655_v48 = vpop.permute.xlu0 %654 }
 0x2a1   :  { %v660_v49 = vmul.f32 %v3518_v47, %v655_v48 }
 0x2a3   :  { %664 = vrot.lane.b32.xlu1 %v660_v49, %s3849_s25 }
 0x2a4   :  { %v657_v51 = vpop.permute.xlu1 %656  ;;  %v570_v58 = vpop.permute.xlu0 %569 }
 0x2a5   :  { %v661_v53 = vmul.f32 %v3520_v50, %v657_v51  ;;  %v574_v60 = vmul.f32 %v3524_v59, %v570_v58 }
 0x2a7   :  { %557 = vrot.lane.b32.xlu1 %v553_v52, %s3849_s25  ;;  %666 = vrot.lane.b32.xlu0 %v661_v53, %s3849_s25  ;;  %v3351_v52 = vld [vmem:[#allocation7 + $0x8] sm:$0xff]  }
 0x2a8   :  { %v568_v55 = vpop.permute.xlu1 %567  ;;  %v647_v9 = vpop.permute.xlu0 %646  ;;  %v3352_v53 = vunpack.c.l.bf16 %v3351_v52 }
 0x2a9   :  { %v573_v57 = vmul.f32 %v3522_v54, %v568_v55  ;;  %v651_v12 = vmul.f32 %v3520_v50, %v647_v9 }
 0x2ab   :  { %577 = vrot.lane.b32.xlu1 %v573_v57, %s3849_s25  ;;  %559 = vrot.lane.b32.xlu0 %v554_v56, %s3849_s25  ;;  %v3347_v56 = vld [vmem:[#allocation6] sm:$0xff]   ;;  %v3353_v57 = vunpack.c.h.bf16 %v3351_v52 }
 0x2ac   :  { %v645_v7 = vpop.permute.xlu1 %644  ;;  %v3348_v58 = vunpack.c.l.bf16 %v3347_v56 }
 0x2ad   :  { %v650_v8 = vmul.f32 %v3518_v47, %v645_v7 }
 0x2af   :  { %579 = vrot.lane.b32.xlu0 %v574_v60, %s3849_s25 }
 0x315   :  { %v665_v10 = vpop.permute.xlu1 %664 }
 0x316   :  { %v670_v11 = vadd.f32 %v665_v10, %v650_v8 }
 0x318   :  { %3525 = vtanh.f32 %v670_v11 }
 0x319   :  { %v558_v13 = vpop.permute.xlu1 %557  ;;  %v667_v14 = vpop.permute.xlu0 %666 }
 0x31a   :  { %v671_v15 = vadd.f32 %v667_v14, %v651_v12  ;;  %v563_v16 = vmul.f32 %v3522_v54, %v558_v13 }
 0x31c   :  { %3527 = vtanh.f32 %v671_v15 }
 0x31d   :  { %v578_v17 = vpop.permute.xlu1 %577  ;;  %v560_v18 = vpop.permute.xlu0 %559 }
 0x31e   :  { %v4064_v19 = vadd.f32 %v578_v17, %v563_v16  ;;  %v564_v20 = vmul.f32 %v3524_v59, %v560_v18 }
 0x320   :  { %3529 = vtanh.f32 %v4064_v19 }
 0x321   :  { %v580_v21 = vpop.permute.xlu0 %579 }
 0x322   :  { %v4067_v22 = vadd.f32 %v580_v21, %v564_v20 }
 0x324   :  { %3531 = vtanh.f32 %v4067_v22 }
 0x325   :  { %v3526_v23 = vpop.eup %3525 }
 0x326   :  { %676 = vrot.lane.b32.xlu1 %v3526_v23, %s3849_s25 }
 0x329   :  { %v3528_v24 = vpop.eup %3527 }
 0x32a   :  { %678 = vrot.lane.b32.xlu0 %v3528_v24, %s3849_s25 }
 0x32d   :  { %v3530_v25 = vpop.eup %3529 }
 0x32e   :  { %589 = vrot.lane.b32.xlu1 %v3530_v25, %s3849_s25 }
 0x331   :  { %v3532_v26 = vpop.eup %3531 }
 0x332   :  { %591 = vrot.lane.b32.xlu0 %v3532_v26, %s3849_s25 }
 0x398   :  { %v677_v27 = vpop.permute.xlu1 %676 }
 0x399   :  { %v682_v28 = vmul.f32 %v3518_v47, %v677_v27 }
 0x39b   :  { %686 = vrot.lane.b32.xlu1 %v682_v28, %s3850_s14 }
 0x39c   :  { %v679_v29 = vpop.permute.xlu0 %678 }
 0x39d   :  { %v683_v30 = vmul.f32 %v3520_v50, %v679_v29 }
 0x39f   :  { %688 = vrot.lane.b32.xlu0 %v683_v30, %s3850_s14 }
 0x3a0   :  { %v590_v31 = vpop.permute.xlu1 %589 }
 0x3a1   :  { %v595_v32 = vmul.f32 %v3522_v54, %v590_v31 }
 0x3a3   :  { %599 = vrot.lane.b32.xlu1 %v595_v32, %s3850_s14 }
 0x3a4   :  { %v592_v33 = vpop.permute.xlu0 %591 }
 0x3a5   :  { %v596_v34 = vmul.f32 %v3524_v59, %v592_v33 }
 0x3a7   :  { %601 = vrot.lane.b32.xlu0 %v596_v34, %s3850_s14 }
 0x3ab   :  { %696 = vrot.lane.b32.xlu0 %v670_v11, %s3851_s15 }
 0x40d   :  { %v687_v35 = vpop.permute.xlu1 %686 }
 0x40e   :  { %692 = vst.msk [vmem:[#allocation4] sm:$0xff] %vm67_vm0, %v687_v35  ;;  %705 = vst.msk [vmem:[#allocation12 + $0x30] sm:$0xff] %vm67_vm0, %v687_v35 }
 0x411   :  { %v689_v36 = vpop.permute.xlu0 %688 }
 0x412   :  { %693 = vst.msk [vmem:[#allocation4 + $0x8] sm:$0xff] %vm67_vm0, %v689_v36  ;;  %706 = vst.msk [vmem:[#allocation12 + $0x38] sm:$0xff] %vm67_vm0, %v689_v36 }
 0x415   :  { %v600_v37 = vpop.permute.xlu1 %599  ;;  %v709_v39 = vld [vmem:[#allocation4] sm:$0xff] }
 0x416   :  { %605 = vst.msk [vmem:[#allocation2] sm:$0xff] %vm67_vm0, %v600_v37  ;;  %617 = vst.msk [vmem:[#allocation10] sm:$0xff] %vm67_vm0, %v600_v37 }
 0x419   :  { %v602_v38 = vpop.permute.xlu0 %601  ;;  %v710_v40 = vld [vmem:[#allocation4 + $0x8] sm:$0xff] }
 0x41a   :  { %606 = vst.msk [vmem:[#allocation2 + $0x8] sm:$0xff] %vm67_vm0, %v602_v38  ;;  %618 = vst.msk [vmem:[#allocation10 + $0x8] sm:$0xff] %vm67_vm0, %v602_v38  ;;  %v3474_v41 = vpack.i.bf16 %v710_v40, %v709_v39 }
 0x41c   :  { %3475 = vrot.lane.b32.xlu1 %v3474_v41, %s3849_s25 }
 0x41d   :  { %v697_v42 = vpop.permute.xlu0 %696  ;;  %v707_v46 = vld [vmem:[#allocation2] sm:$0xff] }
 0x41e   :  { %702 = vst.msk [vmem:[#allocation5] sm:$0xff] %vm67_vm0, %v697_v42 }
 0x420   :  { %698 = vrot.lane.b32.xlu1 %v671_v15, %s3851_s15 }
 0x421   :  { %v708_v47 = vld [vmem:[#allocation2 + $0x8] sm:$0xff] }
 0x425   :  { %v925_v8 = vld [vmem:[#allocation5] sm:$0xff] }
 0x48e   :  { %v3476_v43 = vpop.permute.xlu1 %3475 }
 0x48f   :  { %v3478_v44 = vunpack.i.h.bf16 %v3476_v43  ;;  %v3477_v45 = vunpack.i.l.bf16 %v3476_v43 }
 0x491   :  { %v719_v48 = vsel %vm67_vm0, %v707_v46, %v3477_v45  ;;  %v720_v49 = vsel %vm67_vm0, %v708_v47, %v3478_v44 }
 0x492   :  { %v721_v50 = vpack.c.bf16 %v720_v49, %v719_v48  ;;  %v699_v51 = vpop.permute.xlu1 %698 }
 0x493   :  { %703 = vst.msk [vmem:[#allocation5 + $0x8] sm:$0xff] %vm67_vm0, %v699_v51 }
 0x494   :  { %3181 = vmatmul.mubr.msk.bf16.vlgmr.msra.gmra.mxu1 %vm486_vm1, %v721_v50 }
 0x495   :  { %1352 = vmatpush1.bf16.msra.mxu1 %v3992_v61  ;;  %1375 = vmatprep.mubr.bf16.mxu1 %v3848_v62 }
 0x496   :  { %1353 = vmatprep.subr.bf16.mxu1 %v3999_v63 }
 0x499   :  { %1354 = vmatpush1.bf16.msra.mxu1 %v4006_v2 }
 0x49a   :  { %1355 = vmatprep.subr.bf16.mxu1 %v4012_v3  ;;  %v3349_v3 = vunpack.c.h.bf16 %v3347_v56  ;;  %v926_v9 = vld [vmem:[#allocation5 + $0x8] sm:$0xff] }
 0x49d   :  { %1356 = vmatpush1.bf16.msra.mxu1 %v4020_v4 }
 0x49e   :  { %1357 = vmatprep.subr.bf16.mxu1 %v4026_v5 }
 0x4a1   :  { %1358 = vmatpush1.bf16.msra.mxu1 %v4034_v6 }
 0x554   :  { %v807_v54 = vpop.f32.mrf.mxu1 }
 0x555   :  { %v821_v59 = vadd.f32 %v3348_v58, %v807_v54 }
 0x556   :  { %v809_v55 = vpop.f32.mrf.mxu1 }
 0x557   :  { %v909_v61 = vadd.f32 %v3352_v53, %v809_v55  ;;  %v3182_v12 = vmul.f32 -1.442695, %v821_v59 }
 0x558   :  { %v811_v62 = vpop.f32.mrf.mxu1 }
 0x559   :  { %3533 = vtanh.f32 %v909_v61  ;;  %v822_v4 = vadd.f32 %v3349_v3, %v811_v62  ;;  %v3184_v10 = vmul.f32 -1.442695, %v909_v61 }
 0x55a   :  { %v813_v63 = vpop.f32.mrf.mxu1 }
 0x55b   :  { %v910_v2 = vadd.f32 %v3353_v57, %v813_v63  ;;  %v3183_v14 = vmul.f32 -1.442695, %v822_v4 }
 0x55d   :  { %3535 = vtanh.f32 %v910_v2  ;;  %v3185_v11 = vmul.f32 -1.442695, %v910_v2 }
 0x55e   :  { %3537 = vtanh.f32 %v821_v59 }
 0x55f   :  { %3539 = vtanh.f32 %v822_v4 }
 0x560   :  { %3541 = vpow2.f32 %v3184_v10 }
 0x561   :  { %3543 = vpow2.f32 %v3185_v11 }
 0x562   :  { %3545 = vpow2.f32 %v3182_v12 }
 0x563   :  { %3547 = vpow2.f32 %v3183_v14 }
 0x566   :  { %v3534_v5 = vpop.eup %3533 }
 0x567   :  { %939 = vrot.lane.b32.xlu0 %v3534_v5, %s3849_s25 }
 0x56a   :  { %v3536_v6 = vpop.eup %3535 }
 0x56b   :  { %609 = vrot.lane.b32.xlu0 %v4064_v19, %s3851_s15  ;;  %941 = vrot.lane.b32.xlu1 %v3536_v6, %s3849_s25  ;;  %v3538_v60 = vpop.eup %3537 }
 0x56c   :  { %v3540_v7 = vpop.eup %3539 }
 0x56d   :  { %v3542_v13 = vpop.eup %3541 }
 0x56e   :  { %v917_v15 = vadd.f32 1.0, %v3542_v13  ;;  %v3544_v16 = vpop.eup %3543 }
 0x56f   :  { %851 = vrot.lane.b32.xlu0 %v3538_v60, %s3849_s25  ;;  %611 = vrot.lane.b32.xlu1 %v4067_v22, %s3851_s15  ;;  %v918_v17 = vadd.f32 1.0, %v3544_v16  ;;  %v3546_v18 = vpop.eup %3545 }
 0x570   :  { %3549 = vrcp.f32 %v917_v15  ;;  %v829_v19 = vadd.f32 1.0, %v3546_v18  ;;  %v3548_v20 = vpop.eup %3547 }
 0x571   :  { %3551 = vrcp.f32 %v918_v17  ;;  %v830_v23 = vadd.f32 1.0, %v3548_v20 }
 0x572   :  { %3553 = vrcp.f32 %v829_v19 }
 0x573   :  { %853 = vrot.lane.b32.xlu1 %v3540_v7, %s3849_s25  ;;  %929 = vrot.lane.b32.xlu0 %v925_v8, %s3849_s25  ;;  %3555 = vrcp.f32 %v830_v23 }
 0x577   :  { %931 = vrot.lane.b32.xlu1 %v926_v9, %s3849_s25 }
 0x57d   :  { %v3550_v21 = vpop.eup %3549 }
 0x57e   :  { %v3552_v25 = vpop.eup %3551 }
 0x57f   :  { %v3554_v32 = vpop.eup %3553 }
 0x580   :  { %v3556_v36 = vpop.eup %3555 }
 0x5d9   :  { %v940_v22 = vpop.permute.xlu0 %939 }
 0x5da   :  { %v945_v24 = vmul.f32 %v3550_v21, %v940_v22 }
 0x5dc   :  { %949 = vrot.lane.b32.xlu0 %v945_v24, %s3849_s25 }
 0x5dd   :  { %v942_v26 = vpop.permute.xlu1 %941  ;;  %v610_v27 = vpop.permute.xlu0 %609 }
 0x5de   :  { %v946_v28 = vmul.f32 %v3552_v25, %v942_v26  ;;  %615 = vst.msk [vmem:[#allocation3] sm:$0xff] %vm67_vm0, %v610_v27 }
 0x5e0   :  { %951 = vrot.lane.b32.xlu1 %v946_v28, %s3849_s25 }
 0x5e1   :  { %v612_v29 = vpop.permute.xlu1 %611  ;;  %v852_v30 = vpop.permute.xlu0 %851 }
 0x5e2   :  { %616 = vst.msk [vmem:[#allocation3 + $0x8] sm:$0xff] %vm67_vm0, %v612_v29  ;;  %v857_v33 = vmul.f32 %v3554_v32, %v852_v30 }
 0x5e5   :  { %v837_v31 = vld [vmem:[#allocation3] sm:$0xff]  ;;  %v854_v34 = vpop.permute.xlu1 %853  ;;  %v930_v38 = vpop.permute.xlu0 %929 }
 0x5e6   :  { %841 = vrot.lane.b32.xlu0 %v837_v31, %s3849_s25  ;;  %v858_v37 = vmul.f32 %v3556_v36, %v854_v34  ;;  %v935_v39 = vmul.f32 %v3550_v21, %v930_v38 }
 0x5e9   :  { %v838_v35 = vld [vmem:[#allocation3 + $0x8] sm:$0xff]  ;;  %v932_v40 = vpop.permute.xlu1 %931 }
 0x5ea   :  { %843 = vrot.lane.b32.xlu1 %v838_v35, %s3849_s25  ;;  %861 = vrot.lane.b32.xlu0 %v857_v33, %s3849_s25  ;;  %v936_v43 = vmul.f32 %v3552_v25, %v932_v40 }
 0x5ee   :  { %863 = vrot.lane.b32.xlu1 %v858_v37, %s3849_s25 }
 0x64e   :  { %v950_v41 = vpop.permute.xlu0 %949 }
 0x64f   :  { %v955_v42 = vadd.f32 %v950_v41, %v935_v39 }
 0x651   :  { %3557 = vtanh.f32 %v955_v42 }
 0x652   :  { %v952_v44 = vpop.permute.xlu1 %951 }
 0x653   :  { %v956_v45 = vadd.f32 %v952_v44, %v936_v43 }
 0x655   :  { %3559 = vtanh.f32 %v956_v45 }
 0x658   :  { %v842_v46 = vpop.permute.xlu0 %841 }
 0x659   :  { %v847_v47 = vmul.f32 %v3554_v32, %v842_v46 }
 0x65c   :  { %v844_v48 = vpop.permute.xlu1 %843  ;;  %v862_v49 = vpop.permute.xlu0 %861 }
 0x65d   :  { %v4120_v50 = vadd.f32 %v862_v49, %v847_v47  ;;  %v848_v52 = vmul.f32 %v3556_v36, %v844_v48 }
 0x65e   :  { %v3558_v51 = vpop.eup %3557 }
 0x65f   :  { %3561 = vtanh.f32 %v4120_v50  ;;  %961 = vrot.lane.b32.xlu0 %v3558_v51, %s3849_s25 }
 0x660   :  { %v864_v53 = vpop.permute.xlu1 %863 }
 0x661   :  { %v4124_v54 = vadd.f32 %v864_v53, %v848_v52 }
 0x662   :  { %v3560_v55 = vpop.eup %3559 }
 0x663   :  { %3563 = vtanh.f32 %v4124_v54  ;;  %963 = vrot.lane.b32.xlu1 %v3560_v55, %s3849_s25 }
 0x66c   :  { %v3562_v56 = vpop.eup %3561 }
 0x66d   :  { %873 = vrot.lane.b32.xlu0 %v3562_v56, %s3849_s25 }
 0x670   :  { %v3564_v61 = vpop.eup %3563 }
 0x671   :  { %875 = vrot.lane.b32.xlu1 %v3564_v61, %s3849_s25 }
 0x6d1   :  { %v962_v57 = vpop.permute.xlu0 %961 }
 0x6d2   :  { %v967_v62 = vmul.f32 %v3550_v21, %v962_v57  ;;  %v3359_v21 = vld [vmem:[#allocation7 + $0x18] sm:$0xff]  }
 0x6d3   :  { %v3360_v22 = vunpack.c.l.bf16 %v3359_v21  ;;  %v3361_v27 = vunpack.c.h.bf16 %v3359_v21 }
 0x6d4   :  { %971 = vrot.lane.b32.xlu0 %v967_v62, %s3850_s14 }
 0x6d5   :  { %v964_v58 = vpop.permute.xlu1 %963 }
 0x6d6   :  { %v968_v63 = vmul.f32 %v3552_v25, %v964_v58  ;;  %v3355_v25 = vld [vmem:[#allocation6 + $0x18] sm:$0xff]  }
 0x6d7   :  { %v3356_v29 = vunpack.c.l.bf16 %v3355_v25  ;;  %v3357_v33 = vunpack.c.h.bf16 %v3355_v25 }
 0x6d8   :  { %973 = vrot.lane.b32.xlu1 %v968_v63, %s3850_s14 }
 0x6df   :  { %v874_v2 = vpop.permute.xlu0 %873 }
 0x6e0   :  { %v879_v59 = vmul.f32 %v3554_v32, %v874_v2 }
 0x6e2   :  { %883 = vrot.lane.b32.xlu0 %v879_v59, %s3850_s14 }
 0x6e3   :  { %v876_v3 = vpop.permute.xlu1 %875 }
 0x6e4   :  { %v880_v4 = vmul.f32 %v3556_v36, %v876_v3 }
 0x6e6   :  { %885 = vrot.lane.b32.xlu1 %v880_v4, %s3850_s14 }
 0x6ea   :  { %981 = vrot.lane.b32.xlu1 %v955_v42, %s3851_s15 }
 0x746   :  { %v972_v5 = vpop.permute.xlu0 %971 }
 0x747   :  { %977 = vst.msk [vmem:[#allocation4] sm:$0xff] %vm67_vm0, %v972_v5  ;;  %990 = vst.msk [vmem:[#allocation12 + $0x20] sm:$0xff] %vm67_vm0, %v972_v5 }
 0x74a   :  { %v974_v6 = vpop.permute.xlu1 %973 }
 0x74b   :  { %978 = vst.msk [vmem:[#allocation4 + $0x8] sm:$0xff] %vm67_vm0, %v974_v6  ;;  %991 = vst.msk [vmem:[#allocation12 + $0x28] sm:$0xff] %vm67_vm0, %v974_v6 }
 0x74e   :  { %v994_v60 = vld [vmem:[#allocation4] sm:$0xff] }
 0x752   :  { %v995_v7 = vld [vmem:[#allocation4 + $0x8] sm:$0xff] }
 0x753   :  { %v3479_v8 = vpack.i.bf16 %v995_v7, %v994_v60 }
 0x754   :  { %v884_v9 = vpop.permute.xlu0 %883 }
 0x755   :  { %889 = vst.msk [vmem:[#allocation2] sm:$0xff] %vm67_vm0, %v884_v9  ;;  %902 = vst.msk [vmem:[#allocation10 + $0x10] sm:$0xff] %vm67_vm0, %v884_v9  ;;  %3480 = vrot.lane.b32.xlu0 %v3479_v8, %s3849_s25 }
 0x758   :  { %v886_v10 = vpop.permute.xlu1 %885 }
 0x759   :  { %890 = vst.msk [vmem:[#allocation2 + $0x8] sm:$0xff] %vm67_vm0, %v886_v10  ;;  %903 = vst.msk [vmem:[#allocation10 + $0x18] sm:$0xff] %vm67_vm0, %v886_v10  ;;  %983 = vrot.lane.b32.xlu0 %v956_v45, %s3851_s15 }
 0x75c   :  { %v982_v11 = vpop.permute.xlu1 %981  ;;  %v992_v15 = vld [vmem:[#allocation2] sm:$0xff] }
 0x75d   :  { %987 = vst.msk [vmem:[#allocation5] sm:$0xff] %vm67_vm0, %v982_v11 }
 0x760   :  { %v993_v16 = vld [vmem:[#allocation2 + $0x8] sm:$0xff] }
 0x764   :  { %v1210_v39 = vld [vmem:[#allocation5] sm:$0xff] }
 0x7c7   :  { %v3481_v12 = vpop.permute.xlu0 %3480 }
 0x7c8   :  { %v3483_v13 = vunpack.i.h.bf16 %v3481_v12  ;;  %v3482_v14 = vunpack.i.l.bf16 %v3481_v12 }
 0x7ca   :  { %v1005_v17 = vsel %vm67_vm0, %v993_v16, %v3483_v13  ;;  %v1004_v18 = vsel %vm67_vm0, %v992_v15, %v3482_v14 }
 0x7cb   :  { %v1006_v19 = vpack.c.bf16 %v1005_v17, %v1004_v18  ;;  %v984_v20 = vpop.permute.xlu0 %983 }
 0x7cc   :  { %988 = vst.msk [vmem:[#allocation5 + $0x8] sm:$0xff] %vm67_vm0, %v984_v20 }
 0x7cd   :  { %3194 = vmatmul.mubr.msk.bf16.vlgmr.msra.gmra.mxu0 %vm486_vm1, %v1006_v19 }
 0x7d3   :  { %v1211_v40 = vld [vmem:[#allocation5 + $0x8] sm:$0xff] }
 0x88d   :  { %v1092_v23 = vpop.f32.mrf.mxu0 }
 0x88e   :  { %v1106_v32 = vadd.f32 %v3356_v29, %v1092_v23 }
 0x88f   :  { %v1094_v24 = vpop.f32.mrf.mxu0 }
 0x890   :  { %v1194_v26 = vadd.f32 %v3360_v22, %v1094_v24  ;;  %v3195_v43 = vmul.f32 -1.442695, %v1106_v32 }
 0x891   :  { %v1096_v28 = vpop.f32.mrf.mxu0 }
 0x892   :  { %3565 = vtanh.f32 %v1194_v26  ;;  %v1107_v34 = vadd.f32 %v3357_v33, %v1096_v28  ;;  %v3197_v41 = vmul.f32 -1.442695, %v1194_v26 }
 0x893   :  { %v1098_v30 = vpop.f32.mrf.mxu0 }
 0x894   :  { %v1195_v31 = vadd.f32 %v3361_v27, %v1098_v30  ;;  %v3196_v45 = vmul.f32 -1.442695, %v1107_v34 }
 0x896   :  { %3567 = vtanh.f32 %v1195_v31  ;;  %v3198_v42 = vmul.f32 -1.442695, %v1195_v31 }
 0x897   :  { %3569 = vtanh.f32 %v1106_v32 }
 0x898   :  { %3571 = vtanh.f32 %v1107_v34 }
 0x899   :  { %3573 = vpow2.f32 %v3197_v41 }
 0x89a   :  { %3575 = vpow2.f32 %v3198_v42 }
 0x89b   :  { %3577 = vpow2.f32 %v3195_v43 }
 0x89c   :  { %3579 = vpow2.f32 %v3196_v45 }
 0x89f   :  { %v3566_v35 = vpop.eup %3565 }
 0x8a0   :  { %1224 = vrot.lane.b32.xlu1 %v3566_v35, %s3849_s25 }
 0x8a3   :  { %v3568_v36 = vpop.eup %3567 }
 0x8a4   :  { %893 = vrot.lane.b32.xlu1 %v4120_v50, %s3851_s15  ;;  %1226 = vrot.lane.b32.xlu0 %v3568_v36, %s3849_s25  ;;  %v3570_v37 = vpop.eup %3569 }
 0x8a5   :  { %v3572_v38 = vpop.eup %3571 }
 0x8a6   :  { %v3574_v44 = vpop.eup %3573 }
 0x8a7   :  { %v1202_v46 = vadd.f32 1.0, %v3574_v44  ;;  %v3576_v47 = vpop.eup %3575 }
 0x8a8   :  { %1136 = vrot.lane.b32.xlu1 %v3570_v37, %s3849_s25  ;;  %895 = vrot.lane.b32.xlu0 %v4124_v54, %s3851_s15  ;;  %v1203_v48 = vadd.f32 1.0, %v3576_v47  ;;  %v3578_v49 = vpop.eup %3577 }
 0x8a9   :  { %3581 = vrcp.f32 %v1202_v46  ;;  %v1114_v50 = vadd.f32 1.0, %v3578_v49  ;;  %v3580_v51 = vpop.eup %3579 }
 0x8aa   :  { %3583 = vrcp.f32 %v1203_v48  ;;  %v1115_v54 = vadd.f32 1.0, %v3580_v51 }
 0x8ab   :  { %3585 = vrcp.f32 %v1114_v50 }
 0x8ac   :  { %1214 = vrot.lane.b32.xlu1 %v1210_v39, %s3849_s25  ;;  %1138 = vrot.lane.b32.xlu0 %v3572_v38, %s3849_s25  ;;  %3587 = vrcp.f32 %v1115_v54  ;;  %v3363_v54 = vld [vmem:[#allocation6 + $0x8] sm:$0xff]  }
 0x8b0   :  { %1216 = vrot.lane.b32.xlu0 %v1211_v40, %s3849_s25 }
 0x8b6   :  { %v3582_v52 = vpop.eup %3581 }
 0x8b7   :  { %v3584_v56 = vpop.eup %3583 }
 0x8b8   :  { %v3586_v59 = vpop.eup %3585 }
 0x8b9   :  { %v3588_v6 = vpop.eup %3587 }
 0x912   :  { %v1225_v53 = vpop.permute.xlu1 %1224 }
 0x913   :  { %v1230_v55 = vmul.f32 %v3582_v52, %v1225_v53 }
 0x915   :  { %1234 = vrot.lane.b32.xlu1 %v1230_v55, %s3849_s25  ;;  %v3367_v55 = vld [vmem:[#allocation7] sm:$0xff]  }
 0x916   :  { %v894_v61 = vpop.permute.xlu1 %893  ;;  %v1227_v57 = vpop.permute.xlu0 %1226 }
 0x917   :  { %899 = vst.msk [vmem:[#allocation3] sm:$0xff] %vm67_vm0, %v894_v61  ;;  %v1231_v62 = vmul.f32 %v3584_v56, %v1227_v57  ;;  %v3368_v61 = vunpack.c.l.bf16 %v3367_v55 }
 0x919   :  { %1236 = vrot.lane.b32.xlu0 %v1231_v62, %s3849_s25 }
 0x91a   :  { %v896_v58 = vpop.permute.xlu0 %895  ;;  %v1137_v63 = vpop.permute.xlu1 %1136 }
 0x91b   :  { %900 = vst.msk [vmem:[#allocation3 + $0x8] sm:$0xff] %vm67_vm0, %v896_v58  ;;  %v1142_v3 = vmul.f32 %v3586_v59, %v1137_v63  ;;  %v3365_v58 = vunpack.c.h.bf16 %v3363_v54 }
 0x91e   :  { %v1122_v2 = vld [vmem:[#allocation3] sm:$0xff]  ;;  %v1139_v4 = vpop.permute.xlu0 %1138  ;;  %v1215_v7 = vpop.permute.xlu1 %1214 }
 0x91f   :  { %1126 = vrot.lane.b32.xlu1 %v1122_v2, %s3849_s25  ;;  %v1143_v60 = vmul.f32 %v3588_v6, %v1139_v4  ;;  %v1220_v8 = vmul.f32 %v3582_v52, %v1215_v7 }
 0x922   :  { %v1123_v5 = vld [vmem:[#allocation3 + $0x8] sm:$0xff]  ;;  %v1217_v9 = vpop.permute.xlu0 %1216 }
 0x923   :  { %1146 = vrot.lane.b32.xlu1 %v1142_v3, %s3849_s25  ;;  %1128 = vrot.lane.b32.xlu0 %v1123_v5, %s3849_s25  ;;  %v1221_v12 = vmul.f32 %v3584_v56, %v1217_v9  ;;  %v3369_v3 = vunpack.c.h.bf16 %v3367_v55 }
 0x927   :  { %1148 = vrot.lane.b32.xlu0 %v1143_v60, %s3849_s25 }
 0x987   :  { %v1235_v10 = vpop.permute.xlu1 %1234 }
 0x988   :  { %v1240_v11 = vadd.f32 %v1235_v10, %v1220_v8 }
 0x98a   :  { %3589 = vtanh.f32 %v1240_v11 }
 0x98b   :  { %v1237_v13 = vpop.permute.xlu0 %1236 }
 0x98c   :  { %v1241_v14 = vadd.f32 %v1237_v13, %v1221_v12 }
 0x98e   :  { %3591 = vtanh.f32 %v1241_v14 }
 0x991   :  { %v1127_v15 = vpop.permute.xlu1 %1126 }
 0x992   :  { %v1132_v16 = vmul.f32 %v3586_v59, %v1127_v15 }
 0x995   :  { %v1147_v17 = vpop.permute.xlu1 %1146  ;;  %v1129_v18 = vpop.permute.xlu0 %1128 }
 0x996   :  { %v1152_v19 = vadd.f32 %v1147_v17, %v1132_v16  ;;  %v1133_v21 = vmul.f32 %v3588_v6, %v1129_v18 }
 0x997   :  { %v3590_v20 = vpop.eup %3589 }
 0x998   :  { %3593 = vtanh.f32 %v1152_v19  ;;  %1246 = vrot.lane.b32.xlu1 %v3590_v20, %s3849_s25 }
 0x999   :  { %v1149_v22 = vpop.permute.xlu0 %1148 }
 0x99a   :  { %v1153_v23 = vadd.f32 %v1149_v22, %v1133_v21 }
 0x99b   :  { %v3592_v24 = vpop.eup %3591 }
 0x99c   :  { %3595 = vtanh.f32 %v1153_v23  ;;  %1248 = vrot.lane.b32.xlu0 %v3592_v24, %s3849_s25 }
 0x9a5   :  { %v3594_v25 = vpop.eup %3593 }
 0x9a6   :  { %1158 = vrot.lane.b32.xlu1 %v3594_v25, %s3849_s25 }
 0x9a9   :  { %v3596_v26 = vpop.eup %3595 }
 0x9aa   :  { %1160 = vrot.lane.b32.xlu0 %v3596_v26, %s3849_s25 }
 0xa0a   :  { %v1247_v27 = vpop.permute.xlu1 %1246 }
 0xa0b   :  { %v1252_v28 = vmul.f32 %v3582_v52, %v1247_v27 }
 0xa0d   :  { %1256 = vrot.lane.b32.xlu1 %v1252_v28, %s3850_s14 }
 0xa0e   :  { %v1249_v29 = vpop.permute.xlu0 %1248 }
 0xa0f   :  { %v1253_v30 = vmul.f32 %v3584_v56, %v1249_v29  ;;  %v3364_v56 = vunpack.c.l.bf16 %v3363_v54 }
 0xa11   :  { %1258 = vrot.lane.b32.xlu0 %v1253_v30, %s3850_s14 }
 0xa18   :  { %v1159_v31 = vpop.permute.xlu1 %1158 }
 0xa19   :  { %v1164_v32 = vmul.f32 %v3586_v59, %v1159_v31 }
 0xa1b   :  { %1168 = vrot.lane.b32.xlu1 %v1164_v32, %s3850_s14 }
 0xa1c   :  { %v1161_v33 = vpop.permute.xlu0 %1160 }
 0xa1d   :  { %v1165_v34 = vmul.f32 %v3588_v6, %v1161_v33 }
 0xa1f   :  { %1170 = vrot.lane.b32.xlu0 %v1165_v34, %s3850_s14 }
 0xa23   :  { %1178 = vrot.lane.b32.xlu0 %v1152_v19, %s3851_s15 }
 0xa27   :  { %1266 = vrot.lane.b32.xlu0 %v1240_v11, %s3851_s15 }
 0xa7f   :  { %v1257_v35 = vpop.permute.xlu1 %1256 }
 0xa80   :  { %1262 = vst.msk [vmem:[#allocation4] sm:$0xff] %vm67_vm0, %v1257_v35  ;;  %1275 = vst.msk [vmem:[#allocation12 + $0x10] sm:$0xff] %vm67_vm0, %v1257_v35 }
 0xa83   :  { %v1259_v36 = vpop.permute.xlu0 %1258 }
 0xa84   :  { %1263 = vst.msk [vmem:[#allocation4 + $0x8] sm:$0xff] %vm67_vm0, %v1259_v36  ;;  %1276 = vst.msk [vmem:[#allocation12 + $0x18] sm:$0xff] %vm67_vm0, %v1259_v36 }
 0xa87   :  { %v1279_v37 = vld [vmem:[#allocation4] sm:$0xff] }
 0xa8b   :  { %v1280_v38 = vld [vmem:[#allocation4 + $0x8] sm:$0xff] }
 0xa8c   :  { %v3484_v39 = vpack.i.bf16 %v1280_v38, %v1279_v37 }
 0xa8d   :  { %v1169_v40 = vpop.permute.xlu1 %1168 }
 0xa8e   :  { %1174 = vst.msk [vmem:[#allocation2] sm:$0xff] %vm67_vm0, %v1169_v40  ;;  %1187 = vst.msk [vmem:[#allocation10 + $0x20] sm:$0xff] %vm67_vm0, %v1169_v40  ;;  %3485 = vrot.lane.b32.xlu1 %v3484_v39, %s3849_s25 }
 0xa91   :  { %v1171_v41 = vpop.permute.xlu0 %1170 }
 0xa92   :  { %1175 = vst.msk [vmem:[#allocation2 + $0x8] sm:$0xff] %vm67_vm0, %v1171_v41  ;;  %1188 = vst.msk [vmem:[#allocation10 + $0x28] sm:$0xff] %vm67_vm0, %v1171_v41  ;;  %1180 = vrot.lane.b32.xlu1 %v1153_v23, %s3851_s15 }
 0xa95   :  { %v1179_v42 = vpop.permute.xlu0 %1178  ;;  %v1277_v47 = vld [vmem:[#allocation2] sm:$0xff] }
 0xa96   :  { %1184 = vst.msk [vmem:[#allocation3] sm:$0xff] %vm67_vm0, %v1179_v42  ;;  %1268 = vrot.lane.b32.xlu1 %v1241_v14, %s3851_s15 }
 0xa99   :  { %v1267_v43 = vpop.permute.xlu0 %1266  ;;  %v1278_v48 = vld [vmem:[#allocation2 + $0x8] sm:$0xff] }
 0xa9a   :  { %1272 = vst.msk [vmem:[#allocation5] sm:$0xff] %vm67_vm0, %v1267_v43 }
 0xa9d   :  { %v1407_v9 = vld [vmem:[#allocation3] sm:$0xff] }
 0xaa1   :  { %v1494_v11 = vld [vmem:[#allocation5] sm:$0xff] }
 0xb00   :  { %v3486_v44 = vpop.permute.xlu1 %3485 }
 0xb01   :  { %v3488_v45 = vunpack.i.h.bf16 %v3486_v44  ;;  %v3487_v46 = vunpack.i.l.bf16 %v3486_v44 }
 0xb03   :  { %v1289_v49 = vsel %vm67_vm0, %v1277_v47, %v3487_v46  ;;  %v1290_v50 = vsel %vm67_vm0, %v1278_v48, %v3488_v45 }
 0xb04   :  { %v1291_v51 = vpack.c.bf16 %v1290_v50, %v1289_v49  ;;  %v1181_v52 = vpop.permute.xlu1 %1180 }
 0xb05   :  { %1185 = vst.msk [vmem:[#allocation3 + $0x8] sm:$0xff] %vm67_vm0, %v1181_v52 }
 0xb06   :  { %3207 = vmatmul.mubr.msk.bf16.vlgmr.msra.gmra.mxu1 %vm486_vm1, %v1291_v51 }
 0xb08   :  { %v1269_v53 = vpop.permute.xlu1 %1268 }
 0xb09   :  { %1273 = vst.msk [vmem:[#allocation5 + $0x8] sm:$0xff] %vm67_vm0, %v1269_v53 }
 0xb0c   :  { %v1408_v12 = vld [vmem:[#allocation3 + $0x8] sm:$0xff] }
 0xb10   :  { %v1495_v13 = vld [vmem:[#allocation5 + $0x8] sm:$0xff] }
 0xbc6   :  { %v1377_v57 = vpop.f32.mrf.mxu1 }
 0xbc7   :  { %v1391_v62 = vadd.f32 %v3364_v56, %v1377_v57 }
 0xbc8   :  { %v1379_v63 = vpop.f32.mrf.mxu1 }
 0xbc9   :  { %3597 = vtanh.f32 %v1391_v62  ;;  %v1478_v2 = vadd.f32 %v3368_v61, %v1379_v63  ;;  %v3208_v14 = vmul.f32 -1.442695, %v1391_v62 }
 0xbca   :  { %v1381_v59 = vpop.f32.mrf.mxu1 }
 0xbcb   :  { %v1392_v4 = vadd.f32 %v3365_v58, %v1381_v59  ;;  %3599 = vtanh.f32 %v1478_v2  ;;  %v3210_v15 = vmul.f32 -1.442695, %v1478_v2 }
 0xbcc   :  { %v1383_v5 = vpop.f32.mrf.mxu1 }
 0xbcd   :  { %3601 = vtanh.f32 %v1392_v4  ;;  %v1479_v6 = vadd.f32 %v3369_v3, %v1383_v5  ;;  %v3209_v16 = vmul.f32 -1.442695, %v1392_v4 }
 0xbcf   :  { %3603 = vtanh.f32 %v1479_v6  ;;  %v3211_v17 = vmul.f32 -1.442695, %v1479_v6 }
 0xbd0   :  { %3605 = vpow2.f32 %v3208_v14 }
 0xbd1   :  { %3607 = vpow2.f32 %v3210_v15 }
 0xbd2   :  { %3609 = vpow2.f32 %v3209_v16 }
 0xbd3   :  { %3611 = vpow2.f32 %v3211_v17 }
 0xbd6   :  { %v3598_v60 = vpop.eup %3597 }
 0xbd7   :  { %1421 = vrot.lane.b32.xlu0 %v3598_v60, %s3849_s25 }
 0xbd8   :  { %v3600_v7 = vpop.eup %3599 }
 0xbda   :  { %v3602_v8 = vpop.eup %3601 }
 0xbdb   :  { %1508 = vrot.lane.b32.xlu0 %v3600_v7, %s3849_s25  ;;  %1423 = vrot.lane.b32.xlu1 %v3602_v8, %s3849_s25 }
 0xbdc   :  { %v3604_v10 = vpop.eup %3603 }
 0xbdd   :  { %v3606_v18 = vpop.eup %3605 }
 0xbde   :  { %v1399_v19 = vadd.f32 1.0, %v3606_v18  ;;  %v3608_v20 = vpop.eup %3607 }
 0xbdf   :  { %1411 = vrot.lane.b32.xlu0 %v1407_v9, %s3849_s25  ;;  %1510 = vrot.lane.b32.xlu1 %v3604_v10, %s3849_s25  ;;  %v3610_v21 = vpop.eup %3609  ;;  %v1486_v22 = vadd.f32 1.0, %v3608_v20 }
 0xbe0   :  { %3613 = vrcp.f32 %v1399_v19  ;;  %v1400_v23 = vadd.f32 1.0, %v3610_v21  ;;  %v3612_v24 = vpop.eup %3611 }
 0xbe1   :  { %3615 = vrcp.f32 %v1486_v22  ;;  %v1487_v25 = vadd.f32 1.0, %v3612_v24 }
 0xbe2   :  { %3617 = vrcp.f32 %v1400_v23 }
 0xbe3   :  { %1498 = vrot.lane.b32.xlu0 %v1494_v11, %s3849_s25  ;;  %1413 = vrot.lane.b32.xlu1 %v1408_v12, %s3849_s25  ;;  %3619 = vrcp.f32 %v1487_v25 }
 0xbe7   :  { %1500 = vrot.lane.b32.xlu1 %v1495_v13, %s3849_s25 }
 0xbed   :  { %v3614_v26 = vpop.eup %3613 }
 0xbee   :  { %v3616_v29 = vpop.eup %3615 }
 0xbef   :  { %v3618_v31 = vpop.eup %3617 }
 0xbf0   :  { %v3620_v35 = vpop.eup %3619 }
 0xc49   :  { %v1422_v27 = vpop.permute.xlu0 %1421 }
 0xc4a   :  { %v1427_v28 = vmul.f32 %v3614_v26, %v1422_v27 }
 0xc4c   :  { %1431 = vrot.lane.b32.xlu0 %v1427_v28, %s3849_s25 }
 0xc4d   :  { %v1509_v30 = vpop.permute.xlu0 %1508  ;;  %v1424_v32 = vpop.permute.xlu1 %1423 }
 0xc4e   :  { %v1514_v33 = vmul.f32 %v3616_v29, %v1509_v30  ;;  %v1428_v34 = vmul.f32 %v3618_v31, %v1424_v32 }
 0xc50   :  { %1518 = vrot.lane.b32.xlu0 %v1514_v33, %s3849_s25  ;;  %1433 = vrot.lane.b32.xlu1 %v1428_v34, %s3849_s25 }
 0xc51   :  { %v1511_v36 = vpop.permute.xlu1 %1510  ;;  %v1412_v38 = vpop.permute.xlu0 %1411 }
 0xc52   :  { %v1515_v37 = vmul.f32 %v3620_v35, %v1511_v36  ;;  %v1417_v41 = vmul.f32 %v3614_v26, %v1412_v38 }
 0xc54   :  { %1520 = vrot.lane.b32.xlu1 %v1515_v37, %s3849_s25 }
 0xc55   :  { %v1414_v39 = vpop.permute.xlu1 %1413  ;;  %v1499_v40 = vpop.permute.xlu0 %1498 }
 0xc56   :  { %v1504_v45 = vmul.f32 %v3616_v29, %v1499_v40  ;;  %v1418_v46 = vmul.f32 %v3618_v31, %v1414_v39 }
 0xc59   :  { %v1501_v43 = vpop.permute.xlu1 %1500 }
 0xc5a   :  { %v1505_v51 = vmul.f32 %v3620_v35, %v1501_v43 }
 0xcbe   :  { %v1432_v42 = vpop.permute.xlu0 %1431 }
 0xcbf   :  { %v1437_v44 = vadd.f32 %v1432_v42, %v1417_v41 }
 0xcc1   :  { %3621 = vtanh.f32 %v1437_v44 }
 0xcc2   :  { %v1519_v47 = vpop.permute.xlu0 %1518  ;;  %v1434_v48 = vpop.permute.xlu1 %1433 }
 0xcc3   :  { %v1524_v49 = vadd.f32 %v1519_v47, %v1504_v45  ;;  %v1438_v50 = vadd.f32 %v1434_v48, %v1418_v46 }
 0xcc5   :  { %3623 = vtanh.f32 %v1524_v49 }
 0xcc6   :  { %3625 = vtanh.f32 %v1438_v50  ;;  %v1521_v52 = vpop.permute.xlu1 %1520 }
 0xcc7   :  { %v1525_v53 = vadd.f32 %v1521_v52, %v1505_v51 }
 0xcc9   :  { %3627 = vtanh.f32 %v1525_v53 }
 0xcce   :  { %v3622_v54 = vpop.eup %3621 }
 0xccf   :  { %1443 = vrot.lane.b32.xlu0 %v3622_v54, %s3849_s25 }
 0xcd2   :  { %v3624_v55 = vpop.eup %3623 }
 0xcd3   :  { %v3626_v56 = vpop.eup %3625  ;;  %1530 = vrot.lane.b32.xlu0 %v3624_v55, %s3849_s25 }
 0xcd4   :  { %1445 = vrot.lane.b32.xlu1 %v3626_v56, %s3849_s25 }
 0xcd6   :  { %v3628_v61 = vpop.eup %3627 }
 0xcd7   :  { %1463 = vrot.lane.b32.xlu0 %v1437_v44, %s3851_s15 }
 0xcd8   :  { %1532 = vrot.lane.b32.xlu1 %v3628_v61, %s3849_s25 }
 0xcdc   :  { %1465 = vrot.lane.b32.xlu1 %v1438_v50, %s3851_s15 }
 0xd41   :  { %v1444_v57 = vpop.permute.xlu0 %1443 }
 0xd42   :  { %v1449_v62 = vmul.f32 %v3614_v26, %v1444_v57 }
 0xd44   :  { %1453 = vrot.lane.b32.xlu0 %v1449_v62, %s3850_s14 }
 0xd45   :  { %v1531_v58 = vpop.permute.xlu0 %1530 }
 0xd46   :  { %v1446_v63 = vpop.permute.xlu1 %1445  ;;  %v1536_v2 = vmul.f32 %v3616_v29, %v1531_v58 }
 0xd47   :  { %v1450_v59 = vmul.f32 %v3618_v31, %v1446_v63 }
 0xd48   :  { %1540 = vrot.lane.b32.xlu0 %v1536_v2, %s3850_s14 }
 0xd49   :  { %1455 = vrot.lane.b32.xlu1 %v1450_v59, %s3850_s14  ;;  %v1464_v3 = vpop.permute.xlu0 %1463 }
 0xd4a   :  { %v1533_v4 = vpop.permute.xlu1 %1532  ;;  %1469 = vst.msk [vmem:[#allocation3] sm:$0xff] %vm67_vm0, %v1464_v3 }
 0xd4b   :  { %v1537_v5 = vmul.f32 %v3620_v35, %v1533_v4 }
 0xd4c   :  { %1550 = vrot.lane.b32.xlu0 %v1524_v49, %s3851_s15 }
 0xd4d   :  { %1542 = vrot.lane.b32.xlu1 %v1537_v5, %s3850_s14 }
 0xd4e   :  { %v1466_v6 = vpop.permute.xlu1 %1465 }
 0xd4f   :  { %1470 = vst.msk [vmem:[#allocation3 + $0x8] sm:$0xff] %vm67_vm0, %v1466_v6 }
 0xd51   :  { %1552 = vrot.lane.b32.xlu1 %v1525_v53, %s3851_s15 }
 0xdb6   :  { %v1454_v60 = vpop.permute.xlu0 %1453 }
 0xdb7   :  { %1459 = vst.msk [vmem:[#allocation2] sm:$0xff] %vm67_vm0, %v1454_v60  ;;  %1472 = vst.msk [vmem:[#allocation10 + $0x30] sm:$0xff] %vm67_vm0, %v1454_v60 }
 0xdba   :  { %v1541_v7 = vpop.permute.xlu0 %1540 }
 0xdbb   :  { %v1456_v8 = vpop.permute.xlu1 %1455  ;;  %1546 = vst.msk [vmem:[#allocation4] sm:$0xff] %vm67_vm0, %v1541_v7  ;;  %1558 = vst.msk [vmem:[#allocation12] sm:$0xff] %vm67_vm0, %v1541_v7 }
 0xdbc   :  { %1460 = vst.msk [vmem:[#allocation2 + $0x8] sm:$0xff] %vm67_vm0, %v1456_v8  ;;  %1473 = vst.msk [vmem:[#allocation10 + $0x38] sm:$0xff] %vm67_vm0, %v1456_v8 }
 0xdbe   :  { %v1551_v9 = vpop.permute.xlu0 %1550 }
 0xdbf   :  { %v1543_v10 = vpop.permute.xlu1 %1542  ;;  %1556 = vst.msk [vmem:[#allocation5] sm:$0xff] %vm67_vm0, %v1551_v9 }
 0xdc0   :  { %1547 = vst.msk [vmem:[#allocation4 + $0x8] sm:$0xff] %vm67_vm0, %v1543_v10  ;;  %1559 = vst.msk [vmem:[#allocation12 + $0x8] sm:$0xff] %vm67_vm0, %v1543_v10 }
 0xdc3   :  { %v1553_v11 = vpop.permute.xlu1 %1552 }
 0xdc4   :  { %1557 = vst.msk [vmem:[#allocation5 + $0x8] sm:$0xff] %vm67_vm0, %v1553_v11 }
 0xdc5 PF:  { %p3213_p1 = scmp.ge.s32.totalorder %s4988_s0, 4 }
 0xdc6   :  { %s3853_s3 = smov (!%p3213_p1), 32   ;;  %s3854_s28 = smov (!%p3213_p1), 64  }
 0xdc7   :  { %1563 = sbr.rel (%p3213_p1) target bundleno = 6857 (0x1ac9), region = 45  ;;  %s3855_s5 = smov (!%p3213_p1), 96  }
 0xdcc   :  { %v4235_v12 = vld [vmem:[#allocation4] sm:$0xff]  ;;  %v4237_v13 = vld [vmem:[#allocation4 + $0x8] sm:$0xff]  ;;  %v3651_v15 = vld [vmem:[%s4994_s6 + $0x34] ss:$8 sps:$4 sm:$0xff]   ;;  %v3852_v17 = vmov 0   ;;  %vm1627_vm2 = vcmask 523264  }
 0xdcd   :  { %v3629_v14 = vpack.i.bf16 %v4237_v13, %v4235_v12  ;;  %v3653_v16 = vld [vmem:[%s4994_s6 + $0x30] ss:$8 sps:$4 sm:$0xff]   ;;  %1663 = vmatprep.mubr.bf16.mxu0 %v3852_v17  ;;  %3635 = vset.pattern.permute.xlu0 %v3852_v17  ;;  %v3654_v18 = vld [vmem:[%s4994_s6 + $0x24] ss:$8 sps:$4 sm:$0xff]   ;;  %v3656_v19 = vld [vmem:[%s4994_s6 + $0x20] ss:$8 sps:$4 sm:$0xff]  }
 0xdce   :  { %3634 = vset.pattern.permute.xlu1 %v3852_v17  ;;  %2039 = vmatprep.mubr.bf16.mxu1 %v3852_v17  ;;  %v3657_v20 = vld [vmem:[%s4994_s6 + $0x14] ss:$8 sps:$4 sm:$0xff]   ;;  %v3659_v21 = vld [vmem:[%s4994_s6 + $0x10] ss:$8 sps:$4 sm:$0xff]   ;;  %v3660_v22 = vld [vmem:[%s4994_s6 + $0x4] ss:$8 sps:$4 sm:$0xff]  }
 0xdcf   :  { %3630 = vrot.lane.b32.xlu0 %v3629_v14, %s3853_s3  ;;  %1639 = vmatprep.subr.bf16.mxu0 %v3651_v15  ;;  %v3662_v23 = vld [vmem:[%s4994_s6] ss:$8 sps:$4 sm:$0xff]   ;;  %v3375_v32 = vld [vmem:[#allocation7 + $0x10] sm:$0xff]   ;;  %v4283_v49 = vld [vmem:[#allocation5 + $0x8] sm:$0xff]  ;;  %vm3229_vm3 = vcmp.gt.s32.totalorder %v3918_v0, 3  ;;  %vm3230_vm4 = vcmp.gt.s32.totalorder %v3923_v1, 3 }
 0xdd0   :  { %1640 = vmatpush1.bf16.msra.mxu0 %v3653_v16  ;;  %2015 = vmatprep.subr.bf16.mxu1 %v3651_v15  ;;  %v4270_v25 = vld [vmem:[#allocation2] sm:$0xff]  ;;  %v4272_v26 = vld [vmem:[#allocation2 + $0x8] sm:$0xff]  ;;  %v3376_v33 = vunpack.c.l.bf16 %v3375_v32  ;;  %v3371_v35 = vld [vmem:[#allocation6 + $0x10] sm:$0xff]   ;;  %v3377_v39 = vunpack.c.h.bf16 %v3375_v32  ;;  %vm3225_vm5 = vcmp.gt.s32.totalorder %v3918_v0, 0  ;;  %vm3226_vm6 = vcmp.gt.s32.totalorder %v3923_v1, 0 }
 0xdd1   :  { %1641 = vmatprep.subr.bf16.mxu0 %v3654_v18  ;;  %2016 = vmatpush1.bf16.msra.mxu1 %v3653_v16  ;;  %v3373_v36 = vunpack.c.h.bf16 %v3371_v35  ;;  %v3372_v42 = vunpack.c.l.bf16 %v3371_v35  ;;  %v4288_v51 = vld [vmem:[#allocation5] sm:$0xff]  ;;  %v4306_v11 = vld [vmem:[#allocation3 + $0x8] sm:$0xff]  ;;  %vm3246_vm11 = vcmp.gt.s32.totalorder %v3918_v0, 2  ;;  %vm3247_vm12 = vcmp.gt.s32.totalorder %v3923_v1, 2 }
 0xdd2   :  { %2017 = vmatprep.subr.bf16.mxu1 %v3654_v18  ;;  %v4298_v7 = vld [vmem:[#allocation3] sm:$0xff]  ;;  %vm3242_vm13 = vcmp.gt.s32.totalorder %v3918_v0, 1  ;;  %vm3243_vm14 = vcmp.gt.s32.totalorder %v3923_v1, 1 }
 0xdd3   :  { %v4528_v0 = vsel %vm3243_vm14, 1, %v3852_v17 }
 0xdd4   :  { %1642 = vmatpush1.bf16.msra.mxu0 %v3656_v19 }
 0xdd5   :  { %1643 = vmatprep.subr.bf16.mxu0 %v3657_v20  ;;  %2018 = vmatpush1.bf16.msra.mxu1 %v3656_v19 }
 0xdd6   :  { %2019 = vmatprep.subr.bf16.mxu1 %v3657_v20 }
 0xdd8   :  { %1644 = vmatpush1.bf16.msra.mxu0 %v3659_v21 }
 0xdd9   :  { %1645 = vmatprep.subr.bf16.mxu0 %v3660_v22  ;;  %2020 = vmatpush1.bf16.msra.mxu1 %v3659_v21 }
 0xdda   :  { %2021 = vmatprep.subr.bf16.mxu1 %v3660_v22 }
 0xddc   :  { %1646 = vmatpush1.bf16.msra.mxu0 %v3662_v23 }
 0xddd   :  { %2022 = vmatpush1.bf16.msra.mxu1 %v3662_v23  ;;  %2394 = vmatprep.subr.bf16.mxu0 %v3651_v15 }
 0xe41   :  { %v3631_v24 = vpop.permute.xlu0 %3630 }
 0xe42   :  { %v3633_v27 = vunpack.i.h.bf16 %v3631_v24  ;;  %v3632_v28 = vunpack.i.l.bf16 %v3631_v24 }
 0xe44   :  { %v1576_v29 = vsel %vm67_vm0, %v4270_v25, %v3632_v28  ;;  %v1577_v30 = vsel %vm67_vm0, %v4272_v26, %v3633_v27 }
 0xe45   :  { %v1578_v31 = vpack.c.bf16 %v1577_v30, %v1576_v29 }
 0xe47   :  { %3222 = vmatmul.mubr.msk.bf16.vlgmr.msra.gmra.mxu0 %vm1627_vm2, %v1578_v31 }
 0xe48   :  { %2395 = vmatpush1.bf16.msra.mxu0 %v3653_v16  ;;  %2418 = vmatprep.mubr.bf16.mxu0 %v3852_v17 }
 0xe49   :  { %2396 = vmatprep.subr.bf16.mxu0 %v3654_v18  ;;  %v4316_v18 = vsel %vm3229_vm3, 1, %v3852_v17 }
 0xe4c   :  { %2397 = vmatpush1.bf16.msra.mxu0 %v3656_v19 }
 0xe4d   :  { %2398 = vmatprep.subr.bf16.mxu0 %v3657_v20  ;;  %v4323_v20 = vsel %vm3230_vm4, 1, %v3852_v17 }
 0xe50   :  { %2399 = vmatpush1.bf16.msra.mxu0 %v3659_v21  ;;  %v4330_v21 = vsel %vm3225_vm5, 1, %v3852_v17 }
 0xe51   :  { %2400 = vmatprep.subr.bf16.mxu0 %v3660_v22 }
 0xe54   :  { %2401 = vmatpush1.bf16.msra.mxu0 %v3662_v23 }
 0xf07   :  { %v1665_v34 = vpop.f32.mrf.mxu0 }
 0xf08   :  { %v1678_v45 = vadd.f32 %v3372_v42, %v1665_v34  ;;  %v4356_v42 = vsel %vm3226_vm6, 1, %v3852_v17 }
 0xf09   :  { %v1667_v37 = vpop.f32.mrf.mxu0 }
 0xf0a   :  { %v1810_v38 = vadd.f32 %v3376_v33, %v1667_v37  ;;  %v3223_v54 = vmul.f32 -1.442695, %v1678_v45 }
 0xf0b   :  { %v1669_v40 = vpop.f32.mrf.mxu0 }
 0xf0c   :  { %v1679_v41 = vadd.f32 %v3373_v36, %v1669_v40  ;;  %3675 = vtanh.f32 %v1810_v38  ;;  %v3227_v52 = vmul.f32 -1.442695, %v1810_v38 }
 0xf0d   :  { %v1671_v43 = vpop.f32.mrf.mxu0 }
 0xf0e   :  { %v1811_v44 = vadd.f32 %v3377_v39, %v1671_v43  ;;  %3677 = vtanh.f32 %v1679_v41  ;;  %v3224_v55 = vmul.f32 -1.442695, %v1679_v41 }
 0xf10   :  { %3679 = vtanh.f32 %v1811_v44  ;;  %v3228_v53 = vmul.f32 -1.442695, %v1811_v44 }
 0xf11   :  { %3681 = vtanh.f32 %v1678_v45 }
 0xf12   :  { %3683 = vpow2.f32 %v3227_v52 }
 0xf13   :  { %3685 = vpow2.f32 %v3228_v53 }
 0xf14   :  { %3687 = vpow2.f32 %v3223_v54 }
 0xf15   :  { %3689 = vpow2.f32 %v3224_v55 }
 0xf19   :  { %v3676_v46 = vpop.eup %3675 }
 0xf1a   :  { %1841 = vrot.lane.b32.xlu0 %v3676_v46, %s3853_s3 }
 0xf1b   :  { %v3678_v47 = vpop.eup %3677 }
 0xf1d   :  { %v3680_v48 = vpop.eup %3679 }
 0xf1e   :  { %1710 = vrot.lane.b32.xlu0 %v3678_v47, %s3853_s3  ;;  %1843 = vrot.lane.b32.xlu1 %v3680_v48, %s3853_s3  ;;  %v3682_v50 = vpop.eup %3681 }
 0xf1f   :  { %v3684_v56 = vpop.eup %3683 }
 0xf20   :  { %v1819_v61 = vadd.f32 1.0, %v3684_v56  ;;  %v3686_v57 = vpop.eup %3685 }
 0xf21   :  { %v1820_v62 = vadd.f32 1.0, %v3686_v57  ;;  %v3688_v58 = vpop.eup %3687 }
 0xf22   :  { %1833 = vrot.lane.b32.xlu0 %v4283_v49, %s3853_s3  ;;  %1708 = vrot.lane.b32.xlu1 %v3682_v50, %s3853_s3  ;;  %3691 = vrcp.f32 %v1819_v61  ;;  %v1686_v63 = vadd.f32 1.0, %v3688_v58  ;;  %v3690_v2 = vpop.eup %3689 }
 0xf23   :  { %3693 = vrcp.f32 %v1820_v62  ;;  %v1687_v59 = vadd.f32 1.0, %v3690_v2 }
 0xf24   :  { %3695 = vrcp.f32 %v1686_v63 }
 0xf25   :  { %3697 = vrcp.f32 %v1687_v59 }
 0xf26   :  { %1831 = vrot.lane.b32.xlu1 %v4288_v51, %s3853_s3 }
 0xf2f   :  { %v4292_v3 = vpop.eup %3691 }
 0xf30   :  { %v4296_v6 = vpop.eup %3693 }
 0xf31   :  { %v4304_v9 = vpop.eup %3695 }
 0xf32   :  { %v4313_v16 = vpop.eup %3697 }
 0xf8c   :  { %v1842_v4 = vpop.permute.xlu0 %1841 }
 0xf8d   :  { %v1847_v5 = vmul.f32 %v4292_v3, %v1842_v4 }
 0xf8f   :  { %1851 = vrot.lane.b32.xlu1 %v1847_v5, %s3853_s3 }
 0xf90   :  { %v1844_v60 = vpop.permute.xlu1 %1843  ;;  %v1711_v15 = vpop.permute.xlu0 %1710 }
 0xf91   :  { %v1848_v8 = vmul.f32 %v4296_v6, %v1844_v60  ;;  %v1715_v19 = vmul.f32 %v4313_v16, %v1711_v15 }
 0xf93   :  { %1698 = vrot.lane.b32.xlu1 %v4298_v7, %s3853_s3  ;;  %1853 = vrot.lane.b32.xlu0 %v1848_v8, %s3853_s3 }
 0xf94   :  { %v1709_v10 = vpop.permute.xlu1 %1708  ;;  %v1834_v24 = vpop.permute.xlu0 %1833 }
 0xf95   :  { %v1714_v14 = vmul.f32 %v4304_v9, %v1709_v10  ;;  %v1838_v29 = vmul.f32 %v4296_v6, %v1834_v24 }
 0xf97   :  { %1718 = vrot.lane.b32.xlu1 %v1714_v14, %s3853_s3  ;;  %1700 = vrot.lane.b32.xlu0 %v4306_v11, %s3853_s3 }
 0xf98   :  { %v1832_v22 = vpop.permute.xlu1 %1831 }
 0xf99   :  { %v1837_v23 = vmul.f32 %v4292_v3, %v1832_v22 }
 0xf9b   :  { %1720 = vrot.lane.b32.xlu0 %v1715_v19, %s3853_s3  ;;  %1879 = vperm.xlu1 %3634, %v4316_v18  }
 0xf9f   :  { %1882 = vperm.xlu0 %3635, %v4323_v20  }
 0xfa3   :  { %1888 = vrot.lane.b32.xlu0 %v4235_v12, %s3854_s28 }
 0xfa7   :  { %1744 = vperm.xlu0 %3635, %v4330_v21  }
0x1001   :  { %v1852_v27 = vpop.permute.xlu1 %1851 }
0x1002   :  { %v4334_v28 = vadd.f32 %v1852_v27, %v1837_v23 }
0x1004   :  { %3699 = vtanh.f32 %v4334_v28 }
0x1005   :  { %v1699_v30 = vpop.permute.xlu1 %1698  ;;  %v1854_v31 = vpop.permute.xlu0 %1853 }
0x1006   :  { %v4338_v32 = vadd.f32 %v1854_v31, %v1838_v29  ;;  %v1704_v12 = vmul.f32 %v4304_v9, %v1699_v30  ;;  %v3383_v30 = vld [vmem:[#allocation7 + $0x8] sm:$0xff]  }
0x1007   :  { %v3384_v31 = vunpack.c.l.bf16 %v3383_v30 }
0x1008   :  { %3701 = vtanh.f32 %v4338_v32 }
0x1009   :  { %v1719_v33 = vpop.permute.xlu1 %1718  ;;  %v1701_v34 = vpop.permute.xlu0 %1700 }
0x100a   :  { %v4342_v35 = vadd.f32 %v1719_v33, %v1704_v12  ;;  %v1705_v37 = vmul.f32 %v4313_v16, %v1701_v34  ;;  %v3379_v34 = vld [vmem:[#allocation6] sm:$0xff]  }
0x100c   :  { %3703 = vtanh.f32 %v4342_v35 }
0x100d   :  { %v1721_v36 = vpop.permute.xlu0 %1720 }
0x100e   :  { %v4346_v38 = vadd.f32 %v1721_v36, %v1705_v37  ;;  %v3385_v36 = vunpack.c.h.bf16 %v3383_v30 }
0x1010   :  { %3705 = vtanh.f32 %v4346_v38 }
0x1011   :  { %v3700_v39 = vpop.eup %3699 }
0x1012   :  { %1863 = vrot.lane.b32.xlu1 %v3700_v39, %s3853_s3  ;;  %v3380_v39 = vunpack.c.l.bf16 %v3379_v34 }
0x1015   :  { %v3702_v40 = vpop.eup %3701 }
0x1016   :  { %1865 = vrot.lane.b32.xlu1 %v3702_v40, %s3853_s3  ;;  %v4366_v45 = vpop.permute.xlu1 %1879 }
0x1017   :  { %vm1884_vm7 = vcmp.eq.s32.totalorder %v4366_v45, 1 }
0x1019   :  { %v3704_v41 = vpop.eup %3703 }
0x101a   :  { %1730 = vrot.lane.b32.xlu0 %v3704_v41, %s3853_s3  ;;  %1890 = vrot.lane.b32.xlu1 %v4237_v13, %s3854_s28  ;;  %v4364_v44 = vpop.permute.xlu0 %1882 }
0x101b   :  { %vm1885_vm8 = vcmp.eq.s32.totalorder %v4364_v44, 1 }
0x101d   :  { %v3706_v43 = vpop.eup %3705 }
0x101e   :  { %1753 = vrot.lane.b32.xlu0 %v4270_v25, %s3854_s28  ;;  %1747 = vperm.xlu1 %3634, %v4356_v42   ;;  %v1889_v46 = vpop.permute.xlu0 %1888 }
0x1022   :  { %1732 = vrot.lane.b32.xlu1 %v3706_v43, %s3853_s3  ;;  %v4372_v25 = vpop.permute.xlu0 %1744 }
0x1023   :  { %vm1749_vm9 = vcmp.eq.s32.totalorder %v4372_v25, 1 }
0x1026   :  { %1755 = vrot.lane.b32.xlu1 %v4272_v26, %s3854_s28 }
0x1084   :  { %v1864_v13 = vpop.permute.xlu1 %1863 }
0x1085   :  { %v4369_v47 = vmul.f32 %v4292_v3, %v1864_v13 }
0x1087   :  { %v1894_v48 = vsel %vm1884_vm7, %v4369_v47, %v1889_v46  ;;  %v3381_v46 = vunpack.c.h.bf16 %v3379_v34  ;;  %v4489_v34 = vsel %vm3246_vm11, 1, %v3852_v17 }
0x1088   :  { %1898 = vrot.lane.b32.xlu0 %v1894_v48, %s3854_s28  ;;  %v1866_v26 = vpop.permute.xlu1 %1865 }
0x1089   :  { %v4379_v50 = vmul.f32 %v4296_v6, %v1866_v26 }
0x108b   :  { %v1929_v45 = vsel %vm1885_vm8, %v4379_v50, 0.0 }
0x108c   :  { %v1731_v52 = vpop.permute.xlu0 %1730  ;;  %v1891_v53 = vpop.permute.xlu1 %1890 }
0x108d   :  { %v1895_v54 = vsel %vm1885_vm8, %v4379_v50, %v1891_v53  ;;  %v4387_v55 = vmul.f32 %v4304_v9, %v1731_v52 }
0x108e   :  { %1900 = vrot.lane.b32.xlu1 %v1895_v54, %s3854_s28 }
0x1090   :  { %v1754_v56 = vpop.permute.xlu0 %1753 }
0x1091   :  { %v1759_v61 = vsel %vm1749_vm9, %v4387_v55, %v1754_v56 }
0x1092   :  { %1763 = vrot.lane.b32.xlu0 %v1759_v61, %s3854_s28 }
0x1099   :  { %v4394_v57 = vpop.permute.xlu1 %1747 }
0x109a   :  { %vm1750_vm10 = vcmp.eq.s32.totalorder %v4394_v57, 1 }
0x109d   :  { %v1733_v62 = vpop.permute.xlu1 %1732 }
0x109e   :  { %v4397_v58 = vmul.f32 %v4313_v16, %v1733_v62 }
0x10a1   :  { %v1756_v63 = vpop.permute.xlu1 %1755 }
0x10a2   :  { %v1760_v2 = vsel %vm1750_vm10, %v4397_v58, %v1756_v63 }
0x10a3   :  { %1765 = vrot.lane.b32.xlu1 %v1760_v2, %s3854_s28 }
0x10a7   :  { %1910 = vrot.lane.b32.xlu1 %v4288_v51, %s3853_s3 }
0x10ab   :  { %1775 = vrot.lane.b32.xlu1 %v4298_v7, %s3853_s3 }
0x10fa   :  { %v1899_v59 = vpop.permute.xlu0 %1898 }
0x10fb   :  { %1904 = vst.msk [vmem:[#allocation4] sm:$0xff] %vm67_vm0, %v1899_v59 }
0x1100   :  { %v1901_v3 = vpop.permute.xlu1 %1900 }
0x1101   :  { %1905 = vst.msk [vmem:[#allocation4 + $0x8] sm:$0xff] %vm67_vm0, %v1901_v3 }
0x1102   :  { %v4411_v5 = vld [vmem:[#allocation4] sm:$0xff] }
0x1104   :  { %v1764_v4 = vpop.permute.xlu0 %1763 }
0x1105   :  { %1769 = vst.msk [vmem:[#allocation2] sm:$0xff] %vm67_vm0, %v1764_v4 }
0x1108   :  { %v4413_v6 = vld [vmem:[#allocation4 + $0x8] sm:$0xff] }
0x1109   :  { %v3636_v60 = vpack.i.bf16 %v4413_v6, %v4411_v5 }
0x110b   :  { %3637 = vrot.lane.b32.xlu0 %v3636_v60, %s3853_s3 }
0x110c   :  { %v4427_v15 = vld [vmem:[#allocation2] sm:$0xff] }
0x110f   :  { %1912 = vrot.lane.b32.xlu0 %v4283_v49, %s3853_s3 }
0x1113   :  { %1777 = vrot.lane.b32.xlu0 %v4306_v11, %s3853_s3 }
0x1115   :  { %v1766_v51 = vpop.permute.xlu1 %1765 }
0x1116   :  { %1770 = vst.msk [vmem:[#allocation2 + $0x8] sm:$0xff] %vm67_vm0, %v1766_v51 }
0x1119   :  { %v1911_v7 = vpop.permute.xlu1 %1910 }
0x111a   :  { %v1916_v8 = vsel %vm1884_vm7, %v4334_v28, %v1911_v7 }
0x111b   :  { %1920 = vrot.lane.b32.xlu1 %v1916_v8, %s3855_s5 }
0x111d   :  { %v4429_v49 = vld [vmem:[#allocation2 + $0x8] sm:$0xff]  ;;  %v1776_v24 = vpop.permute.xlu1 %1775 }
0x111e   :  { %v1781_v52 = vsel %vm1749_vm9, %v4342_v35, %v1776_v24 }
0x117d   :  { %v3638_v9 = vpop.permute.xlu0 %3637 }
0x117e   :  { %v3640_v10 = vunpack.i.h.bf16 %v3638_v9  ;;  %v3639_v14 = vunpack.i.l.bf16 %v3638_v9 }
0x1180   :  { %v1953_v11 = vsel %vm67_vm0, %v4427_v15, %v3639_v14  ;;  %v1954_v16 = vsel %vm67_vm0, %v4429_v49, %v3640_v10 }
0x1181   :  { %v1955_v19 = vpack.c.bf16 %v1954_v16, %v1953_v11  ;;  %v1913_v22 = vpop.permute.xlu0 %1912 }
0x1182   :  { %v1917_v23 = vsel %vm1885_vm8, %v4338_v32, %v1913_v22 }
0x1183   :  { %1922 = vrot.lane.b32.xlu0 %v1917_v23, %s3855_s5  ;;  %3239 = vmatmul.mubr.msk.bf16.vlgmr.msra.gmra.mxu1 %vm1627_vm2, %v1955_v19 }
0x1184   :  { %2797 = vmatprep.mubr.bf16.mxu1 %v3852_v17 }
0x1185   :  { %v1778_v28 = vpop.permute.xlu0 %1777 }
0x1186   :  { %v1782_v54 = vsel %vm1750_vm10, %v4346_v38, %v1778_v28 }
0x118d   :  { %v1921_v27 = vpop.permute.xlu1 %1920 }
0x118e   :  { %1926 = vst.msk [vmem:[#allocation5] sm:$0xff] %vm67_vm0, %v1921_v27 }
0x1195   :  { %v4454_v61 = vld [vmem:[#allocation5] sm:$0xff] }
0x11f5   :  { %v1923_v29 = vpop.permute.xlu0 %1922 }
0x11f6   :  { %1927 = vst.msk [vmem:[#allocation5 + $0x8] sm:$0xff] %vm67_vm0, %v1923_v29 }
0x11fd   :  { %v4459_v35 = vld [vmem:[#allocation5 + $0x8] sm:$0xff] }
0x1243   :  { %v2041_v12 = vpop.f32.mrf.mxu1 }
0x1244   :  { %v2055_v43 = vadd.f32 %v3380_v39, %v2041_v12 }
0x1245   :  { %v2043_v33 = vpop.f32.mrf.mxu1 }
0x1246   :  { %v2189_v32 = vadd.f32 %v3384_v31, %v2043_v33  ;;  %v3240_v63 = vmul.f32 -1.442695, %v2055_v43 }
0x1247   :  { %v2045_v37 = vpop.f32.mrf.mxu1 }
0x1248   :  { %3707 = vtanh.f32 %v2189_v32  ;;  %v2056_v13 = vadd.f32 %v3381_v46, %v2045_v37  ;;  %v3244_v62 = vmul.f32 -1.442695, %v2189_v32 }
0x1249   :  { %v2047_v40 = vpop.f32.mrf.mxu1 }
0x124a   :  { %v2190_v41 = vadd.f32 %v3385_v36, %v2047_v40  ;;  %v3241_v59 = vmul.f32 -1.442695, %v2056_v13  ;;  %v4496_v36 = vsel %vm3247_vm12, 1, %v3852_v17 }
0x124c   :  { %3709 = vtanh.f32 %v2190_v41  ;;  %v3245_v38 = vmul.f32 -1.442695, %v2190_v41 }
0x124d   :  { %3711 = vtanh.f32 %v2055_v43 }
0x124e   :  { %3713 = vtanh.f32 %v2056_v13 }
0x124f   :  { %3715 = vpow2.f32 %v3244_v62 }
0x1250   :  { %3717 = vpow2.f32 %v3245_v38 }
0x1251   :  { %3719 = vpow2.f32 %v3240_v63 }
0x1252   :  { %3721 = vpow2.f32 %v3241_v59 }
0x1255   :  { %v3708_v48 = vpop.eup %3707 }
0x1256   :  { %2220 = vrot.lane.b32.xlu1 %v3708_v48, %s3853_s3 }
0x1259   :  { %v3710_v26 = vpop.eup %3709 }
0x125a   :  { %2222 = vrot.lane.b32.xlu0 %v3710_v26, %s3853_s3  ;;  %1785 = vrot.lane.b32.xlu1 %v1781_v52, %s3855_s5  ;;  %v3712_v53 = vpop.eup %3711 }
0x125b   :  { %v3714_v56 = vpop.eup %3713 }
0x125c   :  { %v3716_v2 = vpop.eup %3715 }
0x125d   :  { %v2198_v3 = vadd.f32 1.0, %v3716_v2  ;;  %v3718_v4 = vpop.eup %3717 }
0x125e   :  { %1787 = vrot.lane.b32.xlu0 %v1782_v54, %s3855_s5  ;;  %2086 = vrot.lane.b32.xlu1 %v3712_v53, %s3853_s3  ;;  %v2199_v60 = vadd.f32 1.0, %v3718_v4  ;;  %v3720_v51 = vpop.eup %3719 }
0x125f   :  { %3723 = vrcp.f32 %v2198_v3  ;;  %v2064_v7 = vadd.f32 1.0, %v3720_v51  ;;  %v3722_v8 = vpop.eup %3721  ;;  %v4521_v3 = vsel %vm3242_vm13, 1, %v3852_v17 }
0x1260   :  { %3725 = vrcp.f32 %v2199_v60  ;;  %v2065_v14 = vadd.f32 1.0, %v3722_v8 }
0x1261   :  { %3727 = vrcp.f32 %v2064_v7 }
0x1262   :  { %2088 = vrot.lane.b32.xlu0 %v3714_v56, %s3853_s3  ;;  %2210 = vrot.lane.b32.xlu1 %v4454_v61, %s3853_s3  ;;  %3729 = vrcp.f32 %v2065_v14 }
0x1266   :  { %2212 = vrot.lane.b32.xlu0 %v4459_v35, %s3853_s3 }
0x126c   :  { %v4463_v9 = vpop.eup %3723 }
0x126d   :  { %v4467_v16 = vpop.eup %3725 }
0x126e   :  { %v4477_v29 = vpop.eup %3727 }
0x126f   :  { %v4486_v33 = vpop.eup %3729 }
0x12c8   :  { %v2221_v10 = vpop.permute.xlu1 %2220 }
0x12c9   :  { %v2226_v11 = vmul.f32 %v4463_v9, %v2221_v10 }
0x12cb   :  { %2230 = vrot.lane.b32.xlu1 %v2226_v11, %s3853_s3 }
0x12cc   :  { %v2223_v19 = vpop.permute.xlu0 %2222  ;;  %v1786_v22 = vpop.permute.xlu1 %1785 }
0x12cd   :  { %v2227_v23 = vmul.f32 %v4467_v16, %v2223_v19  ;;  %1791 = vst.msk [vmem:[#allocation3] sm:$0xff] %vm67_vm0, %v1786_v22 }
0x12cf   :  { %2232 = vrot.lane.b32.xlu0 %v2227_v23, %s3853_s3 }
0x12d0   :  { %v1788_v24 = vpop.permute.xlu0 %1787  ;;  %v2087_v27 = vpop.permute.xlu1 %2086 }
0x12d1   :  { %1792 = vst.msk [vmem:[#allocation3 + $0x8] sm:$0xff] %vm67_vm0, %v1788_v24  ;;  %v2092_v30 = vmul.f32 %v4477_v29, %v2087_v27 }
0x12d4   :  { %v4473_v28 = vld [vmem:[#allocation3] sm:$0xff]  ;;  %v2089_v31 = vpop.permute.xlu0 %2088  ;;  %v2211_v37 = vpop.permute.xlu1 %2210 }
0x12d5   :  { %2076 = vrot.lane.b32.xlu1 %v4473_v28, %s3853_s3  ;;  %v2093_v32 = vmul.f32 %v4486_v33, %v2089_v31  ;;  %v2216_v39 = vmul.f32 %v4463_v9, %v2211_v37 }
0x12d8   :  { %v4481_v12 = vld [vmem:[#allocation3 + $0x8] sm:$0xff]  ;;  %v2213_v40 = vpop.permute.xlu0 %2212 }
0x12d9   :  { %2078 = vrot.lane.b32.xlu0 %v4481_v12, %s3853_s3  ;;  %2096 = vrot.lane.b32.xlu1 %v2092_v30, %s3853_s3  ;;  %v2217_v46 = vmul.f32 %v4467_v16, %v2213_v40 }
0x12dd   :  { %2098 = vrot.lane.b32.xlu0 %v2093_v32, %s3853_s3  ;;  %2258 = vperm.xlu1 %3634, %v4489_v34  }
0x12e1   :  { %2261 = vperm.xlu0 %3635, %v4496_v36  }
0x133d   :  { %v2231_v41 = vpop.permute.xlu1 %2230 }
0x133e   :  { %v4500_v43 = vadd.f32 %v2231_v41, %v2216_v39 }
0x1340   :  { %3731 = vtanh.f32 %v4500_v43 }
0x1341   :  { %v2233_v13 = vpop.permute.xlu0 %2232 }
0x1342   :  { %v4504_v48 = vadd.f32 %v2233_v13, %v2217_v46 }
0x1344   :  { %3733 = vtanh.f32 %v4504_v48 }
0x1347   :  { %v2077_v26 = vpop.permute.xlu1 %2076 }
0x1348   :  { %v2082_v52 = vmul.f32 %v4477_v29, %v2077_v26 }
0x134b   :  { %v2079_v53 = vpop.permute.xlu0 %2078  ;;  %v2097_v54 = vpop.permute.xlu1 %2096 }
0x134c   :  { %v4508_v56 = vadd.f32 %v2097_v54, %v2082_v52  ;;  %v2083_v38 = vmul.f32 %v4486_v33, %v2079_v53 }
0x134d   :  { %v3732_v62 = vpop.eup %3731 }
0x134e   :  { %3735 = vtanh.f32 %v4508_v56  ;;  %2242 = vrot.lane.b32.xlu1 %v3732_v62, %s3853_s3 }
0x134f   :  { %v2099_v63 = vpop.permute.xlu0 %2098 }
0x1350   :  { %v4513_v2 = vadd.f32 %v2099_v63, %v2083_v38 }
0x1351   :  { %v3734_v59 = vpop.eup %3733 }
0x1352   :  { %3737 = vtanh.f32 %v4513_v2  ;;  %2244 = vrot.lane.b32.xlu0 %v3734_v59, %s3853_s3  ;;  %2267 = vrot.lane.b32.xlu1 %v4411_v5, %s3854_s28 }
0x1356   :  { %2269 = vrot.lane.b32.xlu0 %v4413_v6, %s3854_s28  ;;  %2122 = vperm.xlu1 %3634, %v4521_v3  }
0x1358   :  { %v4537_v1 = vpop.permute.xlu1 %2258 }
0x1359   :  { %vm2263_vm15 = vcmp.eq.s32.totalorder %v4537_v1, 1 }
0x135a   :  { %2125 = vperm.xlu0 %3635, %v4528_v0  }
0x135b   :  { %v3736_v4 = vpop.eup %3735 }
0x135c   :  { %2108 = vrot.lane.b32.xlu1 %v3736_v4, %s3853_s3  ;;  %v4539_v5 = vpop.permute.xlu0 %2261  ;;  %v3391_v4 = vld [vmem:[#allocation7 + $0x18] sm:$0xff]  }
0x135d   :  { %vm2264_vm1 = vcmp.eq.s32.totalorder %v4539_v5, 1 }
0x135f   :  { %v3738_v60 = vpop.eup %3737 }
0x1360   :  { %2110 = vrot.lane.b32.xlu0 %v3738_v60, %s3853_s3  ;;  %2131 = vrot.lane.b32.xlu1 %v4427_v15, %s3854_s28  ;;  %v3392_v60 = vunpack.c.l.bf16 %v3391_v4 }
0x1364   :  { %2133 = vrot.lane.b32.xlu0 %v4429_v49, %s3854_s28 }
0x13c0   :  { %v2243_v17 = vpop.permute.xlu1 %2242 }
0x13c1   :  { %v4542_v6 = vmul.f32 %v4463_v9, %v2243_v17 }
0x13c4   :  { %v2245_v51 = vpop.permute.xlu0 %2244  ;;  %v2268_v7 = vpop.permute.xlu1 %2267 }
0x13c5   :  { %v2273_v8 = vsel %vm2263_vm15, %v4542_v6, %v2268_v7  ;;  %v4550_v15 = vmul.f32 %v4467_v16, %v2245_v51  ;;  %v3387_v7 = vld [vmem:[#allocation6 + $0x18] sm:$0xff]  }
0x13c6   :  { %2277 = vrot.lane.b32.xlu1 %v2273_v8, %s3854_s28 }
0x13c7   :  { %v2308_v1 = vsel %vm2264_vm1, %v4550_v15, 0.0 }
0x13c8   :  { %v2270_v49 = vpop.permute.xlu0 %2269 }
0x13c9   :  { %v2274_v9 = vsel %vm2264_vm1, %v4550_v15, %v2270_v49  ;;  %v3393_v49 = vunpack.c.h.bf16 %v3391_v4 }
0x13ca   :  { %2279 = vrot.lane.b32.xlu0 %v2274_v9, %s3854_s28  ;;  %v3388_v9 = vunpack.c.l.bf16 %v3387_v7 }
0x13d1   :  { %v4557_v10 = vpop.permute.xlu1 %2122 }
0x13d2   :  { %vm2127_vm3 = vcmp.eq.s32.totalorder %v4557_v10, 1 }
0x13d5   :  { %v4559_v14 = vpop.permute.xlu0 %2125  ;;  %v2109_v11 = vpop.permute.xlu1 %2108 }
0x13d6   :  { %v4562_v19 = vmul.f32 %v4477_v29, %v2109_v11  ;;  %vm2128_vm4 = vcmp.eq.s32.totalorder %v4559_v14, 1 }
0x13d9   :  { %v2111_v16 = vpop.permute.xlu0 %2110  ;;  %v2132_v22 = vpop.permute.xlu1 %2131 }
0x13da   :  { %v2137_v23 = vsel %vm2127_vm3, %v4562_v19, %v2132_v22  ;;  %v4570_v24 = vmul.f32 %v4486_v33, %v2111_v16 }
0x13db   :  { %2141 = vrot.lane.b32.xlu1 %v2137_v23, %s3854_s28  ;;  %v3389_v23 = vunpack.c.h.bf16 %v3387_v7 }
0x13dc   :  { %v2172_v57 = vsel %vm2128_vm4, %v4570_v24, 0.0 }
0x13dd   :  { %v2134_v27 = vpop.permute.xlu0 %2133 }
0x13de   :  { %v2138_v29 = vsel %vm2128_vm4, %v4570_v24, %v2134_v27 }
0x13df   :  { %2143 = vrot.lane.b32.xlu0 %v2138_v29, %s3854_s28 }
0x13e3   :  { %2289 = vrot.lane.b32.xlu0 %v4454_v61, %s3853_s3 }
0x13e7   :  { %2153 = vrot.lane.b32.xlu0 %v4473_v28, %s3853_s3 }
0x1438   :  { %v2278_v30 = vpop.permute.xlu1 %2277 }
0x1439   :  { %2283 = vst.msk [vmem:[#allocation4] sm:$0xff] %vm67_vm0, %v2278_v30 }
0x143c   :  { %v2280_v31 = vpop.permute.xlu0 %2279 }
0x143d   :  { %2284 = vst.msk [vmem:[#allocation4 + $0x8] sm:$0xff] %vm67_vm0, %v2280_v31 }
0x1440   :  { %v4583_v33 = vld [vmem:[#allocation4] sm:$0xff] }
0x1444   :  { %v4585_v32 = vld [vmem:[#allocation4 + $0x8] sm:$0xff] }
0x1445   :  { %v3641_v37 = vpack.i.bf16 %v4585_v32, %v4583_v33 }
0x1447   :  { %3642 = vrot.lane.b32.xlu1 %v3641_v37, %s3853_s3 }
0x144b   :  { %2291 = vrot.lane.b32.xlu1 %v4459_v35, %s3853_s3 }
0x144d   :  { %v2142_v61 = vpop.permute.xlu1 %2141 }
0x144e   :  { %2147 = vst.msk [vmem:[#allocation2] sm:$0xff] %vm67_vm0, %v2142_v61 }
0x144f   :  { %2155 = vrot.lane.b32.xlu1 %v4481_v12, %s3853_s3 }
0x1451   :  { %v2144_v28 = vpop.permute.xlu0 %2143 }
0x1452   :  { %2148 = vst.msk [vmem:[#allocation2 + $0x8] sm:$0xff] %vm67_vm0, %v2144_v28 }
0x1455   :  { %v2290_v39 = vpop.permute.xlu0 %2289  ;;  %v4600_v35 = vld [vmem:[#allocation2] sm:$0xff] }
0x1456   :  { %v2295_v40 = vsel %vm2263_vm15, %v4500_v43, %v2290_v39 }
0x1457   :  { %2299 = vrot.lane.b32.xlu0 %v2295_v40, %s3855_s5 }
0x1459   :  { %v4602_v26 = vld [vmem:[#allocation2 + $0x8] sm:$0xff]  ;;  %v2154_v62 = vpop.permute.xlu0 %2153 }
0x145a   :  { %v2159_v31 = vsel %vm2127_vm3, %v4508_v56, %v2154_v62 }
0x14b9   :  { %v3643_v41 = vpop.permute.xlu1 %3642 }
0x14ba   :  { %v3645_v46 = vunpack.i.h.bf16 %v3643_v41  ;;  %v3644_v13 = vunpack.i.l.bf16 %v3643_v41 }
0x14bc   :  { %v2333_v12 = vsel %vm67_vm0, %v4602_v26, %v3645_v46  ;;  %v2332_v52 = vsel %vm67_vm0, %v4600_v35, %v3644_v13 }
0x14bd   :  { %v2334_v53 = vpack.c.bf16 %v2333_v12, %v2332_v52  ;;  %v2292_v54 = vpop.permute.xlu1 %2291 }
0x14be   :  { %v2296_v43 = vsel %vm2264_vm1, %v4504_v48, %v2292_v54 }
0x14bf   :  { %2301 = vrot.lane.b32.xlu1 %v2296_v43, %s3855_s5  ;;  %3256 = vmatmul.mubr.msk.bf16.vlgmr.msra.gmra.mxu0 %vm1627_vm2, %v2334_v53 }
0x14c1   :  { %v2156_v63 = vpop.permute.xlu1 %2155 }
0x14c2   :  { %v2160_v61 = vsel %vm2128_vm4, %v4513_v2, %v2156_v63 }
0x14c9   :  { %v2300_v38 = vpop.permute.xlu0 %2299 }
0x14ca   :  { %2305 = vst.msk [vmem:[#allocation5] sm:$0xff] %vm67_vm0, %v2300_v38 }
0x14d1   :  { %v4626_v39 = vld [vmem:[#allocation5] sm:$0xff] }
0x1531   :  { %v2302_v59 = vpop.permute.xlu1 %2301 }
0x1532   :  { %2306 = vst.msk [vmem:[#allocation5 + $0x8] sm:$0xff] %vm67_vm0, %v2302_v59 }
0x1539   :  { %v4631_v56 = vld [vmem:[#allocation5 + $0x8] sm:$0xff] }
0x157f   :  { %v2420_v17 = vpop.f32.mrf.mxu0 }
0x1580   :  { %v2434_v22 = vadd.f32 %v3388_v9, %v2420_v17 }
0x1581   :  { %v2422_v51 = vpop.f32.mrf.mxu0 }
0x1582   :  { %v2568_v8 = vadd.f32 %v3392_v60, %v2422_v51  ;;  %v3257_v41 = vmul.f32 -1.442695, %v2434_v22 }
0x1583   :  { %v2424_v48 = vpop.f32.mrf.mxu0 }
0x1584   :  { %3739 = vtanh.f32 %v2568_v8  ;;  %v2435_v27 = vadd.f32 %v3389_v23, %v2424_v48  ;;  %v3261_v40 = vmul.f32 -1.442695, %v2568_v8 }
0x1585   :  { %v2426_v11 = vpop.f32.mrf.mxu0 }
0x1586   :  { %v2569_v16 = vadd.f32 %v3393_v49, %v2426_v11  ;;  %v3258_v13 = vmul.f32 -1.442695, %v2435_v27 }
0x1588   :  { %3741 = vtanh.f32 %v2569_v16  ;;  %v3262_v2 = vmul.f32 -1.442695, %v2569_v16 }
0x1589   :  { %3743 = vtanh.f32 %v2434_v22 }
0x158a   :  { %3745 = vtanh.f32 %v2435_v27 }
0x158b   :  { %3747 = vpow2.f32 %v3261_v40 }
0x158c   :  { %3749 = vpow2.f32 %v3262_v2 }
0x158d   :  { %3751 = vpow2.f32 %v3257_v41 }
0x158e   :  { %3753 = vpow2.f32 %v3258_v13 }
0x1591   :  { %v3740_v29 = vpop.eup %3739 }
0x1592   :  { %2599 = vrot.lane.b32.xlu0 %v3740_v29, %s3853_s3 }
0x1595   :  { %v3742_v30 = vpop.eup %3741 }
0x1596   :  { %2163 = vrot.lane.b32.xlu0 %v2159_v31, %s3855_s5  ;;  %2601 = vrot.lane.b32.xlu1 %v3742_v30, %s3853_s3  ;;  %v3744_v37 = vpop.eup %3743 }
0x1597   :  { %v3746_v28 = vpop.eup %3745 }
0x1598   :  { %v3748_v46 = vpop.eup %3747 }
0x1599   :  { %v2577_v12 = vadd.f32 1.0, %v3748_v46  ;;  %v3750_v52 = vpop.eup %3749 }
0x159a   :  { %2465 = vrot.lane.b32.xlu0 %v3744_v37, %s3853_s3  ;;  %2165 = vrot.lane.b32.xlu1 %v2160_v61, %s3855_s5  ;;  %v2578_v53 = vadd.f32 1.0, %v3750_v52  ;;  %v3752_v54 = vpop.eup %3751 }
0x159b   :  { %3755 = vrcp.f32 %v2577_v12  ;;  %v2443_v43 = vadd.f32 1.0, %v3752_v54  ;;  %v3754_v62 = vpop.eup %3753 }
0x159c   :  { %3757 = vrcp.f32 %v2578_v53  ;;  %v2444_v59 = vadd.f32 1.0, %v3754_v62 }
0x159d   :  { %3759 = vrcp.f32 %v2443_v43 }
0x159e   :  { %2589 = vrot.lane.b32.xlu0 %v4626_v39, %s3853_s3  ;;  %2467 = vrot.lane.b32.xlu1 %v3746_v28, %s3853_s3  ;;  %3761 = vrcp.f32 %v2444_v59 }
0x15a2   :  { %2591 = vrot.lane.b32.xlu1 %v4631_v56, %s3853_s3 }
0x15a8   :  { %v4635_v38 = vpop.eup %3755 }
0x15a9   :  { %v4639_v60 = vpop.eup %3757 }
0x15aa   :  { %v3760_v9 = vpop.eup %3759 }
0x15ab   :  { %v4654_v23 = vpop.eup %3761 }
0x1604   :  { %v2600_v63 = vpop.permute.xlu0 %2599 }
0x1605   :  { %v2605_v4 = vmul.f32 %v4635_v38, %v2600_v63 }
0x1607   :  { %2609 = vrot.lane.b32.xlu0 %v2605_v4, %s3853_s3 }
0x1608   :  { %v2164_v17 = vpop.permute.xlu0 %2163  ;;  %v2602_v51 = vpop.permute.xlu1 %2601 }
0x1609   :  { %2169 = vst.msk [vmem:[#allocation3] sm:$0xff] %vm67_vm0, %v2164_v17  ;;  %v2606_v7 = vmul.f32 %v4639_v60, %v2602_v51 }
0x160b   :  { %2611 = vrot.lane.b32.xlu1 %v2606_v7, %s3853_s3 }
0x160c   :  { %v2166_v8 = vpop.permute.xlu1 %2165  ;;  %v2466_v49 = vpop.permute.xlu0 %2465 }
0x160d   :  { %2170 = vst.msk [vmem:[#allocation3 + $0x8] sm:$0xff] %vm67_vm0, %v2166_v8  ;;  %v2471_v11 = vmul.f32 %v3760_v9, %v2466_v49 }
0x1610   :  { %v4645_v48 = vld [vmem:[#allocation3] sm:$0xff]  ;;  %v2468_v16 = vpop.permute.xlu1 %2467  ;;  %v2590_v29 = vpop.permute.xlu0 %2589 }
0x1611   :  { %2455 = vrot.lane.b32.xlu0 %v4645_v48, %s3853_s3  ;;  %v2472_v27 = vmul.f32 %v4654_v23, %v2468_v16  ;;  %v2595_v30 = vmul.f32 %v4635_v38, %v2590_v29  ;;  %v3665_v29 = vld [vmem:[%s4994_s6 + $0x34] ss:$8 sps:$4 sm:$0xff]  }
0x1612   :  { %2773 = vmatprep.subr.bf16.mxu1 %v3665_v29 }
0x1614   :  { %v4649_v22 = vld [vmem:[#allocation3 + $0x8] sm:$0xff]  ;;  %v2592_v31 = vpop.permute.xlu1 %2591 }
0x1615   :  { %2475 = vrot.lane.b32.xlu0 %v2471_v11, %s3853_s3  ;;  %2457 = vrot.lane.b32.xlu1 %v4649_v22, %s3853_s3  ;;  %v2596_v28 = vmul.f32 %v4639_v60, %v2592_v31 }
0x1619   :  { %2637 = vperm.xlu0 %3635, %v4521_v3   ;;  %2477 = vrot.lane.b32.xlu1 %v2472_v27, %s3853_s3  ;;  %v3663_v27 = vld [vmem:[%s4994_s6 + $0x30] ss:$8 sps:$4 sm:$0xff]  }
0x161a   :  { %2774 = vmatpush1.bf16.msra.mxu1 %v3663_v27 }
0x161d   :  { %2640 = vperm.xlu1 %3634, %v4528_v0  }
0x1679   :  { %v2610_v37 = vpop.permute.xlu0 %2609 }
0x167a   :  { %v4661_v61 = vadd.f32 %v2610_v37, %v2595_v30  ;;  %v3668_v30 = vld [vmem:[%s4994_s6 + $0x24] ss:$8 sps:$4 sm:$0xff]  }
0x167b   :  { %2775 = vmatprep.subr.bf16.mxu1 %v3668_v30  ;;  %v3395_v30 = vld [vmem:[#allocation6 + $0x8] sm:$0xff]  }
0x167c   :  { %3763 = vtanh.f32 %v4661_v61 }
0x167d   :  { %v2612_v40 = vpop.permute.xlu1 %2611 }
0x167e   :  { %v4665_v2 = vadd.f32 %v2612_v40, %v2596_v28  ;;  %v3666_v28 = vld [vmem:[%s4994_s6 + $0x20] ss:$8 sps:$4 sm:$0xff]   ;;  %v3669_v40 = vld [vmem:[%s4994_s6 + $0x10] ss:$8 sps:$4 sm:$0xff]  }
0x167f   :  { %2776 = vmatpush1.bf16.msra.mxu1 %v3666_v28 }
0x1680   :  { %3765 = vtanh.f32 %v4665_v2 }
0x1683   :  { %v2456_v3 = vpop.permute.xlu0 %2455 }
0x1684   :  { %v2461_v41 = vmul.f32 %v3760_v9, %v2456_v3 }
0x1687   :  { %v2476_v46 = vpop.permute.xlu0 %2475  ;;  %v2458_v0 = vpop.permute.xlu1 %2457 }
0x1688   :  { %v4668_v13 = vadd.f32 %v2476_v46, %v2461_v41  ;;  %v2462_v52 = vmul.f32 %v4654_v23, %v2458_v0  ;;  %v3674_v41 = vld [vmem:[%s4994_s6 + $0x4] ss:$8 sps:$4 sm:$0xff]   ;;  %v3672_v46 = vld [vmem:[%s4994_s6] ss:$8 sps:$4 sm:$0xff]  }
0x1689   :  { %v3764_v12 = vpop.eup %3763 }
0x168a   :  { %3767 = vtanh.f32 %v4668_v13  ;;  %2621 = vrot.lane.b32.xlu0 %v3764_v12, %s3853_s3 }
0x168b   :  { %v2478_v53 = vpop.permute.xlu1 %2477 }
0x168c   :  { %v4673_v54 = vadd.f32 %v2478_v53, %v2462_v52 }
0x168d   :  { %v3766_v43 = vpop.eup %3765 }
0x168e   :  { %3769 = vtanh.f32 %v4673_v54  ;;  %2646 = vrot.lane.b32.xlu0 %v4583_v33, %s3854_s28  ;;  %2623 = vrot.lane.b32.xlu1 %v3766_v43, %s3853_s3 }
0x1692   :  { %2501 = vperm.xlu0 %3635, %v4489_v34   ;;  %2648 = vrot.lane.b32.xlu1 %v4585_v32, %s3854_s28 }
0x1694   :  { %v4689_v33 = vpop.permute.xlu0 %2637 }
0x1695   :  { %vm2642_vm5 = vcmp.eq.s32.totalorder %v4689_v33, 1 }
0x1696   :  { %2504 = vperm.xlu1 %3634, %v4496_v36  }
0x1697   :  { %v3768_v62 = vpop.eup %3767 }
0x1698   :  { %2487 = vrot.lane.b32.xlu0 %v3768_v62, %s3853_s3  ;;  %v4691_v34 = vpop.permute.xlu1 %2640 }
0x1699   :  { %vm2643_vm6 = vcmp.eq.s32.totalorder %v4691_v34, 1 }
0x169b   :  { %v3770_v63 = vpop.eup %3769 }
0x169c   :  { %2510 = vrot.lane.b32.xlu0 %v4600_v35, %s3854_s28  ;;  %2489 = vrot.lane.b32.xlu1 %v3770_v63, %s3853_s3 }
0x16a0   :  { %2512 = vrot.lane.b32.xlu1 %v4602_v26, %s3854_s28 }
0x16fc   :  { %v2622_v59 = vpop.permute.xlu0 %2621 }
0x16fd   :  { %v4694_v32 = vmul.f32 %v4635_v38, %v2622_v59 }
0x1700   :  { %v2647_v36 = vpop.permute.xlu0 %2646  ;;  %v2624_v4 = vpop.permute.xlu1 %2623 }
0x1701   :  { %v2652_v35 = vsel %vm2642_vm5, %v4694_v32, %v2647_v36  ;;  %v4702_v26 = vmul.f32 %v4639_v60, %v2624_v4 }
0x1702   :  { %2656 = vrot.lane.b32.xlu0 %v2652_v35, %s3854_s28 }
0x1703   :  { %v2687_v15 = vsel %vm2643_vm6, %v4702_v26, 0.0 }
0x1704   :  { %v2649_v17 = vpop.permute.xlu1 %2648 }
0x1705   :  { %v2653_v38 = vsel %vm2643_vm6, %v4702_v26, %v2649_v17 }
0x1706   :  { %2658 = vrot.lane.b32.xlu1 %v2653_v38, %s3854_s28 }
0x170d   :  { %v4709_v51 = vpop.permute.xlu0 %2501 }
0x170e   :  { %vm2506_vm11 = vcmp.eq.s32.totalorder %v4709_v51, 1 }
0x1711   :  { %v2488_v7 = vpop.permute.xlu0 %2487  ;;  %v4711_v8 = vpop.permute.xlu1 %2504 }
0x1712   :  { %v4713_v49 = vmul.f32 %v3760_v9, %v2488_v7  ;;  %vm2507_vm12 = vcmp.eq.s32.totalorder %v4711_v8, 1 }
0x1714   :  { %v2550_v50 = vsel %vm2506_vm11, %v4713_v49, 0.0 }
0x1715   :  { %v2511_v60 = vpop.permute.xlu0 %2510  ;;  %v2490_v11 = vpop.permute.xlu1 %2489 }
0x1716   :  { %v2516_v16 = vsel %vm2506_vm11, %v4713_v49, %v2511_v60  ;;  %v4727_v9 = vmul.f32 %v4654_v23, %v2490_v11  ;;  %v3671_v23 = vld [vmem:[%s4994_s6 + $0x14] ss:$8 sps:$4 sm:$0xff]  }
0x1717   :  { %2520 = vrot.lane.b32.xlu0 %v2516_v16, %s3854_s28  ;;  %2777 = vmatprep.subr.bf16.mxu1 %v3671_v23 }
0x1718   :  { %2778 = vmatpush1.bf16.msra.mxu1 %v3669_v40  ;;  %v3397_v40 = vunpack.c.h.bf16 %v3395_v30  ;;  %v2551_v14 = vsel %vm2507_vm12, %v4727_v9, 0.0 }
0x1719   :  { %v2513_v31 = vpop.permute.xlu1 %2512  ;;  %2779 = vmatprep.subr.bf16.mxu1 %v3674_v41 }
0x171a   :  { %v2517_v37 = vsel %vm2507_vm12, %v4727_v9, %v2513_v31  ;;  %v3399_v31 = vld [vmem:[#allocation7] sm:$0xff]  }
0x171b   :  { %2522 = vrot.lane.b32.xlu1 %v2517_v37, %s3854_s28  ;;  %v3396_v37 = vunpack.c.l.bf16 %v3395_v30  ;;  %v3400_v28 = vunpack.c.l.bf16 %v3399_v31 }
0x171c   :  { %2780 = vmatpush1.bf16.msra.mxu1 %v3672_v46 }
0x171f   :  { %2532 = vrot.lane.b32.xlu1 %v4645_v48, %s3853_s3 }
0x1723   :  { %2668 = vrot.lane.b32.xlu1 %v4626_v39, %s3853_s3 }
0x1774   :  { %v2657_v3 = vpop.permute.xlu0 %2656 }
0x1775   :  { %2662 = vst.msk [vmem:[#allocation4] sm:$0xff] %vm67_vm0, %v2657_v3 }
0x1778   :  { %v2659_v0 = vpop.permute.xlu1 %2658 }
0x1779   :  { %2663 = vst.msk [vmem:[#allocation4 + $0x8] sm:$0xff] %vm67_vm0, %v2659_v0  ;;  %v3401_v0 = vunpack.c.h.bf16 %v3399_v31 }
0x177c   :  { %v4758_v48 = vld [vmem:[#allocation4] sm:$0xff] }
0x1780   :  { %v4760_v12 = vld [vmem:[#allocation4 + $0x8] sm:$0xff] }
0x1781   :  { %v3646_v39 = vpack.i.bf16 %v4760_v12, %v4758_v48 }
0x1783   :  { %3647 = vrot.lane.b32.xlu0 %v3646_v39, %s3853_s3 }
0x1787   :  { %2534 = vrot.lane.b32.xlu0 %v4649_v22, %s3853_s3 }
0x1789   :  { %v2521_v52 = vpop.permute.xlu0 %2520 }
0x178a   :  { %2526 = vst.msk [vmem:[#allocation2] sm:$0xff] %vm67_vm0, %v2521_v52 }
0x178b   :  { %2670 = vrot.lane.b32.xlu0 %v4631_v56, %s3853_s3 }
0x178d   :  { %v2523_v53 = vpop.permute.xlu1 %2522 }
0x178e   :  { %2527 = vst.msk [vmem:[#allocation2 + $0x8] sm:$0xff] %vm67_vm0, %v2523_v53 }
0x1791   :  { %v2533_v43 = vpop.permute.xlu1 %2532  ;;  %v4779_v4 = vld [vmem:[#allocation2] sm:$0xff] }
0x1792   :  { %v2538_v62 = vsel %vm2506_vm11, %v4668_v13, %v2533_v43 }
0x1793   :  { %2542 = vrot.lane.b32.xlu1 %v2538_v62, %s3855_s5 }
0x1795   :  { %v2669_v63 = vpop.permute.xlu1 %2668  ;;  %v4781_v35 = vld [vmem:[#allocation2 + $0x8] sm:$0xff] }
0x1796   :  { %v2674_v22 = vsel %vm2642_vm5, %v4661_v61, %v2669_v63 }
0x1797   :  { %2678 = vrot.lane.b32.xlu1 %v2674_v22, %s3855_s5 }
0x17f5   :  { %v3648_v59 = vpop.permute.xlu0 %3647 }
0x17f6   :  { %v3650_v36 = vunpack.i.h.bf16 %v3648_v59  ;;  %v3649_v56 = vunpack.i.l.bf16 %v3648_v59 }
0x17f8   :  { %v2711_v17 = vsel %vm67_vm0, %v4779_v4, %v3649_v56  ;;  %v2712_v13 = vsel %vm67_vm0, %v4781_v35, %v3650_v36 }
0x17f9   :  { %v2713_v38 = vpack.c.bf16 %v2712_v13, %v2711_v17  ;;  %v2535_v7 = vpop.permute.xlu0 %2534 }
0x17fa   :  { %v2539_v61 = vsel %vm2507_vm12, %v4673_v54, %v2535_v7 }
0x17fb   :  { %2544 = vrot.lane.b32.xlu0 %v2539_v61, %s3855_s5  ;;  %3273 = vmatmul.mubr.msk.bf16.vlgmr.msra.gmra.mxu1 %vm1627_vm2, %v2713_v38 }
0x17fd   :  { %v2671_v60 = vpop.permute.xlu0 %2670 }
0x17fe   :  { %v2675_v11 = vsel %vm2643_vm6, %v4665_v2, %v2671_v60 }
0x17ff   :  { %2680 = vrot.lane.b32.xlu0 %v2675_v11, %s3855_s5 }
0x1805   :  { %v2543_v16 = vpop.permute.xlu1 %2542 }
0x1806   :  { %2548 = vst.msk [vmem:[#allocation3] sm:$0xff] %vm67_vm0, %v2543_v16 }
0x1809   :  { %v2679_v27 = vpop.permute.xlu1 %2678 }
0x180a   :  { %2684 = vst.msk [vmem:[#allocation5] sm:$0xff] %vm67_vm0, %v2679_v27 }
0x180d   :  { %v2830_v22 = vld [vmem:[#allocation3] sm:$0xff] }
0x1811   :  { %v4805_v36 = vld [vmem:[#allocation5] sm:$0xff] }
0x186d   :  { %v2545_v29 = vpop.permute.xlu0 %2544 }
0x186e   :  { %2549 = vst.msk [vmem:[#allocation3 + $0x8] sm:$0xff] %vm67_vm0, %v2545_v29 }
0x1871   :  { %v2681_v54 = vpop.permute.xlu0 %2680 }
0x1872   :  { %2685 = vst.msk [vmem:[#allocation5 + $0x8] sm:$0xff] %vm67_vm0, %v2681_v54 }
0x1875   :  { %v2831_v56 = vld [vmem:[#allocation3 + $0x8] sm:$0xff] }
0x1879   :  { %v4810_v17 = vld [vmem:[#allocation5 + $0x8] sm:$0xff] }
0x18bb   :  { %v2799_v23 = vpop.f32.mrf.mxu1 }
0x18bc   :  { %v2813_v2 = vadd.f32 %v3396_v37, %v2799_v23 }
0x18bd   :  { %v2801_v3 = vpop.f32.mrf.mxu1 }
0x18be   :  { %3771 = vtanh.f32 %v2813_v2  ;;  %v2946_v41 = vadd.f32 %v3400_v28, %v2801_v3  ;;  %v3274_v13 = vmul.f32 -1.442695, %v2813_v2 }
0x18bf   :  { %v2803_v46 = vpop.f32.mrf.mxu1 }
0x18c0   :  { %v2814_v39 = vadd.f32 %v3397_v40, %v2803_v46  ;;  %3773 = vtanh.f32 %v2946_v41  ;;  %v3278_v38 = vmul.f32 -1.442695, %v2946_v41 }
0x18c1   :  { %v2805_v52 = vpop.f32.mrf.mxu1 }
0x18c2   :  { %3775 = vtanh.f32 %v2814_v39  ;;  %v2947_v53 = vadd.f32 %v3401_v0, %v2805_v52  ;;  %v3275_v7 = vmul.f32 -1.442695, %v2814_v39 }
0x18c4   :  { %3777 = vtanh.f32 %v2947_v53  ;;  %v3279_v61 = vmul.f32 -1.442695, %v2947_v53 }
0x18c5   :  { %3779 = vpow2.f32 %v3274_v13 }
0x18c6   :  { %3781 = vpow2.f32 %v3278_v38 }
0x18c7   :  { %3783 = vpow2.f32 %v3275_v7 }
0x18c8   :  { %3785 = vpow2.f32 %v3279_v61 }
0x18cb   :  { %v3772_v43 = vpop.eup %3771 }
0x18cc   :  { %2844 = vrot.lane.b32.xlu1 %v3772_v43, %s3853_s3 }
0x18cd   :  { %v3774_v62 = vpop.eup %3773 }
0x18cf   :  { %v3776_v63 = vpop.eup %3775 }
0x18d0   :  { %2976 = vrot.lane.b32.xlu1 %v3774_v62, %s3853_s3  ;;  %2846 = vrot.lane.b32.xlu0 %v3776_v63, %s3853_s3 }
0x18d1   :  { %v3778_v59 = vpop.eup %3777 }
0x18d2   :  { %v3780_v60 = vpop.eup %3779 }
0x18d3   :  { %v2822_v11 = vadd.f32 1.0, %v3780_v60  ;;  %v3782_v16 = vpop.eup %3781 }
0x18d4   :  { %2834 = vrot.lane.b32.xlu1 %v2830_v22, %s3853_s3  ;;  %2978 = vrot.lane.b32.xlu0 %v3778_v59, %s3853_s3  ;;  %v3784_v27 = vpop.eup %3783  ;;  %v2954_v29 = vadd.f32 1.0, %v3782_v16  ;;  %v1793_v16 = vsel %vm1749_vm9, %v4387_v55, 0.0  ;;  %v2171_v55 = vsel %vm2127_vm3, %v4562_v19, 0.0 }
0x18d5   :  { %3787 = vrcp.f32 %v2822_v11  ;;  %v2823_v54 = vadd.f32 1.0, %v3784_v27  ;;  %v3786_v30 = vpop.eup %3785 }
0x18d6   :  { %3789 = vrcp.f32 %v2954_v29  ;;  %v2955_v31 = vadd.f32 1.0, %v3786_v30  ;;  %v1928_v29 = vsel %vm1884_vm7, %v4369_v47, 0.0  ;;  %v2307_v47 = vsel %vm2263_vm15, %v4542_v6, 0.0 }
0x18d7   :  { %3791 = vrcp.f32 %v2823_v54  ;;  %v2686_v6 = vsel %vm2642_vm5, %v4694_v32, 0.0 }
0x18d8   :  { %2966 = vrot.lane.b32.xlu1 %v4805_v36, %s3853_s3  ;;  %2836 = vrot.lane.b32.xlu0 %v2831_v56, %s3853_s3  ;;  %3793 = vrcp.f32 %v2955_v31 }
0x18dc   :  { %2968 = vrot.lane.b32.xlu0 %v4810_v17, %s3853_s3 }
0x18e2   :  { %v4814_v37 = vpop.eup %3787 }
0x18e3   :  { %v4818_v2 = vpop.eup %3789 }
0x18e4   :  { %v4820_v3 = vpop.eup %3791 }
0x18e5   :  { %v4826_v39 = vpop.eup %3793 }
0x193e   :  { %v2845_v28 = vpop.permute.xlu1 %2844 }
0x193f   :  { %v2850_v23 = vmul.f32 %v4814_v37, %v2845_v28 }
0x1941   :  { %2854 = vrot.lane.b32.xlu1 %v2850_v23, %s3853_s3 }
0x1942   :  { %v2977_v40 = vpop.permute.xlu1 %2976  ;;  %v2847_v41 = vpop.permute.xlu0 %2846 }
0x1943   :  { %v2982_v46 = vmul.f32 %v4818_v2, %v2977_v40  ;;  %v2851_v0 = vmul.f32 %v4820_v3, %v2847_v41 }
0x1945   :  { %2986 = vrot.lane.b32.xlu1 %v2982_v46, %s3853_s3  ;;  %2856 = vrot.lane.b32.xlu0 %v2851_v0, %s3853_s3 }
0x1946   :  { %v2979_v52 = vpop.permute.xlu0 %2978 }
0x1947   :  { %v2983_v53 = vmul.f32 %v4826_v39, %v2979_v52 }
0x1949   :  { %2880 = vperm.xlu1 %3634, %v4316_v18   ;;  %2988 = vrot.lane.b32.xlu0 %v2983_v53, %s3853_s3  ;;  %v2835_v18 = vpop.permute.xlu1 %2834 }
0x194d   :  { %3014 = vperm.xlu1 %3634, %v4330_v21   ;;  %2883 = vperm.xlu0 %3635, %v4323_v20   ;;  %v2837_v20 = vpop.permute.xlu0 %2836  ;;  %v2967_v21 = vpop.permute.xlu1 %2966 }
0x194e   :  { %v2972_v63 = vmul.f32 %v4818_v2, %v2967_v21 }
0x1951   :  { %2889 = vrot.lane.b32.xlu1 %v4779_v4, %s3854_s28  ;;  %3017 = vperm.xlu0 %3635, %v4356_v42   ;;  %v2840_v4 = vmul.f32 %v4814_v37, %v2835_v18  ;;  %v2969_v42 = vpop.permute.xlu0 %2968 }
0x1955   :  { %2911 = vrot.lane.b32.xlu1 %v2830_v22, %s3853_s3  ;;  %2891 = vrot.lane.b32.xlu0 %v4781_v35, %s3854_s28  ;;  %v2841_v35 = vmul.f32 %v4820_v3, %v2837_v20 }
0x1959   :  { %3023 = vrot.lane.b32.xlu1 %v4758_v48, %s3854_s28  ;;  %2913 = vrot.lane.b32.xlu0 %v2831_v56, %s3853_s3 }
0x195d   :  { %3025 = vrot.lane.b32.xlu0 %v4760_v12, %s3854_s28  ;;  %v2973_v12 = vmul.f32 %v4826_v39, %v2969_v42 }
0x19b3   :  { %v2855_v43 = vpop.permute.xlu1 %2854 }
0x19b4   :  { %v2860_v62 = vadd.f32 %v2855_v43, %v2840_v4 }
0x19b6   :  { %3795 = vtanh.f32 %v2860_v62 }
0x19b7   :  { %v2987_v22 = vpop.permute.xlu1 %2986  ;;  %v2857_v48 = vpop.permute.xlu0 %2856 }
0x19b8   :  { %v4847_v59 = vadd.f32 %v2987_v22, %v2972_v63  ;;  %v2861_v56 = vadd.f32 %v2857_v48, %v2841_v35 }
0x19ba   :  { %3797 = vtanh.f32 %v4847_v59 }
0x19bb   :  { %3799 = vtanh.f32 %v2861_v56  ;;  %v2989_v13 = vpop.permute.xlu0 %2988 }
0x19bc   :  { %v4851_v38 = vadd.f32 %v2989_v13, %v2973_v12 }
0x19be   :  { %3801 = vtanh.f32 %v4851_v38 }
0x19c3   :  { %v3796_v7 = vpop.eup %3795 }
0x19c4   :  { %2866 = vrot.lane.b32.xlu1 %v3796_v7, %s3853_s3  ;;  %v2881_v27 = vpop.permute.xlu1 %2880 }
0x19c5   :  { %vm2885_vm2 = vcmp.eq.s32.totalorder %v2881_v27, 1 }
0x19c7   :  { %v3798_v61 = vpop.eup %3797 }
0x19c8   :  { %v3800_v60 = vpop.eup %3799  ;;  %2998 = vrot.lane.b32.xlu1 %v3798_v61, %s3853_s3  ;;  %v4874_v25 = vpop.permute.xlu0 %2883 }
0x19c9   :  { %2868 = vrot.lane.b32.xlu0 %v3800_v60, %s3853_s3  ;;  %vm2886_vm7 = vcmp.eq.s32.totalorder %v4874_v25, 1 }
0x19cb   :  { %v3802_v11 = vpop.eup %3801 }
0x19cc   :  { %3045 = vrot.lane.b32.xlu1 %v4805_v36, %s3853_s3  ;;  %v1794_v36 = vsel %vm1750_vm10, %v4397_v58, 0.0  ;;  %v4893_v58 = vpop.permute.xlu0 %3017 }
0x19cd   :  { %3000 = vrot.lane.b32.xlu0 %v3802_v11, %s3853_s3  ;;  %vm3020_vm9 = vcmp.eq.s32.totalorder %v4893_v58, 1 }
0x19d0   :  { %1797 = vrot.lane.b32.xlu1 %v1793_v16, %s3854_s28  ;;  %v2892_v10 = vpop.permute.xlu0 %2891 }
0x19d1   :  { %3047 = vrot.lane.b32.xlu0 %v4810_v17, %s3853_s3  ;;  %v4879_v17 = vpop.permute.xlu1 %3014 }
0x19d2   :  { %vm3019_vm8 = vcmp.eq.s32.totalorder %v4879_v17, 1 }
0x19d4   :  { %1932 = vrot.lane.b32.xlu1 %v1928_v29, %s3854_s28  ;;  %v2914_v24 = vpop.permute.xlu0 %2913 }
0x19d5   :  { %1799 = vrot.lane.b32.xlu0 %v1794_v36, %s3854_s28  ;;  %v2890_v44 = vpop.permute.xlu1 %2889  ;;  %v2918_v33 = vsel %vm2886_vm7, %v2861_v56, %v2914_v24 }
0x19d8   :  { %2175 = vrot.lane.b32.xlu1 %v2171_v55, %s3854_s28  ;;  %v3026_v8 = vpop.permute.xlu0 %3025 }
0x19d9   :  { %1934 = vrot.lane.b32.xlu0 %v1929_v45, %s3854_s28  ;;  %v2912_v19 = vpop.permute.xlu1 %2911 }
0x19da   :  { %v2917_v5 = vsel %vm2885_vm2, %v2860_v62, %v2912_v19 }
0x19dc   :  { %2311 = vrot.lane.b32.xlu1 %v2307_v47, %s3854_s28 }
0x19dd   :  { %2177 = vrot.lane.b32.xlu0 %v2172_v57, %s3854_s28  ;;  %v3024_v32 = vpop.permute.xlu1 %3023 }
0x19e0   :  { %2554 = vrot.lane.b32.xlu1 %v2550_v50, %s3854_s28 }
0x19e1   :  { %2313 = vrot.lane.b32.xlu0 %v2308_v1, %s3854_s28 }
0x19e4   :  { %2690 = vrot.lane.b32.xlu1 %v2686_v6, %s3854_s28 }
0x19e5   :  { %2556 = vrot.lane.b32.xlu0 %v2551_v14, %s3854_s28 }
0x19e8   :  { %2921 = vrot.lane.b32.xlu1 %v2917_v5, %s3855_s5 }
0x19e9   :  { %2692 = vrot.lane.b32.xlu0 %v2687_v15, %s3854_s28 }
0x19ed   :  { %2923 = vrot.lane.b32.xlu0 %v2918_v33, %s3855_s5 }
0x1a36   :  { %v2867_v51 = vpop.permute.xlu1 %2866 }
0x1a37   :  { %v2872_v26 = vmul.f32 %v4814_v37, %v2867_v51 }
0x1a39   :  { %v2895_v23 = vsel %vm2885_vm2, %v2872_v26, %v2890_v44  ;;  %v2929_v46 = vsel %vm2885_vm2, %v2872_v26, 0.0 }
0x1a3a   :  { %v2999_v49 = vpop.permute.xlu1 %2998 }
0x1a3b   :  { %v2869_v9 = vpop.permute.xlu0 %2868  ;;  %v3004_v0 = vmul.f32 %v4818_v2, %v2999_v49 }
0x1a3c   :  { %v2873_v40 = vmul.f32 %v4820_v3, %v2869_v9 }
0x1a3d   :  { %v3029_v20 = vsel %vm3019_vm8, %v3004_v0, %v3024_v32  ;;  %v3063_v43 = vsel %vm3019_vm8, %v3004_v0, 0.0 }
0x1a3e   :  { %v3046_v34 = vpop.permute.xlu1 %3045  ;;  %v2896_v3 = vsel %vm2886_vm7, %v2873_v40, %v2892_v10  ;;  %v2930_v2 = vsel %vm2886_vm7, %v2873_v40, 0.0 }
0x1a3f   :  { %v3001_v54 = vpop.permute.xlu0 %3000  ;;  %v3051_v30 = vsel %vm3019_vm8, %v4847_v59, %v3046_v34 }
0x1a40   :  { %3055 = vrot.lane.b32.xlu1 %v3051_v30, %s3855_s5  ;;  %v3005_v21 = vmul.f32 %v4826_v39, %v3001_v54 }
0x1a42   :  { %v1798_v31 = vpop.permute.xlu1 %1797  ;;  %v3030_v62 = vsel %vm3020_vm9, %v3005_v21, %v3026_v8  ;;  %v3064_v35 = vsel %vm3020_vm9, %v3005_v21, 0.0 }
0x1a43   :  { %v3048_v28 = vpop.permute.xlu0 %3047  ;;  %1803 = vst.msk [vmem:[#allocation10] sm:$0xff] %vm67_vm0, %v1798_v31 }
0x1a44   :  { %v3052_v37 = vsel %vm3020_vm9, %v4851_v38, %v3048_v28  ;;  %2899 = vrot.lane.b32.xlu1 %v2895_v23, %s3854_s28 }
0x1a45   :  { %3057 = vrot.lane.b32.xlu0 %v3052_v37, %s3855_s5 }
0x1a46   :  { %v1933_v41 = vpop.permute.xlu1 %1932 }
0x1a47   :  { %v1800_v52 = vpop.permute.xlu0 %1799  ;;  %1939 = vst.msk [vmem:[#allocation12 + $0x30] sm:$0xff] %vm67_vm0, %v1933_v41 }
0x1a48   :  { %1804 = vst.msk [vmem:[#allocation10 + $0x8] sm:$0xff] %vm67_vm0, %v1800_v52  ;;  %2933 = vrot.lane.b32.xlu1 %v2929_v46, %s3854_s28 }
0x1a49   :  { %2901 = vrot.lane.b32.xlu0 %v2896_v3, %s3854_s28 }
0x1a4a   :  { %v2176_v53 = vpop.permute.xlu1 %2175 }
0x1a4b   :  { %v1935_v18 = vpop.permute.xlu0 %1934  ;;  %2182 = vst.msk [vmem:[#allocation10 + $0x10] sm:$0xff] %vm67_vm0, %v2176_v53 }
0x1a4c   :  { %1940 = vst.msk [vmem:[#allocation12 + $0x38] sm:$0xff] %vm67_vm0, %v1935_v18  ;;  %3033 = vrot.lane.b32.xlu1 %v3029_v20, %s3854_s28 }
0x1a4d   :  { %2935 = vrot.lane.b32.xlu0 %v2930_v2, %s3854_s28 }
0x1a4e   :  { %v2312_v4 = vpop.permute.xlu1 %2311 }
0x1a4f   :  { %v2178_v42 = vpop.permute.xlu0 %2177  ;;  %2318 = vst.msk [vmem:[#allocation12 + $0x20] sm:$0xff] %vm67_vm0, %v2312_v4 }
0x1a50   :  { %2183 = vst.msk [vmem:[#allocation10 + $0x18] sm:$0xff] %vm67_vm0, %v2178_v42  ;;  %3067 = vrot.lane.b32.xlu1 %v3063_v43, %s3854_s28 }
0x1a51   :  { %3035 = vrot.lane.b32.xlu0 %v3030_v62, %s3854_s28 }
0x1a52   :  { %v2555_v39 = vpop.permute.xlu1 %2554 }
0x1a53   :  { %v2314_v63 = vpop.permute.xlu0 %2313  ;;  %2561 = vst.msk [vmem:[#allocation10 + $0x20] sm:$0xff] %vm67_vm0, %v2555_v39 }
0x1a54   :  { %2319 = vst.msk [vmem:[#allocation12 + $0x28] sm:$0xff] %vm67_vm0, %v2314_v63 }
0x1a55   :  { %3069 = vrot.lane.b32.xlu0 %v3064_v35, %s3854_s28 }
0x1a56   :  { %v2691_v22 = vpop.permute.xlu1 %2690 }
0x1a57   :  { %v2557_v48 = vpop.permute.xlu0 %2556  ;;  %2697 = vst.msk [vmem:[#allocation12 + $0x10] sm:$0xff] %vm67_vm0, %v2691_v22 }
0x1a58   :  { %2562 = vst.msk [vmem:[#allocation10 + $0x28] sm:$0xff] %vm67_vm0, %v2557_v48 }
0x1a5a   :  { %v2922_v59 = vpop.permute.xlu1 %2921 }
0x1a5b   :  { %v2693_v56 = vpop.permute.xlu0 %2692  ;;  %2927 = vst.msk [vmem:[#allocation3] sm:$0xff] %vm67_vm0, %v2922_v59 }
0x1a5c   :  { %2698 = vst.msk [vmem:[#allocation12 + $0x18] sm:$0xff] %vm67_vm0, %v2693_v56 }
0x1a5f   :  { %v2924_v12 = vpop.permute.xlu0 %2923 }
0x1a60   :  { %2928 = vst.msk [vmem:[#allocation3 + $0x8] sm:$0xff] %vm67_vm0, %v2924_v12 }
0x1ab2   :  { %v3056_v13 = vpop.permute.xlu1 %3055 }
0x1ab3   :  { %3061 = vst.msk [vmem:[#allocation5] sm:$0xff] %vm67_vm0, %v3056_v13 }
0x1ab6   :  { %v2900_v38 = vpop.permute.xlu1 %2899 }
0x1ab7   :  { %v3058_v7 = vpop.permute.xlu0 %3057  ;;  %2905 = vst.msk [vmem:[#allocation2] sm:$0xff] %vm67_vm0, %v2900_v38 }
0x1ab8   :  { %3062 = vst.msk [vmem:[#allocation5 + $0x8] sm:$0xff] %vm67_vm0, %v3058_v7 }
0x1aba   :  { %v2934_v61 = vpop.permute.xlu1 %2933 }
0x1abb   :  { %v2902_v60 = vpop.permute.xlu0 %2901  ;;  %2940 = vst.msk [vmem:[#allocation10 + $0x30] sm:$0xff] %vm67_vm0, %v2934_v61 }
0x1abc   :  { %2906 = vst.msk [vmem:[#allocation2 + $0x8] sm:$0xff] %vm67_vm0, %v2902_v60 }
0x1abe   :  { %v3034_v11 = vpop.permute.xlu1 %3033 }
0x1abf   :  { %v2936_v16 = vpop.permute.xlu0 %2935  ;;  %3039 = vst.msk [vmem:[#allocation4] sm:$0xff] %vm67_vm0, %v3034_v11 }
0x1ac0   :  { %2941 = vst.msk [vmem:[#allocation10 + $0x38] sm:$0xff] %vm67_vm0, %v2936_v16 }
0x1ac2   :  { %v3068_v27 = vpop.permute.xlu1 %3067 }
0x1ac3   :  { %v3036_v29 = vpop.permute.xlu0 %3035  ;;  %3073 = vst.msk [vmem:[#allocation12] sm:$0xff] %vm67_vm0, %v3068_v27 }
0x1ac4   :  { %3040 = vst.msk [vmem:[#allocation4 + $0x8] sm:$0xff] %vm67_vm0, %v3036_v29 }
0x1ac7   :  { %v3070_v36 = vpop.permute.xlu0 %3069 }
0x1ac8   :  { %3074 = vst.msk [vmem:[#allocation12 + $0x8] sm:$0xff] %vm67_vm0, %v3070_v36 }
0x1ac9 PF:  { %s3856_s6 = smov [#allocation10]  }
0x1aca   :  { %s3080_s3 = sshll.u32 %s3856_s6, 4  ;;  %s3081_s3 = int_to_ptr.vmem [resolvable:$true] %s3080_s3 }
0x1acb   :  { %s3803_s8 = scalar_lea.vmem %s3081_s3, 1024  ;;  %p3808_p3 = scmp.lt.s32.totalorder %s3081_s3, %s3081_s3 }
0x1acc   :  { %p3804_p2 = scmp.ne.s32.totalorder %s3081_s3, %s3803_s8  ;;  %p3809_p4 = scmp.lt.s32.totalorder %s3803_s8, %s3803_s8 }
0x1ace   :  { %p3810_p5 = por %p3809_p4, %p3808_p3 }
0x1ad0   :  { %p3811_p6 = pnand %p3810_p5, %p3804_p2 }
0x1ad2   :  { %3814 = shalt.err (!%p3811_p6)
}
0x1ad3   :  { %s3857_s21 = smov 128   ;;  %s3858_s22 = smov 8  }
0x1ad4   :  { %3086 = dma.vmem_to_hbm [thread:$0]  %s3081_s3, 1024, %s4997_s9, [#allocation11], %s3857_s21, %s3857_s21, %s3858_s22  }
0x1ad5   :  { %s3859_s25 = smov [#allocation12]  }
0x1ad6   :  { %s3097_s26 = sshll.u32 %s3859_s25, 4  ;;  %s3098_s26 = int_to_ptr.vmem [resolvable:$true] %s3097_s26 }
0x1ad7   :  { %s3823_s27 = scalar_lea.vmem %s3098_s26, 1024  ;;  %p3828_p8 = scmp.lt.s32.totalorder %s3098_s26, %s3098_s26 }
0x1ad8   :  { %p3824_p7 = scmp.ne.s32.totalorder %s3098_s26, %s3823_s27  ;;  %p3829_p9 = scmp.lt.s32.totalorder %s3823_s27, %s3823_s27 }
0x1ada   :  { %p3830_p10 = por %p3829_p9, %p3828_p8 }
0x1adc   :  { %p3831_p11 = pnand %p3830_p10, %p3824_p7 }
0x1ade   :  { %3834 = shalt.err (!%p3831_p11)
}
0x1adf   :  { %3103 = dma.vmem_to_hbm [thread:$0]  %s3098_s26, 1024, %s4998_s10, [#allocation13], %s3857_s21, %s3857_s21, %s3858_s22  }
0x1ae0   :  { %3843 = dma.done.wait [#allocation11], 1024  }
0x1ae1   :  { %3844 = vsyncadd [#allocation11], 4294966272 }
0x1ae2   :  { %3845 = dma.done.wait [#allocation13], 1024  }
0x1ae3   :  { %3846 = vsyncadd [#allocation13], 4294966272 }
0x1ae4   :  { %3110 = vsyncpa [#allocation11], 1 }
0x1ae5   :  { %3111 = vsyncpa [#allocation13], 1 }

</bundles_post_ra>
